<compile_context>
chip_gen: v5e
topology: v5e:2x2
jax: 0.10.0
libtpu: 0.0.40
codegen_flags: <defaults>
</compile_context>

<pallas_src>
import jax
import jax.numpy as jnp
from jax.experimental import pallas as pl
from jax.experimental.pallas import tpu as pltpu

_LANE = 128


def _make_kernel(compute_dtype, precision):
    """Whole ACASX forward on one (stacked) batch tile.

    x_ref : (G*5, TBg)   batch on lanes, G groups stacked on sublanes.
    w_l   : (G*out, G*in) block-diagonal weights (compute_dtype, VMEM-resident).
    b_l   : (G*out, 1)    f32 bias, broadcast along lanes.
    o_ref : (G*5, TBg)    f32 output.
    """

    def kernel(x_ref,
               w0, b0, w1, b1, w2, b2, w3, b3, w4, b4, w5, b5, w6, b6,
               o_ref):
        def matmul(w_ref, h):
            # f32 accumulation regardless of operand dtype; precision pinned.
            return jnp.dot(w_ref[...], h,
                           preferred_element_type=jnp.float32,
                           precision=precision)

        h = x_ref[...]
        for w, b in ((w0, b0), (w1, b1), (w2, b2),
                     (w3, b3), (w4, b4), (w5, b5)):
            # bias + ReLU in f32, then store the inter-layer activation in the
            # (narrow) compute dtype to halve ld/st traffic between layers.
            h = jnp.maximum(matmul(w, h) + b[...], 0.0).astype(compute_dtype)
        o_ref[...] = matmul(w6, h) + b6[...]

    return kernel


def _round_up(n, m):
    return ((n + m - 1) // m) * m


def _block_diag(w, g):
    """block_diag(w, w, ..., w) with g copies (PyTorch (out, in) layout)."""
    if g == 1:
        return w
    out_f, in_f = w.shape
    wb = jnp.zeros((g * out_f, g * in_f), w.dtype)
    for k in range(g):
        wb = wb.at[k * out_f:(k + 1) * out_f, k * in_f:(k + 1) * in_f].set(w)
    return wb


def _device_tuning():
    """Returns (block-diag group count, min grid steps) per TPU generation.

    v5-and-older: 128-deep MXU -> G=2 (K=100), single TensorCore.
    v6e:          256-deep MXU -> G=5 (K=250), single TensorCore.
    v7x:          256-deep MXU -> G=5, 2 TensorCores -> want >=2 grid steps.
    """
    try:
        kind = jax.devices()[0].device_kind.lower()
    except Exception:
        return 5, 1
    if any(v in kind for v in ("v2", "v3", "v4", "v5")):
        return 2, 1
    if "v7" in kind:
        return 5, 2
    return 5, 1


def _choose_tiling(B, unit, min_tiles=1, max_tile=8192):
    """Balanced batch tiles: tile_b is a multiple of `unit` (= G*128), padding
    waste is < one tile, and (on v7x) the grid gets >= min_tiles steps so the
    'parallel' axis actually uses both TensorCores."""
    n_units = pl.cdiv(B, unit)
    n_tiles = pl.cdiv(B, max_tile)
    if n_tiles < min_tiles and n_units >= min_tiles:
        n_tiles = min_tiles
    tile_b = pl.cdiv(n_units, n_tiles) * unit
    return tile_b, tile_b * n_tiles


def acasx_forward(x, params, *, tile_b=None, group=None,
                  compute_dtype=jnp.bfloat16, interpret=False):
    """x: (B, 5) f32.  params: 7 x (W, b) with PyTorch shapes W=(out, in),
    b=(out,).  Returns (B, 5) f32, matching the nn.Linear/ReLU chain.

    compute_dtype=jnp.bfloat16 (default): bf16 matmul operands, f32 accumulate
    (fast path).  compute_dtype=jnp.float32: exact f32 with HIGHEST precision.
    """
    B = x.shape[0]
    compute_dtype = jnp.dtype(compute_dtype)
    auto_group, min_tiles = _device_tuning()
    G = group if group is not None else auto_group
    precision = (jax.lax.Precision.DEFAULT if compute_dtype == jnp.bfloat16
                 else jax.lax.Precision.HIGHEST)

    unit = G * _LANE  # tile_b must be divisible by G*128 (lane-dense groups)
    if tile_b is None:
        tile_b, b_pad = _choose_tiling(B, unit, min_tiles=min_tiles)
    else:
        tile_b = max(unit, _round_up(tile_b, unit))
        b_pad = _round_up(B, tile_b)
    n_tiles = b_pad // tile_b
    tbg = tile_b // G           # lane width seen by the kernel
    bpg = b_pad // G

    # --- Input: (B, 5) -> (5, b_pad) -> group-stacked (G*5, b_pad/G). -------
    # Padded batch columns are zeros; after the bias adds they hold finite
    # garbage that is sliced off below (never read as real results).
    x_t = jnp.asarray(x, jnp.float32).T
    if b_pad != B:
        x_t = jnp.pad(x_t, ((0, 0), (0, b_pad - B)))
    x_stacked = (x_t.reshape(5, G, bpg)
                    .transpose(1, 0, 2)
                    .reshape(G * 5, bpg)
                    .astype(compute_dtype))

    # --- Parameters: block-diagonal replication, cast once in the wrapper. --
    flat, flat_specs = [], []
    for w, b in params:
        wb = _block_diag(jnp.asarray(w, jnp.float32), G).astype(compute_dtype)
        bb = jnp.tile(jnp.reshape(jnp.asarray(b, jnp.float32), (-1, 1)),
                      (G, 1))                      # bias stays f32
        flat.extend([wb, bb])
        # Full-shape blocks + constant index_map -> parameters stay resident
        # in VMEM across all batch tiles (Pallas skips re-DMA on same index).
        flat_specs.append(pl.BlockSpec(wb.shape, lambda i: (0, 0)))
        flat_specs.append(pl.BlockSpec(bb.shape, lambda i: (0, 0)))

    out_stacked = pl.pallas_call(
        _make_kernel(compute_dtype, precision),
        out_shape=jax.ShapeDtypeStruct((G * 5, bpg), jnp.float32),
        grid=(n_tiles,),
        in_specs=[pl.BlockSpec((G * 5, tbg), lambda i: (0, i))] + flat_specs,
        out_specs=pl.BlockSpec((G * 5, tbg), lambda i: (0, i)),
        compiler_params=pltpu.CompilerParams(
            dimension_semantics=("parallel",),
            vmem_limit_bytes=32 * 1024 * 1024),
        interpret=interpret,
    )(x_stacked, *flat)

    # --- Un-stack groups and strip batch padding. ---------------------------
    out_t = (out_stacked.reshape(G, 5, bpg)
                        .transpose(1, 0, 2)
                        .reshape(5, b_pad))
    return out_t[:, :B].T


def acasx_reference(x, params, precision=jax.lax.Precision.HIGHEST):
    """Plain-JAX reference (PyTorch semantics: y = x @ W.T + b)."""
    h = jnp.asarray(x, jnp.float32)
    for w, b in params[:-1]:
        h = jnp.maximum(jnp.dot(h, w.T, precision=precision) + b, 0.0)
    w, b = params[-1]
    return jnp.dot(h, w.T, precision=precision) + b


def acasx_apply(x, params, *, small_batch_threshold=256):
    """Dispatcher: for tiny batches the fixed pallas_call overhead exceeds the
    whole network's compute, so use the XLA-fused path; Pallas otherwise."""
    if x.shape[0] <= small_batch_threshold:
        return acasx_reference(x, params)
    return acasx_forward(x, params)


def init_params(key):
    """Deterministic init matching ACASX layer shapes (PyTorch layout)."""
    sizes = [(5, 50)] + [(50, 50)] * 5 + [(50, 5)]
    params = []
    for fan_in, fan_out in sizes:
        key, kw, kb = jax.random.split(key, 3)
        bound = float(fan_in) ** -0.5
        w = jax.random.uniform(kw, (fan_out, fan_in), jnp.float32,
                               -bound, bound)
        b = jax.random.uniform(kb, (fan_out,), jnp.float32, -bound, bound)
        params.append((w, b))
    return params


if __name__ == "__main__":
    key = jax.random.PRNGKey(0)
    key, kx = jax.random.split(key)
    batch = 8
    x = jax.random.normal(kx, (batch, 5), jnp.float32)
    params = init_params(key)

    ref = acasx_reference(x, params)

    # Fast path: bf16 operands, f32 accumulation (deliberate numerics change
    # per perf review -> compare against the f32 reference at bf16 tolerance).
    out_bf16 = acasx_forward(x, params)          # default compute_dtype=bf16
    jax.block_until_ready(out_bf16)
    assert out_bf16.shape == (batch, 5)
    assert jnp.allclose(out_bf16, ref, atol=5e-2, rtol=5e-2), \
        float(jnp.max(jnp.abs(out_bf16 - ref)))

    # Exact path: f32 operands, HIGHEST precision, must match tightly.  This
    # also validates the block-diagonal / group-stacked layout plumbing.
    out_f32 = acasx_forward(x, params, compute_dtype=jnp.float32)
    jax.block_until_ready(out_f32)
    assert jnp.allclose(out_f32, ref, atol=1e-4, rtol=1e-4), \
        float(jnp.max(jnp.abs(out_f32 - ref)))

    print("KERNEL_OK")
</pallas_src>

<mosaic_0001>
module attributes {stable_mosaic.version = 11 : i64} {
  func.func @kernel(%arg0: i32, %arg1: memref<25x128xbf16, #tpu.memory_space<vmem>>, %arg2: memref<250x25xbf16, #tpu.memory_space<vmem>>, %arg3: memref<250x1xf32, #tpu.memory_space<vmem>>, %arg4: memref<250x250xbf16, #tpu.memory_space<vmem>>, %arg5: memref<250x1xf32, #tpu.memory_space<vmem>>, %arg6: memref<250x250xbf16, #tpu.memory_space<vmem>>, %arg7: memref<250x1xf32, #tpu.memory_space<vmem>>, %arg8: memref<250x250xbf16, #tpu.memory_space<vmem>>, %arg9: memref<250x1xf32, #tpu.memory_space<vmem>>, %arg10: memref<250x250xbf16, #tpu.memory_space<vmem>>, %arg11: memref<250x1xf32, #tpu.memory_space<vmem>>, %arg12: memref<250x250xbf16, #tpu.memory_space<vmem>>, %arg13: memref<250x1xf32, #tpu.memory_space<vmem>>, %arg14: memref<25x250xbf16, #tpu.memory_space<vmem>>, %arg15: memref<25x1xf32, #tpu.memory_space<vmem>>, %arg16: memref<25x128xf32, #tpu.memory_space<vmem>>) attributes {dimension_semantics = [#tpu.dimension_semantics<parallel>], iteration_bounds = array<i64: 1>, scalar_prefetch = 0 : i64, scratch_operands = 0 : i64, tpu.core_type = #tpu.core_type<tc>, window_params = [{transform_indices = @transform_0, window_bounds = array<i64: 25, 128>}, {pipeline_mode = #tpu.pipeline_mode<synchronous>, transform_indices = @transform_1, window_bounds = array<i64: 250, 25>}, {pipeline_mode = #tpu.pipeline_mode<synchronous>, transform_indices = @transform_2, window_bounds = array<i64: 250, 1>}, {pipeline_mode = #tpu.pipeline_mode<synchronous>, transform_indices = @transform_3, window_bounds = array<i64: 250, 250>}, {pipeline_mode = #tpu.pipeline_mode<synchronous>, transform_indices = @transform_4, window_bounds = array<i64: 250, 1>}, {pipeline_mode = #tpu.pipeline_mode<synchronous>, transform_indices = @transform_5, window_bounds = array<i64: 250, 250>}, {pipeline_mode = #tpu.pipeline_mode<synchronous>, transform_indices = @transform_6, window_bounds = array<i64: 250, 1>}, {pipeline_mode = #tpu.pipeline_mode<synchronous>, transform_indices = @transform_7, window_bounds = array<i64: 250, 250>}, {pipeline_mode = #tpu.pipeline_mode<synchronous>, transform_indices = @transform_8, window_bounds = array<i64: 250, 1>}, {pipeline_mode = #tpu.pipeline_mode<synchronous>, transform_indices = @transform_9, window_bounds = array<i64: 250, 250>}, {pipeline_mode = #tpu.pipeline_mode<synchronous>, transform_indices = @transform_10, window_bounds = array<i64: 250, 1>}, {pipeline_mode = #tpu.pipeline_mode<synchronous>, transform_indices = @transform_11, window_bounds = array<i64: 250, 250>}, {pipeline_mode = #tpu.pipeline_mode<synchronous>, transform_indices = @transform_12, window_bounds = array<i64: 250, 1>}, {pipeline_mode = #tpu.pipeline_mode<synchronous>, transform_indices = @transform_13, window_bounds = array<i64: 25, 250>}, {pipeline_mode = #tpu.pipeline_mode<synchronous>, transform_indices = @transform_14, window_bounds = array<i64: 25, 1>}, {transform_indices = @transform_15, window_bounds = array<i64: 25, 128>}]} {
    %c0 = arith.constant 0 : index
    %c0_0 = arith.constant 0 : index
    %0 = vector.load %arg1[%c0, %c0_0] : memref<25x128xbf16, #tpu.memory_space<vmem>>, vector<25x128xbf16>
    %c0_1 = arith.constant 0 : index
    %c0_2 = arith.constant 0 : index
    %1 = vector.load %arg2[%c0_1, %c0_2] : memref<250x25xbf16, #tpu.memory_space<vmem>>, vector<250x25xbf16>
    %cst = arith.constant dense<0.000000e+00> : vector<250x128xf32>
    %2 = tpu.matmul %1, %0, %cst {dimension_numbers = #tpu.dot_dimension_numbers<[1], [0], [0], [1], [0, 0, 1, 1], [], []>} : vector<250x25xbf16>, vector<25x128xbf16>, vector<250x128xf32> -> vector<250x128xf32>
    %c0_3 = arith.constant 0 : index
    %c0_4 = arith.constant 0 : index
    %3 = vector.load %arg3[%c0_3, %c0_4] : memref<250x1xf32, #tpu.memory_space<vmem>>, vector<250x1xf32>
    %4 = vector.broadcast %3 : vector<250x1xf32> to vector<250x128xf32>
    %5 = arith.addf %2, %4 : vector<250x128xf32>
    %cst_5 = arith.constant 0.000000e+00 : f32
    %6 = vector.broadcast %cst_5 : f32 to vector<250x128xf32>
    %7 = arith.maximumf %5, %6 : vector<250x128xf32>
    %8 = arith.truncf %7 : vector<250x128xf32> to vector<250x128xbf16>
    %c0_6 = arith.constant 0 : index
    %c0_7 = arith.constant 0 : index
    %9 = vector.load %arg4[%c0_6, %c0_7] : memref<250x250xbf16, #tpu.memory_space<vmem>>, vector<250x250xbf16>
    %cst_8 = arith.constant dense<0.000000e+00> : vector<250x128xf32>
    %10 = tpu.matmul %9, %8, %cst_8 {dimension_numbers = #tpu.dot_dimension_numbers<[1], [0], [0], [1], [0, 0, 1, 1], [], []>} : vector<250x250xbf16>, vector<250x128xbf16>, vector<250x128xf32> -> vector<250x128xf32>
    %c0_9 = arith.constant 0 : index
    %c0_10 = arith.constant 0 : index
    %11 = vector.load %arg5[%c0_9, %c0_10] : memref<250x1xf32, #tpu.memory_space<vmem>>, vector<250x1xf32>
    %12 = vector.broadcast %11 : vector<250x1xf32> to vector<250x128xf32>
    %13 = arith.addf %10, %12 : vector<250x128xf32>
    %cst_11 = arith.constant 0.000000e+00 : f32
    %14 = vector.broadcast %cst_11 : f32 to vector<250x128xf32>
    %15 = arith.maximumf %13, %14 : vector<250x128xf32>
    %16 = arith.truncf %15 : vector<250x128xf32> to vector<250x128xbf16>
    %c0_12 = arith.constant 0 : index
    %c0_13 = arith.constant 0 : index
    %17 = vector.load %arg6[%c0_12, %c0_13] : memref<250x250xbf16, #tpu.memory_space<vmem>>, vector<250x250xbf16>
    %cst_14 = arith.constant dense<0.000000e+00> : vector<250x128xf32>
    %18 = tpu.matmul %17, %16, %cst_14 {dimension_numbers = #tpu.dot_dimension_numbers<[1], [0], [0], [1], [0, 0, 1, 1], [], []>} : vector<250x250xbf16>, vector<250x128xbf16>, vector<250x128xf32> -> vector<250x128xf32>
    %c0_15 = arith.constant 0 : index
    %c0_16 = arith.constant 0 : index
    %19 = vector.load %arg7[%c0_15, %c0_16] : memref<250x1xf32, #tpu.memory_space<vmem>>, vector<250x1xf32>
    %20 = vector.broadcast %19 : vector<250x1xf32> to vector<250x128xf32>
    %21 = arith.addf %18, %20 : vector<250x128xf32>
    %cst_17 = arith.constant 0.000000e+00 : f32
    %22 = vector.broadcast %cst_17 : f32 to vector<250x128xf32>
    %23 = arith.maximumf %21, %22 : vector<250x128xf32>
    %24 = arith.truncf %23 : vector<250x128xf32> to vector<250x128xbf16>
    %c0_18 = arith.constant 0 : index
    %c0_19 = arith.constant 0 : index
    %25 = vector.load %arg8[%c0_18, %c0_19] : memref<250x250xbf16, #tpu.memory_space<vmem>>, vector<250x250xbf16>
    %cst_20 = arith.constant dense<0.000000e+00> : vector<250x128xf32>
    %26 = tpu.matmul %25, %24, %cst_20 {dimension_numbers = #tpu.dot_dimension_numbers<[1], [0], [0], [1], [0, 0, 1, 1], [], []>} : vector<250x250xbf16>, vector<250x128xbf16>, vector<250x128xf32> -> vector<250x128xf32>
    %c0_21 = arith.constant 0 : index
    %c0_22 = arith.constant 0 : index
    %27 = vector.load %arg9[%c0_21, %c0_22] : memref<250x1xf32, #tpu.memory_space<vmem>>, vector<250x1xf32>
    %28 = vector.broadcast %27 : vector<250x1xf32> to vector<250x128xf32>
    %29 = arith.addf %26, %28 : vector<250x128xf32>
    %cst_23 = arith.constant 0.000000e+00 : f32
    %30 = vector.broadcast %cst_23 : f32 to vector<250x128xf32>
    %31 = arith.maximumf %29, %30 : vector<250x128xf32>
    %32 = arith.truncf %31 : vector<250x128xf32> to vector<250x128xbf16>
    %c0_24 = arith.constant 0 : index
    %c0_25 = arith.constant 0 : index
    %33 = vector.load %arg10[%c0_24, %c0_25] : memref<250x250xbf16, #tpu.memory_space<vmem>>, vector<250x250xbf16>
    %cst_26 = arith.constant dense<0.000000e+00> : vector<250x128xf32>
    %34 = tpu.matmul %33, %32, %cst_26 {dimension_numbers = #tpu.dot_dimension_numbers<[1], [0], [0], [1], [0, 0, 1, 1], [], []>} : vector<250x250xbf16>, vector<250x128xbf16>, vector<250x128xf32> -> vector<250x128xf32>
    %c0_27 = arith.constant 0 : index
    %c0_28 = arith.constant 0 : index
    %35 = vector.load %arg11[%c0_27, %c0_28] : memref<250x1xf32, #tpu.memory_space<vmem>>, vector<250x1xf32>
    %36 = vector.broadcast %35 : vector<250x1xf32> to vector<250x128xf32>
    %37 = arith.addf %34, %36 : vector<250x128xf32>
    %cst_29 = arith.constant 0.000000e+00 : f32
    %38 = vector.broadcast %cst_29 : f32 to vector<250x128xf32>
    %39 = arith.maximumf %37, %38 : vector<250x128xf32>
    %40 = arith.truncf %39 : vector<250x128xf32> to vector<250x128xbf16>
    %c0_30 = arith.constant 0 : index
    %c0_31 = arith.constant 0 : index
    %41 = vector.load %arg12[%c0_30, %c0_31] : memref<250x250xbf16, #tpu.memory_space<vmem>>, vector<250x250xbf16>
    %cst_32 = arith.constant dense<0.000000e+00> : vector<250x128xf32>
    %42 = tpu.matmul %41, %40, %cst_32 {dimension_numbers = #tpu.dot_dimension_numbers<[1], [0], [0], [1], [0, 0, 1, 1], [], []>} : vector<250x250xbf16>, vector<250x128xbf16>, vector<250x128xf32> -> vector<250x128xf32>
    %c0_33 = arith.constant 0 : index
    %c0_34 = arith.constant 0 : index
    %43 = vector.load %arg13[%c0_33, %c0_34] : memref<250x1xf32, #tpu.memory_space<vmem>>, vector<250x1xf32>
    %44 = vector.broadcast %43 : vector<250x1xf32> to vector<250x128xf32>
    %45 = arith.addf %42, %44 : vector<250x128xf32>
    %cst_35 = arith.constant 0.000000e+00 : f32
    %46 = vector.broadcast %cst_35 : f32 to vector<250x128xf32>
    %47 = arith.maximumf %45, %46 : vector<250x128xf32>
    %48 = arith.truncf %47 : vector<250x128xf32> to vector<250x128xbf16>
    %c0_36 = arith.constant 0 : index
    %c0_37 = arith.constant 0 : index
    %49 = vector.load %arg14[%c0_36, %c0_37] : memref<25x250xbf16, #tpu.memory_space<vmem>>, vector<25x250xbf16>
    %cst_38 = arith.constant dense<0.000000e+00> : vector<25x128xf32>
    %50 = tpu.matmul %49, %48, %cst_38 {dimension_numbers = #tpu.dot_dimension_numbers<[1], [0], [0], [1], [0, 0, 1, 1], [], []>} : vector<25x250xbf16>, vector<250x128xbf16>, vector<25x128xf32> -> vector<25x128xf32>
    %c0_39 = arith.constant 0 : index
    %c0_40 = arith.constant 0 : index
    %51 = vector.load %arg15[%c0_39, %c0_40] : memref<25x1xf32, #tpu.memory_space<vmem>>, vector<25x1xf32>
    %52 = vector.broadcast %51 : vector<25x1xf32> to vector<25x128xf32>
    %53 = arith.addf %50, %52 : vector<25x128xf32>
    %c0_41 = arith.constant 0 : index
    %c0_42 = arith.constant 0 : index
    %54 = vector.load %arg16[%c0_41, %c0_42] : memref<25x128xf32, #tpu.memory_space<vmem>>, vector<25x128xf32>
    tpu.vector_store %arg16[%c0_41, %c0_42], %53 {strides = array<i32>} : memref<25x128xf32, #tpu.memory_space<vmem>>, vector<25x128xf32>,
    return
  }
  func.func @transform_0(%arg0: i32) -> (i32, i32) {
    %c0_i32 = arith.constant 0 : i32
    %c0_i32_0 = arith.constant 0 : i32
    return %c0_i32, %arg0 : i32, i32
  }
  func.func @transform_1(%arg0: i32) -> (i32, i32) {
    %c0_i32 = arith.constant 0 : i32
    %c0_i32_0 = arith.constant 0 : i32
    %c0_i32_1 = arith.constant 0 : i32
    return %c0_i32, %c0_i32_0 : i32, i32
  }
  func.func @transform_2(%arg0: i32) -> (i32, i32) {
    %c0_i32 = arith.constant 0 : i32
    %c0_i32_0 = arith.constant 0 : i32
    %c0_i32_1 = arith.constant 0 : i32
    return %c0_i32, %c0_i32_0 : i32, i32
  }
  func.func @transform_3(%arg0: i32) -> (i32, i32) {
    %c0_i32 = arith.constant 0 : i32
    %c0_i32_0 = arith.constant 0 : i32
    %c0_i32_1 = arith.constant 0 : i32
    return %c0_i32, %c0_i32_0 : i32, i32
  }
  func.func @transform_4(%arg0: i32) -> (i32, i32) {
    %c0_i32 = arith.constant 0 : i32
    %c0_i32_0 = arith.constant 0 : i32
    %c0_i32_1 = arith.constant 0 : i32
    return %c0_i32, %c0_i32_0 : i32, i32
  }
  func.func @transform_5(%arg0: i32) -> (i32, i32) {
    %c0_i32 = arith.constant 0 : i32
    %c0_i32_0 = arith.constant 0 : i32
    %c0_i32_1 = arith.constant 0 : i32
    return %c0_i32, %c0_i32_0 : i32, i32
  }
  func.func @transform_6(%arg0: i32) -> (i32, i32) {
    %c0_i32 = arith.constant 0 : i32
    %c0_i32_0 = arith.constant 0 : i32
    %c0_i32_1 = arith.constant 0 : i32
    return %c0_i32, %c0_i32_0 : i32, i32
  }
  func.func @transform_7(%arg0: i32) -> (i32, i32) {
    %c0_i32 = arith.constant 0 : i32
    %c0_i32_0 = arith.constant 0 : i32
    %c0_i32_1 = arith.constant 0 : i32
    return %c0_i32, %c0_i32_0 : i32, i32
  }
  func.func @transform_8(%arg0: i32) -> (i32, i32) {
    %c0_i32 = arith.constant 0 : i32
    %c0_i32_0 = arith.constant 0 : i32
    %c0_i32_1 = arith.constant 0 : i32
    return %c0_i32, %c0_i32_0 : i32, i32
  }
  func.func @transform_9(%arg0: i32) -> (i32, i32) {
    %c0_i32 = arith.constant 0 : i32
    %c0_i32_0 = arith.constant 0 : i32
    %c0_i32_1 = arith.constant 0 : i32
    return %c0_i32, %c0_i32_0 : i32, i32
  }
  func.func @transform_10(%arg0: i32) -> (i32, i32) {
    %c0_i32 = arith.constant 0 : i32
    %c0_i32_0 = arith.constant 0 : i32
    %c0_i32_1 = arith.constant 0 : i32
    return %c0_i32, %c0_i32_0 : i32, i32
  }
  func.func @transform_11(%arg0: i32) -> (i32, i32) {
    %c0_i32 = arith.constant 0 : i32
    %c0_i32_0 = arith.constant 0 : i32
    %c0_i32_1 = arith.constant 0 : i32
    return %c0_i32, %c0_i32_0 : i32, i32
  }
  func.func @transform_12(%arg0: i32) -> (i32, i32) {
    %c0_i32 = arith.constant 0 : i32
    %c0_i32_0 = arith.constant 0 : i32
    %c0_i32_1 = arith.constant 0 : i32
    return %c0_i32, %c0_i32_0 : i32, i32
  }
  func.func @transform_13(%arg0: i32) -> (i32, i32) {
    %c0_i32 = arith.constant 0 : i32
    %c0_i32_0 = arith.constant 0 : i32
    %c0_i32_1 = arith.constant 0 : i32
    return %c0_i32, %c0_i32_0 : i32, i32
  }
  func.func @transform_14(%arg0: i32) -> (i32, i32) {
    %c0_i32 = arith.constant 0 : i32
    %c0_i32_0 = arith.constant 0 : i32
    %c0_i32_1 = arith.constant 0 : i32
    return %c0_i32, %c0_i32_0 : i32, i32
  }
  func.func @transform_15(%arg0: i32) -> (i32, i32) {
    %c0_i32 = arith.constant 0 : i32
    %c0_i32_0 = arith.constant 0 : i32
    return %c0_i32, %arg0 : i32, i32
  }
}

</mosaic_0001>

<bundles_post_ra>
// kernel: tpu_custom_call.1
= control target key start
LH: loop header
LB: loop body
LE: loop exit
PB: predicated region body
PF: predicated region fallthrough
CT: control target
= control target key end

     0   :  { %vm420_vm0 = vcmask 1043456   ;;  %vm421_vm1 = vcmask 1044480   ;;  %v4965_v3 = vmov 0   ;;  %v4966_v7 = vmov 65535   ;;  %s7575_s0 = inlined_call_operand.vmem [shape: bf16[25,128], index: 0, kind: input, shape index: {}]   ;;  %s7576_s1 = inlined_call_operand.vmem [shape: bf16[250,25], index: 1, kind: input, shape index: {}]   ;;  %s7577_s2 = inlined_call_operand.vmem [shape: f32[250,1], index: 2, kind: input, shape index: {}]   ;;  %s7578_s3 = inlined_call_operand.vmem [shape: bf16[250,250], index: 3, kind: input, shape index: {}]   ;;  %s7579_s4 = inlined_call_operand.vmem [shape: f32[250,1], index: 4, kind: input, shape index: {}]   ;;  %s7580_s5 = inlined_call_operand.vmem [shape: bf16[250,250], index: 5, kind: input, shape index: {}]   ;;  %s7581_s6 = inlined_call_operand.vmem [shape: f32[250,1], index: 6, kind: input, shape index: {}]   ;;  %s7582_s7 = inlined_call_operand.vmem [shape: bf16[250,250], index: 7, kind: input, shape index: {}]   ;;  %s7583_s8 = inlined_call_operand.vmem [shape: f32[250,1], index: 8, kind: input, shape index: {}]   ;;  %s7584_s9 = inlined_call_operand.vmem [shape: bf16[250,250], index: 9, kind: input, shape index: {}]   ;;  %s7585_s10 = inlined_call_operand.vmem [shape: f32[250,1], index: 10, kind: input, shape index: {}]   ;;  %s7586_s11 = inlined_call_operand.vmem [shape: bf16[250,250], index: 11, kind: input, shape index: {}]   ;;  %s7587_s12 = inlined_call_operand.vmem [shape: f32[250,1], index: 12, kind: input, shape index: {}]   ;;  %s7588_s13 = inlined_call_operand.vmem [shape: bf16[25,250], index: 13, kind: input, shape index: {}]   ;;  %s7589_s14 = inlined_call_operand.vmem [shape: f32[25,1], index: 14, kind: input, shape index: {}]   ;;  %s7590_s15 = inlined_call_operand.hbm [shape: f32[25,128], index: 15, kind: output, shape index: {}]  }
   0x1   :  { %v118_v0 = vld [vmem:[%s7577_s2 + $0xf0] sm:$0xff]  ;;  %v116_v1 = vld [vmem:[%s7577_s2 + $0xe0] sm:$0xff]  ;;  %4938 = vset.pattern.permute.xlu2 %v4965_v3  ;;  %4937 = vset.pattern.permute.xlu1 %v4965_v3  ;;  %v3975_v4 = vld [vmem:[%s7575_s0 + $0x8] sm:$0xf]  ;;  %v422_v8 = vsel %vm420_vm0, 4294967295, %v4966_v7 }
   0x2   :  { %v102_v2 = vld [vmem:[%s7577_s2 + $0x70] sm:$0xff]  ;;  %v4732_v5 = vld [vmem:[%s7575_s0 + $0x8] sm:$0x10]  ;;  %4936 = vset.pattern.permute.xlu0 %v4965_v3  ;;  %262 = vperm.xlu2 %4938, %v116_v1   ;;  %v423_v9 = vsel %vm421_vm1, %v422_v8, 0  ;;  %v4731_v11 = vld [vmem:[%s7575_s0] sm:$0xff] }
   0x3   :  { %v3976_v6 = vor.u32 %v4732_v5, %v3975_v4  ;;  %272 = vperm.xlu0 %4936, %v118_v0   ;;  %192 = vperm.xlu1 %4937, %v102_v2   ;;  %v117_v12 = vld [vmem:[%s7577_s2 + $0xe8] sm:$0xff] }
   0x5   :  { %v425_v10 = vand.u32 %v3976_v6, %v423_v9 }
   0x7   :  { %433 = vmatpush.bf16.msra.mxu0 %v425_v10  ;;  %4913 = vmatpush.bf16.msra.mxu3 %v425_v10 }
   0x8   :  { %20 = vsyncpa [#allocation3], 0  ;;  %v119_v13 = vld [vmem:[%s7577_s2 + $0xf8] sm:$0x3]  ;;  %v4733_v15 = vld [vmem:[%s7576_s1] sm:$0xff]  ;;  %vm371_vm2 = vcmask 203776  }
   0x9   :  { %v103_v14 = vld [vmem:[%s7577_s2 + $0x78] sm:$0xff]  ;;  %v114_v16 = vld [vmem:[%s7577_s2 + $0xd0] sm:$0xff]  ;;  %v101_v17 = vld [vmem:[%s7577_s2 + $0x68] sm:$0xff]  ;;  %vm932_vm3 = vcmask 998400   ;;  %s3893_s19 = sshll.u32 %s7590_s15, 4  ;;  %s3894_s19 = int_to_ptr.hbm [resolvable:$true] %s3893_s19 }
   0xa   :  { %267 = vperm.xlu2 %4938, %v117_v12   ;;  %v100_v18 = vld [vmem:[%s7577_s2 + $0x60] sm:$0xff]  ;;  %v99_v19 = vld [vmem:[%s7577_s2 + $0x58] sm:$0xff]  ;;  %v98_v21 = vld [vmem:[%s7577_s2 + $0x50] sm:$0xff] }
   0xb   :  { %434 = vmatpush.bf16.msra.mxu0 %v4731_v11  ;;  %277 = vperm.xlu0 %4936, %v119_v13   ;;  %v115_v20 = vld [vmem:[%s7577_s2 + $0xd8] sm:$0xff]  ;;  %v4734_v22 = vld [vmem:[%s7576_s1 + $0x8] sm:$0xff]  ;;  %v96_v23 = vld [vmem:[%s7577_s2 + $0x40] sm:$0xff] }
   0xc   :  { %197 = vperm.xlu1 %4937, %v103_v14   ;;  %4914 = vmatpush.bf16.msra.mxu3 %v4731_v11  ;;  %v112_v24 = vld [vmem:[%s7577_s2 + $0xc0] sm:$0xff]  ;;  %v113_v25 = vld [vmem:[%s7577_s2 + $0xc8] sm:$0xff]  ;;  %v111_v26 = vld [vmem:[%s7577_s2 + $0xb8] sm:$0xff] }
   0xd   :  { %v110_v27 = vld [vmem:[%s7577_s2 + $0xb0] sm:$0xff]  ;;  %v97_v28 = vld [vmem:[%s7577_s2 + $0x48] sm:$0xff]  ;;  %v108_v30 = vld [vmem:[%s7577_s2 + $0xa0] sm:$0xff] }
   0xe   :  { %3977 = vmatmul.msk.bf16.vlgmr.msra.gmra.mxu0 %vm371_vm2, %v4733_v15  ;;  %v4735_v29 = vld [vmem:[%s7576_s1 + $0x10] sm:$0xff]  ;;  %v95_v31 = vld [vmem:[%s7577_s2 + $0x38] sm:$0xff]  ;;  %v93_v33 = vld [vmem:[%s7577_s2 + $0x28] sm:$0xff] }
   0xf   :  { %v94_v32 = vld [vmem:[%s7577_s2 + $0x30] sm:$0xff]  ;;  %v109_v34 = vld [vmem:[%s7577_s2 + $0xa8] sm:$0xff]  ;;  %v92_v35 = vld [vmem:[%s7577_s2 + $0x20] sm:$0xff] }
  0x10   :  { %v4736_v36 = vld [vmem:[%s7576_s1 + $0x18] sm:$0xff]  ;;  %v90_v37 = vld [vmem:[%s7577_s2 + $0x10] sm:$0xff]  ;;  %v105_v40 = vld [vmem:[%s7577_s2 + $0x88] sm:$0xff] }
  0x11   :  { %v106_v38 = vld [vmem:[%s7577_s2 + $0x90] sm:$0xff]  ;;  %v107_v39 = vld [vmem:[%s7577_s2 + $0x98] sm:$0xff]  ;;  %v104_v41 = vld [vmem:[%s7577_s2 + $0x80] sm:$0xff] }
  0x12   :  { %252 = vperm.xlu2 %4938, %v114_v16   ;;  %v91_v42 = vld [vmem:[%s7577_s2 + $0x18] sm:$0xff]  ;;  %v4737_v43 = vld [vmem:[%s7576_s1 + $0x20] sm:$0xff]  ;;  %v610_v44 = vld [vmem:[%s7579_s4 + $0x70] sm:$0xff] }
  0x13   :  { %182 = vperm.xlu0 %4936, %v100_v18   ;;  %v89_v45 = vld [vmem:[%s7577_s2 + $0x8] sm:$0xff]  ;;  %v88_v46 = vld [vmem:[%s7577_s2] sm:$0xff]  ;;  %v611_v49 = vld [vmem:[%s7579_s4 + $0x78] sm:$0xff] }
  0x14   :  { %187 = vperm.xlu1 %4937, %v101_v17   ;;  %v609_v47 = vld [vmem:[%s7579_s4 + $0x68] sm:$0xff]  ;;  %v608_v48 = vld [vmem:[%s7579_s4 + $0x60] sm:$0xff]  ;;  %v606_v51 = vld [vmem:[%s7579_s4 + $0x50] sm:$0xff] }
  0x15   :  { %v4738_v50 = vld [vmem:[%s7576_s1 + $0x28] sm:$0xff]  ;;  %v627_v52 = vld [vmem:[%s7579_s4 + $0xf8] sm:$0x3]  ;;  %v626_v53 = vld [vmem:[%s7579_s4 + $0xf0] sm:$0xff] }
  0x16   :  { %v605_v54 = vld [vmem:[%s7579_s4 + $0x48] sm:$0xff]  ;;  %v604_v56 = vld [vmem:[%s7579_s4 + $0x40] sm:$0xff]  ;;  %v607_v57 = vld [vmem:[%s7579_s4 + $0x58] sm:$0xff] }
  0x17   :  { %v4739_v58 = vld [vmem:[%s7576_s1 + $0x30] sm:$0xff]  ;;  %v625_v61 = vld [vmem:[%s7579_s4 + $0xe8] sm:$0xff]  ;;  %v624_v62 = vld [vmem:[%s7579_s4 + $0xe0] sm:$0xff] }
  0x18   :  { %v4747_v59 = vld [vmem:[%s7576_s1 + $0x70] sm:$0xff]  ;;  %v623_v2 = vld [vmem:[%s7579_s4 + $0xd8] sm:$0xff]  ;;  %v620_v12 = vld [vmem:[%s7579_s4 + $0xc0] sm:$0xff] }
  0x19   :  { %3991 = vmatmul.msk.bf16.vlgmr.msra.gmra.mxu3 %vm371_vm2, %v4747_v59  ;;  %v602_v60 = vld [vmem:[%s7579_s4 + $0x30] sm:$0xff]  ;;  %v603_v4 = vld [vmem:[%s7579_s4 + $0x38] sm:$0xff]  ;;  %v601_v13 = vld [vmem:[%s7579_s4 + $0x28] sm:$0xff] }
  0x1a   :  { %177 = vperm.xlu2 %4938, %v99_v19   ;;  %v622_v3 = vld [vmem:[%s7579_s4 + $0xd0] sm:$0xff]  ;;  %v4740_v5 = vld [vmem:[%s7576_s1 + $0x38] sm:$0xff]  ;;  %v600_v14 = vld [vmem:[%s7579_s4 + $0x20] sm:$0xff] }
  0x1b   :  { %257 = vperm.xlu0 %4936, %v115_v20   ;;  %v3967_v6 = vld [vmem:[%s7576_s1 + $0x78] sm:$0xf]  ;;  %v4748_v7 = vld [vmem:[%s7576_s1 + $0x78] sm:$0x10]  ;;  %v598_v19 = vld [vmem:[%s7579_s4 + $0x10] sm:$0xff] }
  0x1c   :  { %172 = vperm.xlu1 %4937, %v98_v21   ;;  %v3968_v9 = vor.u32 %v4748_v7, %v3967_v6  ;;  %v599_v18 = vld [vmem:[%s7579_s4 + $0x18] sm:$0xff]  ;;  %v621_v20 = vld [vmem:[%s7579_s4 + $0xc8] sm:$0xff]  ;;  %v4741_v21 = vld [vmem:[%s7576_s1 + $0x40] sm:$0xff] }
  0x1e   :  { %3978 = vmatmul.msk.bf16.gmra.mxu0 %vm371_vm2, %v4734_v22 }
  0x22   :  { %162 = vperm.xlu2 %4938, %v96_v23  }
  0x23   :  { %242 = vperm.xlu0 %4936, %v112_v24  }
  0x24   :  { %247 = vperm.xlu1 %4937, %v113_v25   ;;  %v596_v25 = vld [vmem:[%s7579_s4] sm:$0xff] }
  0x29   :  { %3992 = vmatmul.msk.bf16.gmra.mxu3 %vm371_vm2, %v3968_v9 }
  0x2a   :  { %237 = vperm.xlu2 %4938, %v111_v26  }
  0x2b   :  { %167 = vperm.xlu0 %4936, %v97_v28   ;;  %v618_v28 = vld [vmem:[%s7579_s4 + $0xb0] sm:$0xff] }
  0x2c   :  { %232 = vperm.xlu1 %4937, %v110_v27   ;;  %v619_v27 = vld [vmem:[%s7579_s4 + $0xb8] sm:$0xff] }
  0x2e   :  { %3979 = vmatmul.msk.bf16.gmra.mxu0 %vm371_vm2, %v4735_v29 }
  0x32   :  { %222 = vperm.xlu2 %4938, %v108_v30  }
  0x33   :  { %152 = vperm.xlu0 %4936, %v94_v32   ;;  %v617_v32 = vld [vmem:[%s7579_s4 + $0xa8] sm:$0xff] }
  0x34   :  { %157 = vperm.xlu1 %4937, %v95_v31  }
  0x3a   :  { %147 = vperm.xlu2 %4938, %v93_v33   ;;  %v616_v33 = vld [vmem:[%s7579_s4 + $0xa0] sm:$0xff] }
  0x3b   :  { %227 = vperm.xlu0 %4936, %v109_v34   ;;  %v597_v34 = vld [vmem:[%s7579_s4 + $0x8] sm:$0xff] }
  0x3c   :  { %142 = vperm.xlu1 %4937, %v92_v35   ;;  %v4742_v35 = vld [vmem:[%s7576_s1 + $0x48] sm:$0xff] }
  0x3e   :  { %3980 = vmatmul.msk.bf16.gmra.mxu0 %vm371_vm2, %v4736_v36 }
  0x42   :  { %132 = vperm.xlu2 %4938, %v90_v37  }
  0x43   :  { %212 = vperm.xlu0 %4936, %v106_v38  }
  0x44   :  { %217 = vperm.xlu1 %4937, %v107_v39  }
  0x4a   :  { %207 = vperm.xlu2 %4938, %v105_v40   ;;  %v612_v40 = vld [vmem:[%s7579_s4 + $0x80] sm:$0xff] }
  0x4b   :  { %137 = vperm.xlu0 %4936, %v91_v42   ;;  %v614_v42 = vld [vmem:[%s7579_s4 + $0x90] sm:$0xff] }
  0x4c   :  { %202 = vperm.xlu1 %4937, %v104_v41   ;;  %v615_v41 = vld [vmem:[%s7579_s4 + $0x98] sm:$0xff] }
  0x4e   :  { %3981 = vmatmul.msk.bf16.gmra.mxu0 %vm371_vm2, %v4737_v43 }
  0x52   :  { %700 = vperm.xlu2 %4938, %v610_v44  }
  0x53   :  { %122 = vperm.xlu0 %4936, %v88_v46  }
  0x54   :  { %127 = vperm.xlu1 %4937, %v89_v45  }
  0x5a   :  { %695 = vperm.xlu2 %4938, %v609_v47   ;;  %v1273_v47 = vld [vmem:[%s7581_s6 + $0xf8] sm:$0x3] }
  0x5b   :  { %705 = vperm.xlu0 %4936, %v611_v49   ;;  %v613_v49 = vld [vmem:[%s7579_s4 + $0x88] sm:$0xff] }
  0x5c   :  { %690 = vperm.xlu1 %4937, %v608_v48   ;;  %v5204_v55 = vpop.permute.xlu2 %262  ;;  %v1272_v48 = vld [vmem:[%s7581_s6 + $0xf0] sm:$0xff] }
  0x5e   :  { %3982 = vmatmul.msk.bf16.gmra.mxu0 %vm371_vm2, %v4738_v50  ;;  %v4743_v50 = vld [vmem:[%s7576_s1 + $0x50] sm:$0xff] }
  0x62   :  { %680 = vperm.xlu2 %4938, %v606_v51  }
  0x63   :  { %780 = vperm.xlu0 %4936, %v626_v53  }
  0x64   :  { %785 = vperm.xlu1 %4937, %v627_v52   ;;  %v5229_v63 = vpop.permute.xlu2 %267 }
  0x6a   :  { %675 = vperm.xlu2 %4938, %v605_v54  }
  0x6b   :  { %685 = vperm.xlu0 %4936, %v607_v57   ;;  %v1257_v57 = vld [vmem:[%s7581_s6 + $0x78] sm:$0xff] }
  0x6c   :  { %670 = vperm.xlu1 %4937, %v604_v56   ;;  %v5253_v8 = vpop.permute.xlu2 %252  ;;  %v1270_v56 = vld [vmem:[%s7581_s6 + $0xe0] sm:$0xff] }
  0x6e   :  { %3983 = vmatmul.msk.bf16.gmra.mxu0 %vm371_vm2, %v4739_v58  ;;  %v1256_v58 = vld [vmem:[%s7581_s6 + $0x70] sm:$0xff] }
  0x72   :  { %660 = vperm.xlu2 %4938, %v602_v60  }
  0x73   :  { %770 = vperm.xlu0 %4936, %v624_v62   ;;  %v1255_v62 = vld [vmem:[%s7581_s6 + $0x68] sm:$0xff] }
  0x74   :  { %775 = vperm.xlu1 %4937, %v625_v61   ;;  %v5274_v17 = vpop.permute.xlu2 %177 }
  0x75   :  { %v5231_v0 = vpop.permute.xlu0 %272  ;;  %v5233_v1 = vpop.permute.xlu1 %192 }
  0x7a   :  { %765 = vperm.xlu2 %4938, %v623_v2   ;;  %v1254_v2 = vld [vmem:[%s7581_s6 + $0x60] sm:$0xff] }
  0x7b   :  { %665 = vperm.xlu0 %4936, %v603_v4  }
  0x7c   :  { %760 = vperm.xlu1 %4937, %v622_v3   ;;  %v5298_v26 = vpop.permute.xlu2 %162  ;;  %v1271_v3 = vld [vmem:[%s7581_s6 + $0xe8] sm:$0xff] }
  0x7d   :  { %v5255_v10 = vpop.permute.xlu0 %277 }
  0x7e   :  { %v5257_v11 = vpop.permute.xlu1 %197  ;;  %3984 = vmatmul.msk.bf16.gmra.mxu0 %vm371_vm2, %v4740_v5  ;;  %v4744_v5 = vld [vmem:[%s7576_s1 + $0x58] sm:$0xff] }
  0x82   :  { %750 = vperm.xlu2 %4938, %v620_v12  }
  0x83   :  { %650 = vperm.xlu0 %4936, %v600_v14   ;;  %v1252_v14 = vld [vmem:[%s7581_s6 + $0x50] sm:$0xff] }
  0x84   :  { %655 = vperm.xlu1 %4937, %v601_v13   ;;  %v5324_v36 = vpop.permute.xlu2 %237 }
  0x85   :  { %v5272_v16 = vpop.permute.xlu0 %182 }
  0x86   :  { %v5270_v15 = vpop.permute.xlu1 %187 }
  0x8a   :  { %645 = vperm.xlu2 %4938, %v599_v18  }
  0x8b   :  { %v5288_v22 = vpop.f32.mrf.mxu0  ;;  %755 = vperm.xlu0 %4936, %v621_v20   ;;  %v1269_v20 = vld [vmem:[%s7581_s6 + $0xd8] sm:$0xff] }
  0x8c   :  { %640 = vperm.xlu1 %4937, %v598_v19   ;;  %v5340_v44 = vpop.permute.xlu2 %222 }
  0x8d   :  { %v5290_v23 = vpop.permute.xlu0 %257 }
  0x8e   :  { %v5292_v24 = vpop.permute.xlu1 %172  ;;  %3985 = vmatmul.msk.bf16.gmra.mxu0 %vm371_vm2, %v4741_v21  ;;  %v1268_v21 = vld [vmem:[%s7581_s6 + $0xd0] sm:$0xff] }
  0x92   :  { %630 = vperm.xlu2 %4938, %v596_v25  }
  0x93   :  { %v5306_v29 = vpop.f32.mrf.mxu0  ;;  %740 = vperm.xlu0 %4936, %v618_v28  }
  0x94   :  { %745 = vperm.xlu1 %4937, %v619_v27   ;;  %v5365_v54 = vpop.permute.xlu2 %147 }
  0x95   :  { %v5308_v30 = vpop.permute.xlu0 %242 }
  0x96   :  { %v5310_v31 = vpop.permute.xlu1 %247 }
  0x9a   :  { %735 = vperm.xlu2 %4938, %v617_v32  }
  0x9b   :  { %v441_v37 = vpop.f32.mrf.mxu0  ;;  %635 = vperm.xlu0 %4936, %v597_v34  }
  0x9c   :  { %730 = vperm.xlu1 %4937, %v616_v33   ;;  %v133_v4 = vpop.permute.xlu2 %132 }
  0x9d   :  { %v5328_v39 = vpop.permute.xlu0 %167  ;;  %v442_v7 = vadd.f32 %v441_v37, %v133_v4  ;;  %v1263_v4 = vld [vmem:[%s7581_s6 + $0xa8] sm:$0xff] }
  0x9e   :  { %v5326_v38 = vpop.permute.xlu1 %232  ;;  %3986 = vmatmul.msk.bf16.gmra.mxu0 %vm371_vm2, %v4742_v35  ;;  %v1267_v35 = vld [vmem:[%s7581_s6 + $0xc8] sm:$0xff] }
  0x9f   :  { %v518_v18 = vmax.f32 %v442_v7, 0.0 }
  0xa2   :  { %710 = vperm.xlu2 %4938, %v612_v40  }
  0xa3   :  { %v443_v43 = vpop.f32.mrf.mxu0  ;;  %720 = vperm.xlu0 %4936, %v614_v42   ;;  %v1253_v42 = vld [vmem:[%s7581_s6 + $0x58] sm:$0xff] }
  0xa4   :  { %725 = vperm.xlu1 %4937, %v615_v41   ;;  %v1266_v41 = vld [vmem:[%s7581_s6 + $0xc0] sm:$0xff] }
  0xa5   :  { %v5344_v46 = vpop.permute.xlu0 %152 }
  0xa6   :  { %v5342_v45 = vpop.permute.xlu1 %157 }
  0xaa   :  { %1431 = vperm.xlu2 %4938, %v1273_v47   ;;  %v1264_v47 = vld [vmem:[%s7581_s6 + $0xb0] sm:$0xff] }
  0xab   :  { %v5358_v51 = vpop.f32.mrf.mxu0  ;;  %715 = vperm.xlu0 %4936, %v613_v49   ;;  %v1250_v49 = vld [vmem:[%s7581_s6 + $0x40] sm:$0xff] }
  0xac   :  { %1426 = vperm.xlu1 %4937, %v1272_v48   ;;  %v1251_v48 = vld [vmem:[%s7581_s6 + $0x48] sm:$0xff] }
  0xad   :  { %v5360_v52 = vpop.permute.xlu0 %227 }
  0xae   :  { %v5362_v53 = vpop.permute.xlu1 %142  ;;  %3987 = vmatmul.msk.bf16.gmra.mxu0 %vm371_vm2, %v4743_v50 }
  0xb2   :  { %1416 = vperm.xlu2 %4938, %v1270_v56   ;;  %v1249_v56 = vld [vmem:[%s7581_s6 + $0x38] sm:$0xff] }
  0xb3   :  { %v5376_v59 = vpop.f32.mrf.mxu0  ;;  %1346 = vperm.xlu0 %4936, %v1256_v58   ;;  %v1265_v58 = vld [vmem:[%s7581_s6 + $0xb8] sm:$0xff] }
  0xb4   :  { %1351 = vperm.xlu1 %4937, %v1257_v57   ;;  %v1248_v57 = vld [vmem:[%s7581_s6 + $0x30] sm:$0xff] }
  0xb5   :  { %v5378_v60 = vpop.permute.xlu0 %212 }
  0xb6   :  { %v5380_v61 = vpop.permute.xlu1 %217 }
  0xba   :  { %1341 = vperm.xlu2 %4938, %v1255_v62   ;;  %v4746_v62 = vld [vmem:[%s7576_s1 + $0x68] sm:$0xff] }
  0xbb   :  { %v5394_v6 = vpop.f32.mrf.mxu0  ;;  %1421 = vperm.xlu0 %4936, %v1271_v3   ;;  %v1246_v3 = vld [vmem:[%s7581_s6 + $0x20] sm:$0xff] }
  0xbc   :  { %1336 = vperm.xlu1 %4937, %v1254_v2  }
  0xbd   :  { %v138_v12 = vpop.permute.xlu0 %137 }
  0xbe   :  { %v5396_v9 = vpop.permute.xlu1 %202  ;;  %3988 = vmatmul.msk.bf16.gmra.mxu0 %vm371_vm2, %v4744_v5  ;;  %v444_v13 = vadd.f32 %v443_v43, %v138_v12  ;;  %v1262_v5 = vld [vmem:[%s7581_s6 + $0xa0] sm:$0xff]  ;;  %v1261_v12 = vld [vmem:[%s7581_s6 + $0x98] sm:$0xff] }
  0xc0   :  { %v519_v19 = vmax.f32 %v444_v13, 0.0  ;;  %v1260_v13 = vld [vmem:[%s7581_s6 + $0x90] sm:$0xff] }
  0xc2   :  { %1326 = vperm.xlu2 %4938, %v1252_v14   ;;  %v5410_v27 = vpack.c.bf16 %v519_v19, %v518_v18  ;;  %v1247_v14 = vld [vmem:[%s7581_s6 + $0x28] sm:$0xff]  ;;  %v1258_v19 = vld [vmem:[%s7581_s6 + $0x80] sm:$0xff] }
  0xc3   :  { %v5408_v25 = vpop.f32.mrf.mxu0  ;;  %1406 = vperm.xlu0 %4936, %v1268_v21   ;;  %v1244_v21 = vld [vmem:[%s7581_s6 + $0x10] sm:$0xff] }
  0xc4   :  { %1411 = vperm.xlu1 %4937, %v1269_v20   ;;  %v1245_v20 = vld [vmem:[%s7581_s6 + $0x18] sm:$0xff] }
  0xc5   :  { %v123_v32 = vpop.permute.xlu0 %122 }
  0xc6   :  { %v128_v28 = vpop.permute.xlu1 %127  ;;  %v437_v34 = vadd.f32 %v5288_v22, %v123_v32 }
  0xc7   :  { %v439_v33 = vadd.f32 %v5306_v29, %v128_v28  ;;  %v4745_v29 = vld [vmem:[%s7576_s1 + $0x60] sm:$0xff]  ;;  %v506_v28 = vpop.f32.mrf.mxu3 }
  0xc8   :  { %v516_v40 = vmax.f32 %v437_v34, 0.0  ;;  %v1242_v34 = vld [vmem:[%s7581_s6] sm:$0xff] }
  0xc9   :  { %v517_v37 = vmax.f32 %v439_v33, 0.0  ;;  %v1243_v33 = vld [vmem:[%s7581_s6 + $0x8] sm:$0xff] }
  0xca   :  { %1401 = vperm.xlu2 %4938, %v1267_v35   ;;  %v1259_v35 = vld [vmem:[%s7581_s6 + $0x88] sm:$0xff] }
  0xcb   :  { %v5426_v43 = vpop.f32.mrf.mxu0  ;;  %v5428_v22 = vpack.c.bf16 %v517_v37, %v516_v40  ;;  %1331 = vperm.xlu0 %4936, %v1253_v42   ;;  %v1902_v42 = vld [vmem:[%s7583_s8 + $0x78] sm:$0xff] }
  0xcc   :  { %1396 = vperm.xlu1 %4937, %v1266_v41   ;;  %v1899_v41 = vld [vmem:[%s7583_s8 + $0x60] sm:$0xff] }
  0xce   :  { %3989 = vmatmul.msk.bf16.gmra.mxu0 %vm371_vm2, %v4745_v29  ;;  %v1901_v29 = vld [vmem:[%s7583_s8 + $0x70] sm:$0xff] }
  0xcf   :  { %v508_v37 = vpop.f32.mrf.mxu3 }
  0xd2   :  { %1386 = vperm.xlu2 %4938, %v1264_v47  }
  0xd3   :  { %v5440_v50 = vpop.f32.mrf.mxu0  ;;  %1316 = vperm.xlu0 %4936, %v1250_v49  }
  0xd4   :  { %1321 = vperm.xlu1 %4937, %v1251_v48  }
  0xd7   :  { %v511_v48 = vpop.f32.mrf.mxu3 }
  0xda   :  { %1311 = vperm.xlu2 %4938, %v1249_v56  }
  0xdb   :  { %v461_v2 = vpop.f32.mrf.mxu0  ;;  %1391 = vperm.xlu0 %4936, %v1265_v58  }
  0xdc   :  { %1306 = vperm.xlu1 %4937, %v1248_v57  }
  0xde   :  { %3990 = vmatmul.msk.bf16.gmra.mxu0 %vm371_vm2, %v4746_v62 }
  0xe2   :  { %1296 = vperm.xlu2 %4938, %v1246_v3  }
  0xe3   :  { %v463_v7 = vpop.f32.mrf.mxu0  ;;  %1376 = vperm.xlu0 %4936, %v1262_v5  }
  0xe4   :  { %1381 = vperm.xlu1 %4937, %v1263_v4   ;;  %v512_v4 = vadd.f32 %v511_v48, %v5231_v0  ;;  %v464_v5 = vadd.f32 %v463_v7, %v5274_v17  ;;  %v513_v0 = vpop.f32.mrf.mxu3  ;;  %v459_v17 = vadd.f32 %v5440_v50, %v5328_v39  ;;  %v454_v39 = vadd.f32 %v5408_v25, %v5342_v45 }
  0xe5   :  { %v452_v45 = vadd.f32 %v5394_v6, %v5344_v46  ;;  %v447_v48 = vadd.f32 %v5358_v51, %v5362_v53 }
  0xea   :  { %1371 = vperm.xlu2 %4938, %v1261_v12  }
  0xeb   :  { %v466_v18 = vpop.f32.mrf.mxu0  ;;  %1301 = vperm.xlu0 %4936, %v1247_v14  }
  0xec   :  { %1366 = vperm.xlu1 %4937, %v1260_v13   ;;  %v467_v58 = vadd.f32 %v466_v18, %v5272_v16  ;;  %v462_v16 = vadd.f32 %v461_v2, %v5292_v24  ;;  %v546_v18 = vmax.f32 %v512_v4, 0.0  ;;  %v509_v24 = vadd.f32 %v508_v37, %v5229_v63  ;;  %v1898_v63 = vld [vmem:[%s7583_s8 + $0x58] sm:$0xff]  ;;  %v3995_v4 = vld [vmem:[%s7578_s3] sm:$0xf] }
  0xee   :  { %v528_v14 = vmax.f32 %v467_v58, 0.0  ;;  %v1913_v58 = vld [vmem:[%s7583_s8 + $0xd0] sm:$0xff] }
  0xf2   :  { %1356 = vperm.xlu2 %4938, %v1258_v19   ;;  %v514_v19 = vadd.f32 %v513_v0, %v5255_v10  ;;  %v525_v10 = vmax.f32 %v459_v17, 0.0  ;;  %v1912_v17 = vld [vmem:[%s7583_s8 + $0xc8] sm:$0xff] }
  0xf3   :  { %v468_v32 = vpop.f32.mrf.mxu0  ;;  %1286 = vperm.xlu0 %4936, %v1244_v21  }
  0xf4   :  { %1291 = vperm.xlu1 %4937, %v1245_v20   ;;  %v469_v56 = vadd.f32 %v468_v32, %v5270_v15  ;;  %v1900_v15 = vld [vmem:[%s7583_s8 + $0x68] sm:$0xff]  ;;  %v527_v20 = vmax.f32 %v464_v5, 0.0  ;;  %v507_v32 = vadd.f32 %v506_v28, %v5204_v55  ;;  %v547_v2 = vmax.f32 %v514_v19, 0.0  ;;  %v1895_v55 = vld [vmem:[%s7583_s8 + $0x40] sm:$0xff]  ;;  %v4003_v19 = vld [vmem:[%s7578_s3 + $0x10] sm:$0xf] }
  0xf5   :  { %v545_v28 = vmax.f32 %v509_v24, 0.0  ;;  %v4750_v5 = vld [vmem:[%s7578_s3 + $0x4] sm:$0xf0] }
  0xf6   :  { %v529_v12 = vmax.f32 %v469_v56, 0.0  ;;  %v563_v50 = vpack.c.bf16 %v547_v2, %v546_v18  ;;  %v1916_v56 = vld [vmem:[%s7583_s8 + $0xe8] sm:$0xff]  ;;  %v1911_v18 = vld [vmem:[%s7583_s8 + $0xc0] sm:$0xff] }
  0xf8   :  { %v554_v21 = vpack.c.bf16 %v529_v12, %v528_v14  ;;  %v4099_v12 = vld [vmem:[%s7578_s3 + $0xd0] sm:$0xf]  ;;  %v1914_v14 = vld [vmem:[%s7583_s8 + $0xd8] sm:$0xff] }
  0xfa   :  { %1281 = vperm.xlu2 %4938, %v1243_v33   ;;  %v457_v33 = vadd.f32 %v5426_v43, %v5298_v26  ;;  %v1897_v26 = vld [vmem:[%s7583_s8 + $0x50] sm:$0xff]  ;;  %v982_v43 = vsel %vm421_vm1, %v563_v50, 0  ;;  %v1890_v50 = vld [vmem:[%s7583_s8 + $0x18] sm:$0xff] }
  0xfb   :  { %v471_v40 = vpop.f32.mrf.mxu0  ;;  %1361 = vperm.xlu0 %4936, %v1259_v35   ;;  %v544_v35 = vmax.f32 %v507_v32, 0.0  ;;  %1073 = vmatpush.bf16.msra.mxu2 %v982_v43  ;;  %v4778_v32 = vld [vmem:[%s7578_s3 + $0xe4] sm:$0xf0] }
  0xfc   :  { %1276 = vperm.xlu1 %4937, %v1242_v34   ;;  %v472_v47 = vadd.f32 %v471_v40, %v5233_v1  ;;  %v1918_v1 = vld [vmem:[%s7583_s8 + $0xf8] sm:$0x3]  ;;  %v526_v34 = vmax.f32 %v462_v16, 0.0  ;;  %v524_v25 = vmax.f32 %v457_v33, 0.0  ;;  %v1891_v16 = vld [vmem:[%s7583_s8 + $0x20] sm:$0xff] }
  0xfe   :  { %v530_v62 = vmax.f32 %v472_v47, 0.0  ;;  %v553_v40 = vpack.c.bf16 %v527_v20, %v526_v34  ;;  %v562_v47 = vpack.c.bf16 %v545_v28, %v544_v35  ;;  %v4752_v20 = vld [vmem:[%s7578_s3 + $0x14] sm:$0xf0]  ;;  %v1907_v35 = vld [vmem:[%s7583_s8 + $0xa0] sm:$0xff] }
  0xff   :  { %v4004_v2 = vor.u32 %v4752_v20, %v4003_v19  ;;  %v1910_v34 = vld [vmem:[%s7583_s8 + $0xb8] sm:$0xff]  ;;  %v4011_v28 = vld [vmem:[%s7578_s3 + $0x20] sm:$0xf] }
 0x100   :  { %1074 = vmatpush.bf16.msra.mxu2 %v562_v47 }
 0x102   :  { %1981 = vperm.xlu2 %4938, %v1899_v41   ;;  %v449_v41 = vadd.f32 %v5376_v59, %v5365_v54  ;;  %v1915_v54 = vld [vmem:[%s7583_s8 + $0xe0] sm:$0xff]  ;;  %v1896_v59 = vld [vmem:[%s7583_s8 + $0x48] sm:$0xff] }
 0x103   :  { %v473_v49 = vpop.f32.mrf.mxu0  ;;  %1991 = vperm.xlu0 %4936, %v1901_v29   ;;  %v552_v29 = vpack.c.bf16 %v525_v10, %v524_v25 }
 0x104   :  { %v474_v57 = vadd.f32 %v473_v49, %v5257_v11  ;;  %1996 = vperm.xlu1 %4937, %v1902_v42   ;;  %v1917_v11 = vld [vmem:[%s7583_s8 + $0xf0] sm:$0xff]  ;;  %v523_v42 = vmax.f32 %v454_v39, 0.0  ;;  %v522_v49 = vmax.f32 %v452_v45, 0.0  ;;  %v521_v46 = vmax.f32 %v449_v41, 0.0 }
 0x105   :  { %v1909_v39 = vld [vmem:[%s7583_s8 + $0xb0] sm:$0xff] }
 0x106   :  { %v531_v3 = vmax.f32 %v474_v57, 0.0  ;;  %v551_v6 = vpack.c.bf16 %v523_v42, %v522_v49  ;;  %v520_v57 = vmax.f32 %v447_v48, 0.0  ;;  %v1906_v42 = vld [vmem:[%s7583_s8 + $0x98] sm:$0xff]  ;;  %v2562_v49 = vld [vmem:[%s7585_s10 + $0xf0] sm:$0xff] }
 0x108   :  { %v555_v13 = vpack.c.bf16 %v531_v3, %v530_v62  ;;  %v550_v53 = vpack.c.bf16 %v521_v46, %v520_v57  ;;  %v1894_v62 = vld [vmem:[%s7583_s8 + $0x38] sm:$0xff]  ;;  %v1893_v3 = vld [vmem:[%s7583_s8 + $0x30] sm:$0xff]  ;;  %v1904_v46 = vld [vmem:[%s7583_s8 + $0x88] sm:$0xff] }
 0x10a   :  { %984 = vmatpush.bf16.msra.mxu1 %v555_v13  ;;  %4915 = vmatpush.bf16.msrb.mxu3 %v555_v13  ;;  %v4776_v13 = vld [vmem:[%s7578_s3 + $0xd4] sm:$0xf0] }
 0x10b   :  { %v5518_v7 = vpop.f32.mrf.mxu0  ;;  %2076 = vperm.xlu2 %4938, %v1918_v1   ;;  %1986 = vperm.xlu0 %4936, %v1900_v15   ;;  %v4100_v15 = vor.u32 %v4776_v13, %v4099_v12  ;;  %v2560_v12 = vld [vmem:[%s7585_s10 + $0xe0] sm:$0xff] }
 0x10c   :  { %2071 = vperm.xlu1 %4937, %v1917_v11   ;;  %v3996_v11 = vor.u32 %v4750_v5, %v3995_v4  ;;  %v2544_v4 = vld [vmem:[%s7585_s10 + $0x60] sm:$0xff]  ;;  %v2561_v5 = vld [vmem:[%s7585_s10 + $0xe8] sm:$0xff] }
 0x10e   :  { %985 = vmatpush.bf16.msra.mxu1 %v554_v21  ;;  %4916 = vmatpush.bf16.msrb.mxu3 %v554_v21  ;;  %v4107_v21 = vld [vmem:[%s7578_s3 + $0xe0] sm:$0xf] }
 0x10f   :  { %v4108_v33 = vor.u32 %v4778_v32, %v4107_v21  ;;  %v2559_v32 = vld [vmem:[%s7585_s10 + $0xd8] sm:$0xff] }
 0x112   :  { %986 = vmatpush.bf16.msra.mxu1 %v553_v40  ;;  %4917 = vmatpush.bf16.msrb.mxu3 %v553_v40  ;;  %v1888_v40 = vld [vmem:[%s7583_s8 + $0x8] sm:$0xff] }
 0x113   :  { %v5539_v37 = vpop.f32.mrf.mxu0  ;;  %1961 = vperm.xlu2 %4938, %v1895_v55   ;;  %1971 = vperm.xlu0 %4936, %v1897_v26   ;;  %v1887_v55 = vld [vmem:[%s7583_s8] sm:$0xff]  ;;  %v4115_v26 = vld [vmem:[%s7578_s3 + $0xf0] sm:$0xf] }
 0x114   :  { %1976 = vperm.xlu1 %4937, %v1898_v63   ;;  %v4754_v63 = vld [vmem:[%s7578_s3 + $0x24] sm:$0xf0] }
 0x115   :  { %v4012_v25 = vor.u32 %v4754_v63, %v4011_v28 }
 0x116   :  { %987 = vmatpush.bf16.msra.mxu1 %v552_v29  ;;  %4918 = vmatpush.bf16.msrb.mxu3 %v552_v29  ;;  %v1905_v29 = vld [vmem:[%s7583_s8 + $0x90] sm:$0xff] }
 0x11a   :  { %988 = vmatpush.bf16.msra.mxu1 %v551_v6  ;;  %4919 = vmatpush.bf16.msrb.mxu3 %v551_v6  ;;  %v1903_v6 = vld [vmem:[%s7583_s8 + $0x80] sm:$0xff] }
 0x11b   :  { %v5554_v51 = vpop.f32.mrf.mxu0  ;;  %2066 = vperm.xlu2 %4938, %v1916_v56   ;;  %1966 = vperm.xlu0 %4936, %v1896_v59   ;;  %v4019_v56 = vld [vmem:[%s7578_s3 + $0x30] sm:$0xf] }
 0x11c   :  { %2061 = vperm.xlu1 %4937, %v1915_v54   ;;  %v4756_v54 = vld [vmem:[%s7578_s3 + $0x34] sm:$0xf0] }
 0x11d   :  { %v4020_v57 = vor.u32 %v4756_v54, %v4019_v56  ;;  %v2538_v56 = vld [vmem:[%s7585_s10 + $0x30] sm:$0xff]  ;;  %v2555_v54 = vld [vmem:[%s7585_s10 + $0xb8] sm:$0xff] }
 0x11e   :  { %989 = vmatpush.bf16.msra.mxu1 %v550_v53  ;;  %4920 = vmatpush.bf16.msrb.mxu3 %v550_v53  ;;  %v2547_v53 = vld [vmem:[%s7585_s10 + $0x78] sm:$0xff] }
 0x122   :  { %990 = vmatpush.bf16.msra.mxu1 %v5410_v27  ;;  %4921 = vmatpush.bf16.msrb.mxu3 %v5410_v27  ;;  %v1892_v27 = vld [vmem:[%s7583_s8 + $0x28] sm:$0xff] }
 0x123   :  { %v5579_v1 = vpop.f32.mrf.mxu0  ;;  %2051 = vperm.xlu2 %4938, %v1913_v58   ;;  %1951 = vperm.xlu0 %4936, %v1893_v3   ;;  %v2546_v58 = vld [vmem:[%s7585_s10 + $0x70] sm:$0xff] }
 0x124   :  { %1956 = vperm.xlu1 %4937, %v1894_v62   ;;  %v2563_v62 = vld [vmem:[%s7585_s10 + $0xf8] sm:$0x3] }
 0x126   :  { %991 = vmatpush.bf16.msra.mxu1 %v5428_v22  ;;  %4922 = vmatpush.bf16.msrb.mxu3 %v5428_v22  ;;  %v1889_v22 = vld [vmem:[%s7583_s8 + $0x10] sm:$0xff] }
 0x129   :  { %992 = vmatmul.bf16.vlgmr.msra.gmra.mxu1 %v3996_v11  ;;  %1057 = vmatmul.bf16.vlgmr.msrb.gmra.mxu3 %v4100_v15  ;;  %v4027_v11 = vld [vmem:[%s7578_s3 + $0x40] sm:$0xf]  ;;  %v4758_v15 = vld [vmem:[%s7578_s3 + $0x44] sm:$0xf0] }
 0x12a   :  { %4923 = vmatpush.bf16.msra.mxu3 %v982_v43  ;;  %v4780_v43 = vld [vmem:[%s7578_s3 + $0xf4] sm:$0x10] }
 0x12b   :  { %v5592_v0 = vpop.f32.mrf.mxu0  ;;  %1946 = vperm.xlu2 %4938, %v1892_v27   ;;  %2056 = vperm.xlu0 %4936, %v1914_v14   ;;  %v4116_v41 = vor.u32 %v4780_v43, %v4115_v26 }
 0x12c   :  { %1941 = vperm.xlu1 %4937, %v1891_v16  }
 0x12e   :  { %4924 = vmatpush.bf16.msra.mxu3 %v562_v47  ;;  %v1908_v47 = vld [vmem:[%s7583_s8 + $0xa8] sm:$0xff] }
 0x133   :  { %v5615_v24 = vpop.f32.mrf.mxu0  ;;  %1931 = vperm.xlu2 %4938, %v1889_v22   ;;  %2041 = vperm.xlu0 %4936, %v1911_v18   ;;  %v4028_v22 = vor.u32 %v4758_v15, %v4027_v11  ;;  %v4109_v11 = vld [vmem:[%s7578_s3 + $0xe8] sm:$0xf0] }
 0x134   :  { %2046 = vperm.xlu1 %4937, %v1912_v17  }
 0x139   :  { %997 = vmatmul.bf16.gmra.mxu1 %v4004_v2  ;;  %1062 = vmatmul.bf16.gmra.mxu3 %v4108_v33 }
 0x13b   :  { %v5626_v10 = vpop.f32.mrf.mxu0  ;;  %2036 = vperm.xlu2 %4938, %v1910_v34   ;;  %1936 = vperm.xlu0 %4936, %v1890_v50  }
 0x13c   :  { %2031 = vperm.xlu1 %4937, %v1909_v39   ;;  %v487_v39 = vadd.f32 %v5592_v0, %v5340_v44  ;;  %v2542_v44 = vld [vmem:[%s7585_s10 + $0x50] sm:$0xff]  ;;  %v482_v0 = vadd.f32 %v5554_v51, %v5378_v60  ;;  %v477_v60 = vadd.f32 %v5518_v7, %v5396_v9  ;;  %v2557_v9 = vld [vmem:[%s7585_s10 + $0xc8] sm:$0xff]  ;;  %v4749_v7 = vld [vmem:[%s7578_s3 + $0x4] sm:$0xf] }
 0x13e   :  { %v534_v43 = vmax.f32 %v482_v0, 0.0  ;;  %v4021_v0 = vld [vmem:[%s7578_s3 + $0x38] sm:$0xf0] }
 0x143   :  { %v493_v45 = vpop.f32.mrf.mxu0  ;;  %2021 = vperm.xlu2 %4938, %v1907_v35   ;;  %1921 = vperm.xlu0 %4936, %v1887_v55   ;;  %v208_v55 = vpop.permute.xlu2 %207 }
 0x144   :  { %1926 = vperm.xlu1 %4937, %v1888_v40   ;;  %v494_v19 = vadd.f32 %v493_v45, %v5324_v36  ;;  %v489_v36 = vadd.f32 %v5615_v24, %v5360_v52  ;;  %v2556_v40 = vld [vmem:[%s7585_s10 + $0xc0] sm:$0xff]  ;;  %v2543_v52 = vld [vmem:[%s7585_s10 + $0x58] sm:$0xff]  ;;  %v536_v24 = vmax.f32 %v487_v39, 0.0  ;;  %v479_v28 = vadd.f32 %v5539_v37, %v208_v55 }
 0x145   :  { %v2540_v37 = vld [vmem:[%s7585_s10 + $0x40] sm:$0xff] }
 0x146   :  { %v539_v33 = vmax.f32 %v494_v19, 0.0  ;;  %v533_v45 = vmax.f32 %v479_v28, 0.0  ;;  %v2535_v19 = vld [vmem:[%s7585_s10 + $0x18] sm:$0xff]  ;;  %v2548_v39 = vld [vmem:[%s7585_s10 + $0x80] sm:$0xff] }
 0x147   :  { %v3189_v55 = vld [vmem:[%s7587_s12 + $0x60] sm:$0xff] }
 0x149   :  { %1002 = vmatmul.bf16.gmra.mxu1 %v4012_v25  ;;  %1067 = vmatmul.bf16.gmra.mxu3 %v4116_v41  ;;  %v2541_v41 = vld [vmem:[%s7585_s10 + $0x48] sm:$0xff] }
 0x14b   :  { %v496_v48 = vpop.f32.mrf.mxu0  ;;  %2016 = vperm.xlu2 %4938, %v1906_v42   ;;  %2026 = vperm.xlu0 %4936, %v1908_v47   ;;  %v532_v42 = vmax.f32 %v477_v60, 0.0  ;;  %v4775_v47 = vld [vmem:[%s7578_s3 + $0xd4] sm:$0xf]  ;;  %v5878_v28 = vpop.permute.xlu2 %700 }
 0x14c   :  { %2011 = vperm.xlu1 %4937, %v1905_v29   ;;  %v497_v17 = vadd.f32 %v496_v48, %v5308_v30  ;;  %v492_v30 = vadd.f32 %v5626_v10, %v5326_v38  ;;  %v484_v38 = vadd.f32 %v5579_v1, %v5380_v61  ;;  %v537_v10 = vmax.f32 %v489_v36, 0.0  ;;  %v4035_v61 = vld [vmem:[%s7578_s3 + $0x50] sm:$0xf]  ;;  %v4760_v1 = vld [vmem:[%s7578_s3 + $0x54] sm:$0xf0] }
 0x14d   :  { %v4036_v51 = vor.u32 %v4760_v1, %v4035_v61  ;;  %v3997_v29 = vld [vmem:[%s7578_s3 + $0x8] sm:$0xf0]  ;;  %v4101_v48 = vld [vmem:[%s7578_s3 + $0xd8] sm:$0xf0]  ;;  %v3187_v61 = vld [vmem:[%s7587_s12 + $0x50] sm:$0xff] }
 0x14e   :  { %v540_v2 = vmax.f32 %v497_v17, 0.0  ;;  %v538_v50 = vmax.f32 %v492_v30, 0.0  ;;  %v535_v63 = vmax.f32 %v484_v38, 0.0  ;;  %v558_v26 = vpack.c.bf16 %v537_v10, %v536_v24  ;;  %v4051_v17 = vld [vmem:[%s7578_s3 + $0x70] sm:$0xf]  ;;  %v3190_v1 = vld [vmem:[%s7587_s12 + $0x68] sm:$0xff] }
 0x14f   :  { %v4117_v30 = vld [vmem:[%s7578_s3 + $0xf8] sm:$0x10]  ;;  %v4766_v38 = vld [vmem:[%s7578_s3 + $0x84] sm:$0xf0] }
 0x150   :  { %v559_v35 = vpack.c.bf16 %v539_v33, %v538_v50  ;;  %v557_v25 = vpack.c.bf16 %v535_v63, %v534_v43  ;;  %v2532_v33 = vld [vmem:[%s7585_s10] sm:$0xff]  ;;  %v4067_v63 = vld [vmem:[%s7578_s3 + $0x90] sm:$0xf] }
 0x151   :  { %v4059_v50 = vld [vmem:[%s7578_s3 + $0x80] sm:$0xf] }
 0x152   :  { %v4060_v10 = vor.u32 %v4766_v38, %v4059_v50  ;;  %v3185_v43 = vld [vmem:[%s7587_s12 + $0x40] sm:$0xff]  ;;  %v3203_v50 = vld [vmem:[%s7587_s12 + $0xd0] sm:$0xff] }
 0x153   :  { %v498_v59 = vpop.f32.mrf.mxu0  ;;  %2716 = vperm.xlu2 %4938, %v2562_v49   ;;  %2001 = vperm.xlu0 %4936, %v1903_v6   ;;  %v556_v49 = vpack.c.bf16 %v533_v45, %v532_v42  ;;  %v4104_v6 = vor.u32 %v4775_v47, %v4101_v48  ;;  %v3188_v45 = vld [vmem:[%s7587_s12 + $0x58] sm:$0xff]  ;;  %v4029_v42 = vld [vmem:[%s7578_s3 + $0x48] sm:$0xf0]  ;;  %v3183_v47 = vld [vmem:[%s7587_s12 + $0x30] sm:$0xff] }
 0x154   :  { %2006 = vperm.xlu1 %4937, %v1904_v46   ;;  %v499_v16 = vadd.f32 %v498_v59, %v5310_v31  ;;  %v2545_v31 = vld [vmem:[%s7585_s10 + $0x68] sm:$0xff]  ;;  %v4000_v46 = vor.u32 %v4749_v7, %v3997_v29  ;;  %v2554_v59 = vld [vmem:[%s7585_s10 + $0xb0] sm:$0xff]  ;;  %v3181_v7 = vld [vmem:[%s7587_s12 + $0x20] sm:$0xff] }
 0x155   :  { %v3184_v29 = vld [vmem:[%s7587_s12 + $0x38] sm:$0xff]  ;;  %v4075_v48 = vld [vmem:[%s7578_s3 + $0xa0] sm:$0xf] }
 0x156   :  { %v541_v20 = vmax.f32 %v499_v16, 0.0  ;;  %v2550_v16 = vld [vmem:[%s7585_s10 + $0x90] sm:$0xff] }
 0x158   :  { %v560_v34 = vpack.c.bf16 %v541_v20, %v540_v2  ;;  %v2534_v20 = vld [vmem:[%s7585_s10 + $0x10] sm:$0xff] }
 0x159   :  { %1007 = vmatmul.bf16.gmra.mxu1 %v4020_v57  ;;  %v4043_v57 = vld [vmem:[%s7578_s3 + $0x60] sm:$0xf] }
 0x15b   :  { %v501_v3 = vpop.f32.mrf.mxu0  ;;  %2641 = vperm.xlu2 %4938, %v2547_v53   ;;  %2721 = vperm.xlu0 %4936, %v2563_v62   ;;  %v4762_v53 = vld [vmem:[%s7578_s3 + $0x64] sm:$0xf0] }
 0x15c   :  { %2636 = vperm.xlu1 %4937, %v2546_v58   ;;  %v502_v13 = vadd.f32 %v501_v3, %v5253_v8  ;;  %v4044_v58 = vor.u32 %v4762_v53, %v4043_v57  ;;  %v2553_v62 = vld [vmem:[%s7585_s10 + $0xa8] sm:$0xff]  ;;  %v2552_v3 = vld [vmem:[%s7585_s10 + $0xa0] sm:$0xff] }
 0x15d   :  { %v3182_v57 = vld [vmem:[%s7587_s12 + $0x28] sm:$0xff] }
 0x15e   :  { %v542_v8 = vmax.f32 %v502_v13, 0.0  ;;  %v4777_v13 = vld [vmem:[%s7578_s3 + $0xe4] sm:$0xf] }
 0x163   :  { %v503_v27 = vpop.f32.mrf.mxu0  ;;  %2626 = vperm.xlu2 %4938, %v2544_v4   ;;  %2706 = vperm.xlu0 %4936, %v2560_v12   ;;  %v2539_v4 = vld [vmem:[%s7585_s10 + $0x38] sm:$0xff] }
 0x164   :  { %v504_v14 = vadd.f32 %v503_v27, %v5290_v23  ;;  %2711 = vperm.xlu1 %4937, %v2561_v5   ;;  %v2558_v23 = vld [vmem:[%s7585_s10 + $0xd0] sm:$0xff]  ;;  %v4005_v12 = vld [vmem:[%s7578_s3 + $0x18] sm:$0xf0]  ;;  %v4112_v27 = vor.u32 %v4777_v13, %v4109_v11  ;;  %v3178_v11 = vld [vmem:[%s7587_s12 + $0x8] sm:$0xff] }
 0x165   :  { %v4751_v5 = vld [vmem:[%s7578_s3 + $0x14] sm:$0xf] }
 0x166   :  { %v543_v18 = vmax.f32 %v504_v14, 0.0  ;;  %v4008_v15 = vor.u32 %v4751_v5, %v4005_v12  ;;  %v2537_v14 = vld [vmem:[%s7585_s10 + $0x28] sm:$0xff]  ;;  %v3207_v13 = vld [vmem:[%s7587_s12 + $0xf0] sm:$0xff] }
 0x168   :  { %v561_v21 = vpack.c.bf16 %v543_v18, %v542_v8  ;;  %v4764_v8 = vld [vmem:[%s7578_s3 + $0x74] sm:$0xf0] }
 0x169   :  { %1012 = vmatmul.bf16.gmra.mxu1 %v4028_v22  ;;  %v2536_v22 = vld [vmem:[%s7585_s10 + $0x20] sm:$0xff]  ;;  %v4052_v18 = vor.u32 %v4764_v8, %v4051_v17  ;;  %v5966_v17 = vpop.permute.xlu1 %690 }
 0x16a   :  { %1075 = vmatpush.bf16.msra.mxu2 %v561_v21  ;;  %4925 = vmatpush.bf16.msra.mxu3 %v561_v21  ;;  %v2551_v21 = vld [vmem:[%s7585_s10 + $0x98] sm:$0xff] }
 0x16b   :  { %2701 = vperm.xlu2 %4938, %v2559_v32   ;;  %2631 = vperm.xlu0 %4936, %v2545_v31   ;;  %v4753_v32 = vld [vmem:[%s7578_s3 + $0x24] sm:$0xf]  ;;  %v4779_v31 = vld [vmem:[%s7578_s3 + $0xf4] sm:$0xf] }
 0x16c   :  { %2696 = vperm.xlu1 %4937, %v2558_v23   ;;  %v4013_v23 = vld [vmem:[%s7578_s3 + $0x28] sm:$0xf0]  ;;  %v4120_v36 = vor.u32 %v4779_v31, %v4117_v30 }
 0x16d   :  { %v4016_v2 = vor.u32 %v4753_v32, %v4013_v23  ;;  %v4761_v23 = vld [vmem:[%s7578_s3 + $0x64] sm:$0xf]  ;;  %v4045_v31 = vld [vmem:[%s7578_s3 + $0x68] sm:$0xf0] }
 0x16e   :  { %1076 = vmatpush.bf16.msra.mxu2 %v560_v34  ;;  %4926 = vmatpush.bf16.msra.mxu3 %v560_v34  ;;  %v2549_v34 = vld [vmem:[%s7585_s10 + $0x88] sm:$0xff]  ;;  %v4048_v30 = vor.u32 %v4761_v23, %v4045_v31 }
 0x172   :  { %1077 = vmatpush.bf16.msra.mxu2 %v559_v35  ;;  %4927 = vmatpush.bf16.msra.mxu3 %v559_v35  ;;  %v3192_v35 = vld [vmem:[%s7587_s12 + $0x78] sm:$0xff] }
 0x173   :  { %2686 = vperm.xlu2 %4938, %v2556_v40   ;;  %2616 = vperm.xlu0 %4936, %v2542_v44   ;;  %v3191_v40 = vld [vmem:[%s7587_s12 + $0x70] sm:$0xff] }
 0x174   :  { %2621 = vperm.xlu1 %4937, %v2543_v52   ;;  %v2533_v52 = vld [vmem:[%s7585_s10 + $0x8] sm:$0xff]  ;;  %v4755_v44 = vld [vmem:[%s7578_s3 + $0x34] sm:$0xf] }
 0x175   :  { %v4024_v24 = vor.u32 %v4755_v44, %v4021_v0  ;;  %v3200_v0 = vld [vmem:[%s7587_s12 + $0xb8] sm:$0xff] }
 0x176   :  { %1078 = vmatpush.bf16.msra.mxu2 %v558_v26  ;;  %4928 = vmatpush.bf16.msra.mxu3 %v558_v26  ;;  %v4768_v26 = vld [vmem:[%s7578_s3 + $0x94] sm:$0xf0] }
 0x177   :  { %v4068_v60 = vor.u32 %v4768_v26, %v4067_v63  ;;  %v4053_v63 = vld [vmem:[%s7578_s3 + $0x78] sm:$0xf0] }
 0x179   :  { %1017 = vmatmul.bf16.gmra.mxu1 %v4036_v51  ;;  %v3186_v51 = vld [vmem:[%s7587_s12 + $0x48] sm:$0xff] }
 0x17a   :  { %1079 = vmatpush.bf16.msra.mxu2 %v557_v25  ;;  %4929 = vmatpush.bf16.msra.mxu3 %v557_v25  ;;  %v5895_v25 = vpop.permute.xlu0 %705 }
 0x17b   :  { %2611 = vperm.xlu2 %4938, %v2541_v41   ;;  %2691 = vperm.xlu0 %4936, %v2557_v9   ;;  %v4757_v41 = vld [vmem:[%s7578_s3 + $0x44] sm:$0xf] }
 0x17c   :  { %2606 = vperm.xlu1 %4937, %v2540_v37   ;;  %v5903_v37 = vpop.permute.xlu2 %695  ;;  %v4032_v9 = vor.u32 %v4757_v41, %v4029_v42  ;;  %v3198_v41 = vld [vmem:[%s7587_s12 + $0xa8] sm:$0xff]  ;;  %v3197_v42 = vld [vmem:[%s7587_s12 + $0xa0] sm:$0xff] }
 0x17e   :  { %1080 = vmatpush.bf16.msra.mxu2 %v556_v49  ;;  %4930 = vmatpush.bf16.msra.mxu3 %v556_v49  ;;  %v4770_v49 = vld [vmem:[%s7578_s3 + $0xa4] sm:$0xf0] }
 0x181   :  { %4121 = vmatmul.msk.bf16.vlgmr.msra.gmra.mxu2 %vm932_vm3, %v4000_v46  ;;  %4134 = vmatmul.msk.bf16.vlgmr.msra.gmra.mxu3 %vm932_vm3, %v4104_v6  ;;  %v4076_v6 = vor.u32 %v4770_v49, %v4075_v48  ;;  %v3194_v49 = vld [vmem:[%s7587_s12 + $0x88] sm:$0xff] }
 0x182   :  { %v5921_v46 = vpop.permute.xlu0 %780 }
 0x183   :  { %2596 = vperm.xlu2 %4938, %v2538_v56   ;;  %2676 = vperm.xlu0 %4936, %v2554_v59   ;;  %v3179_v59 = vld [vmem:[%s7587_s12 + $0x10] sm:$0xff] }
 0x184   :  { %2681 = vperm.xlu1 %4937, %v2555_v54   ;;  %v5923_v56 = vpop.permute.xlu2 %680  ;;  %v3180_v54 = vld [vmem:[%s7587_s12 + $0x18] sm:$0xff] }
 0x189   :  { %1022 = vmatmul.bf16.gmra.mxu1 %v4044_v58  ;;  %v4759_v58 = vld [vmem:[%s7578_s3 + $0x54] sm:$0xf] }
 0x18a   :  { %v5944_v5 = vpop.permute.xlu0 %685 }
 0x18b   :  { %2671 = vperm.xlu2 %4938, %v2553_v62   ;;  %2601 = vperm.xlu0 %4936, %v2539_v4   ;;  %v4037_v62 = vld [vmem:[%s7578_s3 + $0x58] sm:$0xf0] }
 0x18c   :  { %2666 = vperm.xlu1 %4937, %v2552_v3   ;;  %v4040_v4 = vor.u32 %v4759_v58, %v4037_v62  ;;  %v5946_v12 = vpop.permute.xlu2 %675 }
 0x191   :  { %4122 = vmatmul.msk.bf16.gmra.mxu2 %vm932_vm3, %v4008_v15  ;;  %4135 = vmatmul.msk.bf16.gmra.mxu3 %vm932_vm3, %v4112_v27  ;;  %v3177_v15 = vld [vmem:[%s7587_s12] sm:$0xff]  ;;  %v4083_v27 = vld [vmem:[%s7578_s3 + $0xb0] sm:$0xf] }
 0x193   :  { %2656 = vperm.xlu2 %4938, %v2550_v16   ;;  %2586 = vperm.xlu0 %4936, %v2536_v22   ;;  %v4772_v16 = vld [vmem:[%s7578_s3 + $0xb4] sm:$0xf0] }
 0x194   :  { %2591 = vperm.xlu1 %4937, %v2537_v14   ;;  %v4084_v22 = vor.u32 %v4772_v16, %v4083_v27  ;;  %v5981_v32 = vpop.permute.xlu2 %660  ;;  %v3795_v27 = vld [vmem:[%s7589_s14 + $0x8] sm:$0xff]  ;;  %v3794_v16 = vld [vmem:[%s7589_s14] sm:$0xff] }
 0x199   :  { %1027 = vmatmul.bf16.gmra.mxu1 %v4052_v18  ;;  %v5970_v18 = vpop.permute.xlu0 %770 }
 0x19b   :  { %2581 = vperm.xlu2 %4938, %v2535_v19   ;;  %2661 = vperm.xlu0 %4936, %v2551_v21   ;;  %v3206_v19 = vld [vmem:[%s7587_s12 + $0xe8] sm:$0xff]  ;;  %v3208_v21 = vld [vmem:[%s7587_s12 + $0xf8] sm:$0x3] }
 0x19c   :  { %2576 = vperm.xlu1 %4937, %v2534_v20   ;;  %v3205_v20 = vld [vmem:[%s7587_s12 + $0xe0] sm:$0xff] }
 0x1a1   :  { %4123 = vmatmul.msk.bf16.gmra.mxu2 %vm932_vm3, %v4016_v2  ;;  %4136 = vmatmul.msk.bf16.gmra.mxu3 %vm932_vm3, %v4120_v36  ;;  %v5991_v36 = vpop.permute.xlu1 %785  ;;  %v6005_v38 = vpop.permute.xlu0 %665 }
 0x1a3   :  { %2566 = vperm.xlu2 %4938, %v2532_v33   ;;  %2646 = vperm.xlu0 %4936, %v2548_v39   ;;  %v3201_v33 = vld [vmem:[%s7587_s12 + $0xc0] sm:$0xff]  ;;  %v3204_v39 = vld [vmem:[%s7587_s12 + $0xd8] sm:$0xff] }
 0x1a4   :  { %2651 = vperm.xlu1 %4937, %v2549_v34  }
 0x1a6   :  { %v5942_v3 = vpop.f32.mrf.mxu1 }
 0x1a9   :  { %1032 = vmatmul.bf16.gmra.mxu1 %v4060_v10  ;;  %v4091_v10 = vld [vmem:[%s7578_s3 + $0xc0] sm:$0xf] }
 0x1ab   :  { %3286 = vperm.xlu2 %4938, %v3192_v35   ;;  %2571 = vperm.xlu0 %4936, %v2533_v52   ;;  %v4774_v35 = vld [vmem:[%s7578_s3 + $0xc4] sm:$0xf0] }
 0x1ac   :  { %3281 = vperm.xlu1 %4937, %v3191_v40   ;;  %v5934_v53 = vpop.f32.mrf.mxu3  ;;  %v6013_v40 = vpop.permute.xlu2 %765  ;;  %v4092_v52 = vor.u32 %v4774_v35, %v4091_v10 }
 0x1ae   :  { %v5968_v8 = vpop.f32.mrf.mxu1 }
 0x1b1   :  { %4124 = vmatmul.msk.bf16.gmra.mxu2 %vm932_vm3, %v4024_v24  ;;  %v3199_v24 = vld [vmem:[%s7587_s12 + $0xb0] sm:$0xff] }
 0x1b3   :  { %3261 = vperm.xlu2 %4938, %v3187_v61   ;;  %3271 = vperm.xlu0 %4936, %v3189_v55   ;;  %v3202_v61 = vld [vmem:[%s7587_s12 + $0xc8] sm:$0xff]  ;;  %v4763_v55 = vld [vmem:[%s7578_s3 + $0x74] sm:$0xf] }
 0x1b4   :  { %3276 = vperm.xlu1 %4937, %v3190_v1   ;;  %v5964_v14 = vpop.f32.mrf.mxu3  ;;  %v6026_v1 = vpop.permute.xlu1 %670 }
 0x1b6   :  { %v5996_v34 = vpop.f32.mrf.mxu1 }
 0x1b9   :  { %1037 = vmatmul.bf16.gmra.mxu1 %v4068_v60  ;;  %v6036_v60 = vpop.permute.xlu0 %650 }
 0x1bb   :  { %3256 = vperm.xlu2 %4938, %v3186_v51   ;;  %3266 = vperm.xlu0 %4936, %v3188_v45   ;;  %v4056_v51 = vor.u32 %v4763_v55, %v4053_v63  ;;  %v3195_v45 = vld [vmem:[%s7587_s12 + $0x90] sm:$0xff] }
 0x1bc   :  { %3251 = vperm.xlu1 %4937, %v3185_v43   ;;  %v5989_v2 = vpop.f32.mrf.mxu3  ;;  %v6038_v43 = vpop.permute.xlu2 %750 }
 0x1be   :  { %v6034_v26 = vpop.f32.mrf.mxu1 }
 0x1c1   :  { %4125 = vmatmul.msk.bf16.gmra.mxu2 %vm932_vm3, %v4032_v9 }
 0x1c3   :  { %3231 = vperm.xlu2 %4938, %v3181_v7   ;;  %3241 = vperm.xlu0 %4936, %v3183_v47   ;;  %v6052_v7 = vpop.permute.xlu1 %775  ;;  %v6054_v47 = vpop.permute.xlu0 %755 }
 0x1c4   :  { %3246 = vperm.xlu1 %4937, %v3184_v29   ;;  %v6015_v44 = vpop.f32.mrf.mxu3  ;;  %v6056_v48 = vpop.permute.xlu2 %645 }
 0x1c6   :  { %v1003_v29 = vpop.f32.mrf.mxu1 }
 0x1c9   :  { %1042 = vmatmul.bf16.gmra.mxu1 %v4076_v6  ;;  %v3193_v6 = vld [vmem:[%s7587_s12 + $0x80] sm:$0xff] }
 0x1cb   :  { %3226 = vperm.xlu2 %4938, %v3180_v54   ;;  %3236 = vperm.xlu0 %4936, %v3182_v57   ;;  %v3196_v54 = vld [vmem:[%s7587_s12 + $0x98] sm:$0xff]  ;;  %v4061_v57 = vld [vmem:[%s7578_s3 + $0x88] sm:$0xf0] }
 0x1cc   :  { %3221 = vperm.xlu1 %4937, %v3179_v59   ;;  %v6050_v9 = vpop.f32.mrf.mxu3  ;;  %v4765_v59 = vld [vmem:[%s7578_s3 + $0x84] sm:$0xf] }
 0x1cd   :  { %v4064_v62 = vor.u32 %v4765_v59, %v4061_v57 }
 0x1d1   :  { %4126 = vmatmul.msk.bf16.gmra.mxu2 %vm932_vm3, %v4040_v4  ;;  %v6073_v4 = vpop.permute.xlu1 %760 }
 0x1d3   :  { %3361 = vperm.xlu2 %4938, %v3207_v13   ;;  %3211 = vperm.xlu0 %4936, %v3177_v15   ;;  %v6075_v13 = vpop.f32.mrf.mxu1  ;;  %v3796_v15 = vld [vmem:[%s7589_s14 + $0x10] sm:$0xff] }
 0x1d4   :  { %3216 = vperm.xlu1 %4937, %v3178_v11   ;;  %v1070_v58 = vpop.f32.mrf.mxu3  ;;  %v6077_v11 = vpop.permute.xlu0 %740 }
 0x1d9   :  { %1047 = vmatmul.bf16.gmra.mxu1 %v4084_v22  ;;  %v631_v22 = vpop.permute.xlu2 %630  ;;  %v6090_v31 = vpop.permute.xlu1 %655 }
 0x1db   :  { %3356 = vperm.xlu2 %4938, %v3206_v19   ;;  %3366 = vperm.xlu0 %4936, %v3208_v21   ;;  %v994_v19 = vadd.f32 %v5942_v3, %v631_v22  ;;  %v4069_v3 = vld [vmem:[%s7578_s3 + $0x98] sm:$0xf0] }
 0x1dc   :  { %3351 = vperm.xlu1 %4937, %v3205_v20  }
 0x1e1   :  { %4127 = vmatmul.msk.bf16.gmra.mxu2 %vm932_vm3, %v4048_v30  ;;  %v1008_v30 = vpop.f32.mrf.mxu1 }
 0x1e3   :  { %3331 = vperm.xlu2 %4938, %v3201_v33   ;;  %3341 = vperm.xlu0 %4936, %v3203_v50   ;;  %v3797_v33 = vld [vmem:[%s7589_s14 + $0x18] sm:$0x1]  ;;  %v4767_v50 = vld [vmem:[%s7578_s3 + $0x94] sm:$0xf] }
 0x1e4   :  { %3346 = vperm.xlu1 %4937, %v3204_v39   ;;  %v636_v39 = vpop.permute.xlu0 %635 }
 0x1e5   :  { %v996_v10 = vadd.f32 %v5968_v8, %v636_v39  ;;  %v4769_v8 = vld [vmem:[%s7578_s3 + $0xa4] sm:$0xf]  ;;  %v1071_v39 = vadd.f32 %v1070_v58, %v5991_v36 }
 0x1e9   :  { %1052 = vmatmul.bf16.gmra.mxu1 %v4092_v52 }
 0x1eb   :  { %3326 = vperm.xlu2 %4938, %v3200_v0   ;;  %3336 = vperm.xlu0 %4936, %v3202_v61  }
 0x1ec   :  { %3321 = vperm.xlu1 %4937, %v3199_v24   ;;  %v4072_v24 = vor.u32 %v4767_v50, %v4069_v3 }
 0x1f1   :  { %4128 = vmatmul.msk.bf16.gmra.mxu2 %vm932_vm3, %v4056_v51  ;;  %v641_v51 = vpop.permute.xlu1 %640 }
 0x1f3   :  { %3301 = vperm.xlu2 %4938, %v3195_v45   ;;  %3311 = vperm.xlu0 %4936, %v3197_v42   ;;  %v999_v45 = vadd.f32 %v5996_v34, %v641_v51  ;;  %v1004_v34 = vadd.f32 %v1003_v29, %v6036_v60  ;;  %v1066_v29 = vadd.f32 %v6015_v44, %v6052_v7 }
 0x1f4   :  { %3316 = vperm.xlu1 %4937, %v3198_v41   ;;  %v6106_v41 = vpop.f32.mrf.mxu1  ;;  %v1059_v44 = vadd.f32 %v5934_v53, %v6073_v4  ;;  %v4773_v53 = vld [vmem:[%s7578_s3 + $0xc4] sm:$0xf] }
 0x1fb   :  { %3296 = vperm.xlu2 %4938, %v3194_v49   ;;  %3306 = vperm.xlu0 %4936, %v3196_v54   ;;  %v4077_v54 = vld [vmem:[%s7578_s3 + $0xa8] sm:$0xf0] }
 0x1fc   :  { %3291 = vperm.xlu1 %4937, %v3193_v6  }
 0x201   :  { %4129 = vmatmul.msk.bf16.gmra.mxu2 %vm932_vm3, %v4064_v62  ;;  %v4080_v62 = vor.u32 %v4769_v8, %v4077_v54 }
 0x203   :  { %3810 = vperm.xlu2 %4938, %v3796_v15   ;;  %3800 = vperm.xlu0 %4936, %v3794_v16   ;;  %v1013_v15 = vpop.f32.mrf.mxu1 }
 0x204   :  { %3805 = vperm.xlu1 %4937, %v3795_v27   ;;  %v1082_v20 = vpop.f32.mrf.mxu2  ;;  %v1147_v21 = vpop.f32.mrf.mxu3 }
 0x205   :  { %v1083_v23 = vadd.f32 %v1082_v20, %v994_v19  ;;  %v1069_v20 = vadd.f32 %v6050_v9, %v5921_v46  ;;  %v1064_v46 = vadd.f32 %v5989_v2, %v5970_v18  ;;  %v1148_v2 = vadd.f32 %v1147_v21, %v1059_v44 }
 0x207   :  { %v1162_v61 = vmax.f32 %v1083_v23, 0.0  ;;  %v4771_v23 = vld [vmem:[%s7578_s3 + $0xb4] sm:$0xf] }
 0x20b   :  { %3815 = vperm.xlu0 %4936, %v3797_v33   ;;  %v6122_v19 = vpop.f32.mrf.mxu1  ;;  %v4085_v33 = vld [vmem:[%s7578_s3 + $0xb8] sm:$0xf0] }
 0x20c   :  { %v1084_v35 = vpop.f32.mrf.mxu2  ;;  %v1149_v52 = vpop.f32.mrf.mxu3 }
 0x20d   :  { %v1085_v0 = vadd.f32 %v1084_v35, %v996_v10  ;;  %v4088_v35 = vor.u32 %v4771_v23, %v4085_v33 }
 0x20f   :  { %v1163_v55 = vmax.f32 %v1085_v0, 0.0 }
 0x211   :  { %4130 = vmatmul.msk.bf16.gmra.mxu2 %vm932_vm3, %v4072_v24  ;;  %v6103_v63 = vpack.c.bf16 %v1163_v55, %v1162_v61  ;;  %v1061_v61 = vadd.f32 %v5964_v14, %v6013_v40 }
 0x213   :  { %v1018_v7 = vpop.f32.mrf.mxu1  ;;  %v1150_v58 = vadd.f32 %v1149_v52, %v1061_v61  ;;  %v1014_v52 = vadd.f32 %v1013_v15, %v6026_v1 }
 0x214   :  { %v1087_v42 = vpop.f32.mrf.mxu2  ;;  %v1152_v49 = vpop.f32.mrf.mxu3 }
 0x215   :  { %v6108_v6 = vadd.f32 %v1087_v42, %v999_v45  ;;  %v1153_v55 = vadd.f32 %v1152_v49, %v1064_v46  ;;  %v1009_v45 = vadd.f32 %v1008_v30, %v5981_v32  ;;  %v1189_v14 = vmax.f32 %v1150_v58, 0.0  ;;  %v4093_v32 = vld [vmem:[%s7578_s3 + $0xc8] sm:$0xf0]  ;;  %v6156_v46 = vpop.permute.xlu2 %735  ;;  %s4968_s3 = smov 128  }
 0x216   :  { %v1188_v49 = vmax.f32 %v1148_v2, 0.0  ;;  %v4096_v30 = vor.u32 %v4773_v53, %v4093_v32  ;;  %v1019_v2 = vadd.f32 %v1018_v7, %v5923_v56  ;;  %v1011_v56 = vadd.f32 %v6106_v41, %v6005_v38 }
 0x217   :  { %v1190_v42 = vmax.f32 %v1153_v55, 0.0  ;;  %v1001_v38 = vadd.f32 %v6034_v26, %v6056_v48  ;;  %v1164_v26 = vmax.f32 %v6108_v6, 0.0  ;;  %v4147_v6 = vld [vmem:[%s7580_s5 + $0x10] sm:$0xf] }
 0x21b   :  { %v1020_v4 = vpop.f32.mrf.mxu1 }
 0x21c   :  { %v6116_v59 = vpop.f32.mrf.mxu2  ;;  %v1154_v57 = vpop.f32.mrf.mxu3  ;;  %v1021_v58 = vadd.f32 %v1020_v4, %v5944_v5 }
 0x21d   :  { %v1155_v9 = vadd.f32 %v1154_v57, %v1066_v29  ;;  %v1207_v57 = vpack.c.bf16 %v1189_v14, %v1188_v49  ;;  %v711_v14 = vpop.permute.xlu2 %710 }
 0x21f   :  { %v1191_v51 = vmax.f32 %v1155_v9, 0.0 }
 0x221   :  { %4131 = vmatmul.msk.bf16.gmra.mxu2 %vm932_vm3, %v4080_v62  ;;  %v1208_v40 = vpack.c.bf16 %v1191_v51, %v1190_v42 }
 0x224   :  { %v1092_v27 = vpop.f32.mrf.mxu2  ;;  %v1157_v16 = vpop.f32.mrf.mxu3 }
 0x225   :  { %v6120_v22 = vadd.f32 %v1092_v27, %v1004_v34  ;;  %v1158_v60 = vadd.f32 %v1157_v16, %v1069_v20  ;;  %v1023_v27 = vpop.f32.mrf.mxu1 }
 0x226   :  { %v1024_v55 = vadd.f32 %v1023_v27, %v5966_v17 }
 0x227   :  { %v1192_v0 = vmax.f32 %v1158_v60, 0.0 }
 0x22c   :  { %v6135_v50 = vpop.f32.mrf.mxu2  ;;  %v1159_v3 = vpop.f32.mrf.mxu3 }
 0x22d   :  { %v1160_v10 = vadd.f32 %v1159_v3, %v1071_v39  ;;  %v1025_v20 = vpop.f32.mrf.mxu1 }
 0x22e   :  { %v1026_v1 = vadd.f32 %v1025_v20, %v5903_v37 }
 0x22f   :  { %v1193_v24 = vmax.f32 %v1160_v10, 0.0 }
 0x231   :  { %4132 = vmatmul.msk.bf16.gmra.mxu2 %vm932_vm3, %v4088_v35  ;;  %v1209_v36 = vpack.c.bf16 %v1193_v24, %v1192_v0 }
 0x233   :  { %v1627_v18 = vsel %vm421_vm1, %v1209_v36, 0 }
 0x234   :  { %v1097_v8 = vpop.f32.mrf.mxu2  ;;  %1718 = vmatpush.bf16.msrb.mxu0 %v1627_v18 }
 0x235   :  { %v6146_v54 = vadd.f32 %v1097_v8, %v1009_v45  ;;  %v1028_v33 = vpop.f32.mrf.mxu1 }
 0x236   :  { %v1029_v0 = vadd.f32 %v1028_v33, %v5878_v28 }
 0x237   :  { %v1168_v41 = vmax.f32 %v6146_v54, 0.0 }
 0x238   :  { %1719 = vmatpush.bf16.msrb.mxu0 %v1208_v40 }
 0x23c   :  { %v1099_v21 = vpop.f32.mrf.mxu2  ;;  %1720 = vmatpush.bf16.msrb.mxu0 %v1207_v57 }
 0x23d   :  { %v1030_v60 = vpop.f32.mrf.mxu1 }
 0x23e   :  { %v1031_v15 = vadd.f32 %v1030_v60, %v5895_v25  ;;  %v1016_v25 = vadd.f32 %v6122_v19, %v5946_v12  ;;  %v1006_v12 = vadd.f32 %v6075_v13, %v6090_v31  ;;  %v721_v31 = vpop.permute.xlu0 %720 }
 0x240   :  { %v1095_v20 = vadd.f32 %v6135_v50, %v1006_v12 }
 0x241   :  { %4133 = vmatmul.msk.bf16.gmra.mxu2 %vm932_vm3, %v4096_v30  ;;  %v1100_v30 = vadd.f32 %v1099_v21, %v1011_v56  ;;  %v1090_v21 = vadd.f32 %v6116_v59, %v1001_v38  ;;  %v4139_v59 = vld [vmem:[%s7580_s5] sm:$0xf] }
 0x244   :  { %v1102_v62 = vpop.f32.mrf.mxu2 }
 0x245   :  { %v1103_v34 = vadd.f32 %v1102_v62, %v1014_v52  ;;  %v1033_v10 = vpop.f32.mrf.mxu1 }
 0x246   :  { %v1034_v40 = vadd.f32 %v1033_v10, %v711_v14 }
 0x247   :  { %v1170_v19 = vmax.f32 %v1103_v34, 0.0  ;;  %v1166_v34 = vmax.f32 %v6120_v22, 0.0  ;;  %v4782_v22 = vld [vmem:[%s7580_s5 + $0x4] sm:$0xf0] }
 0x24c   :  { %v1104_v16 = vpop.f32.mrf.mxu2 }
 0x24d   :  { %v6158_v9 = vpop.f32.mrf.mxu1  ;;  %v1105_v53 = vadd.f32 %v1104_v16, %v1016_v25 }
 0x24f   :  { %v1171_v52 = vmax.f32 %v1105_v53, 0.0 }
 0x251   :  { %v1198_v33 = vpack.c.bf16 %v1171_v52, %v1170_v19 }
 0x254   :  { %v1107_v23 = vpop.f32.mrf.mxu2 }
 0x255   :  { %v1038_v37 = vpop.f32.mrf.mxu1  ;;  %v1108_v49 = vadd.f32 %v1107_v23, %v1019_v2  ;;  %v1169_v23 = vmax.f32 %v1100_v30, 0.0 }
 0x256   :  { %v1039_v60 = vadd.f32 %v1038_v37, %v721_v31 }
 0x257   :  { %v1172_v7 = vmax.f32 %v1108_v49, 0.0  ;;  %v1197_v13 = vpack.c.bf16 %v1169_v23, %v1168_v41 }
 0x25c   :  { %v1109_v39 = vpop.f32.mrf.mxu2 }
 0x25d   :  { %v1110_v42 = vadd.f32 %v1109_v39, %v1021_v58  ;;  %v6174_v27 = vpop.f32.mrf.mxu1  ;;  %v1167_v39 = vmax.f32 %v1095_v20, 0.0 }
 0x25f   :  { %v1173_v5 = vmax.f32 %v1110_v42, 0.0  ;;  %v1196_v10 = vpack.c.bf16 %v1167_v39, %v1166_v34 }
 0x261   :  { %v1199_v62 = vpack.c.bf16 %v1173_v5, %v1172_v7 }
 0x264   :  { %v1112_v29 = vpop.f32.mrf.mxu2 }
 0x265   :  { %v1113_v51 = vadd.f32 %v1112_v29, %v1024_v55 }
 0x267   :  { %v1174_v17 = vmax.f32 %v1113_v51, 0.0  ;;  %v4786_v51 = vld [vmem:[%s7580_s5 + $0x24] sm:$0xf0] }
 0x26c   :  { %v1114_v3 = vpop.f32.mrf.mxu2 }
 0x26d   :  { %v1115_v36 = vadd.f32 %v1114_v3, %v1026_v1  ;;  %v1165_v3 = vmax.f32 %v1090_v21, 0.0 }
 0x26f   :  { %v1175_v8 = vmax.f32 %v1115_v36, 0.0  ;;  %v1195_v48 = vpack.c.bf16 %v1165_v3, %v1164_v26 }
 0x271   :  { %v1200_v4 = vpack.c.bf16 %v1175_v8, %v1174_v17  ;;  %v4163_v17 = vld [vmem:[%s7580_s5 + $0x30] sm:$0xf] }
 0x274   :  { %v1117_v35 = vpop.f32.mrf.mxu2 }
 0x275   :  { %v1118_v24 = vadd.f32 %v1117_v35, %v1029_v0  ;;  %v1043_v35 = vpop.f32.mrf.mxu1  ;;  %v4140_v0 = vor.u32 %v4782_v22, %v4139_v59 }
 0x277   :  { %v1176_v45 = vmax.f32 %v1118_v24, 0.0 }
 0x27c   :  { %v1119_v61 = vpop.f32.mrf.mxu2 }
 0x27d   :  { %v1120_v44 = vadd.f32 %v1119_v61, %v1031_v15  ;;  %v1045_v1 = vpop.f32.mrf.mxu1  ;;  %v4784_v61 = vld [vmem:[%s7580_s5 + $0x14] sm:$0xf0] }
 0x27e   :  { %v4148_v36 = vor.u32 %v4784_v61, %v4147_v6  ;;  %v4187_v6 = vld [vmem:[%s7580_s5 + $0x60] sm:$0xf]  ;;  %v4794_v61 = vld [vmem:[%s7580_s5 + $0x64] sm:$0xf0] }
 0x27f   :  { %v1177_v18 = vmax.f32 %v1120_v44, 0.0 }
 0x281   :  { %v1201_v28 = vpack.c.bf16 %v1177_v18, %v1176_v45  ;;  %v746_v18 = vpop.permute.xlu1 %745 }
 0x283   :  { %1629 = vmatpush.bf16.msrb.mxu3 %v1201_v28 }
 0x284   :  { %v1122_v57 = vpop.f32.mrf.mxu2 }
 0x285   :  { %v6168_v32 = vadd.f32 %v1122_v57, %v1034_v40  ;;  %v1048_v24 = vpop.f32.mrf.mxu1  ;;  %v4788_v57 = vld [vmem:[%s7580_s5 + $0x34] sm:$0xf0] }
 0x286   :  { %v1049_v5 = vadd.f32 %v1048_v24, %v6077_v11  ;;  %v4164_v7 = vor.u32 %v4788_v57, %v4163_v17  ;;  %v4203_v17 = vld [vmem:[%s7580_s5 + $0x80] sm:$0xf]  ;;  %v4798_v57 = vld [vmem:[%s7580_s5 + $0x84] sm:$0xf0] }
 0x287   :  { %1630 = vmatpush.bf16.msrb.mxu3 %v1200_v4 }
 0x289   :  { %v731_v28 = vpop.permute.xlu1 %730 }
 0x28b   :  { %1631 = vmatpush.bf16.msrb.mxu3 %v1199_v62  ;;  %v1044_v62 = vadd.f32 %v1043_v35, %v731_v28  ;;  %v4787_v28 = vld [vmem:[%s7580_s5 + $0x34] sm:$0xf] }
 0x28c   :  { %v6176_v16 = vpop.f32.mrf.mxu2 }
 0x28d   :  { %v1050_v44 = vpop.f32.mrf.mxu1 }
 0x28e   :  { %v1051_v25 = vadd.f32 %v1050_v44, %v746_v18  ;;  %v4785_v44 = vld [vmem:[%s7580_s5 + $0x24] sm:$0xf]  ;;  %v4195_v18 = vld [vmem:[%s7580_s5 + $0x70] sm:$0xf] }
 0x28f   :  { %1632 = vmatpush.bf16.msrb.mxu3 %v1198_v33 }
 0x291   :  { %v726_v23 = vpop.permute.xlu1 %725 }
 0x292   :  { %v1041_v33 = vadd.f32 %v6174_v27, %v726_v23  ;;  %v4171_v27 = vld [vmem:[%s7580_s5 + $0x40] sm:$0xf] }
 0x293   :  { %1633 = vmatpush.bf16.msrb.mxu3 %v1197_v13  ;;  %v716_v13 = vpop.permute.xlu0 %715 }
 0x294   :  { %v1127_v29 = vpop.f32.mrf.mxu2 }
 0x295   :  { %v6184_v50 = vadd.f32 %v1127_v29, %v1039_v60  ;;  %v1053_v2 = vpop.f32.mrf.mxu1 }
 0x296   :  { %v1054_v37 = vadd.f32 %v1053_v2, %v6038_v43  ;;  %v1046_v43 = vadd.f32 %v1045_v1, %v6156_v46  ;;  %v1036_v46 = vadd.f32 %v6158_v9, %v716_v13  ;;  %v4783_v1 = vld [vmem:[%s7580_s5 + $0x14] sm:$0xf]  ;;  %v4796_v2 = vld [vmem:[%s7580_s5 + $0x74] sm:$0xf0] }
 0x297   :  { %1634 = vmatpush.bf16.msrb.mxu3 %v1196_v10  ;;  %v1180_v3 = vmax.f32 %v6184_v50, 0.0  ;;  %v4790_v10 = vld [vmem:[%s7580_s5 + $0x44] sm:$0xf0]  ;;  %v4141_v50 = vld [vmem:[%s7580_s5 + $0x8] sm:$0xf0] }
 0x298   :  { %v1125_v34 = vadd.f32 %v6176_v16, %v1036_v46  ;;  %v4172_v9 = vor.u32 %v4790_v10, %v4171_v27  ;;  %v4781_v16 = vld [vmem:[%s7580_s5 + $0x4] sm:$0xf]  ;;  %v4189_v10 = vld [vmem:[%s7580_s5 + $0x68] sm:$0xf0] }
 0x299   :  { %v4144_v22 = vor.u32 %v4781_v16, %v4141_v50  ;;  %v4793_v27 = vld [vmem:[%s7580_s5 + $0x64] sm:$0xf] }
 0x29a   :  { %v1179_v35 = vmax.f32 %v1125_v34, 0.0  ;;  %v4802_v34 = vld [vmem:[%s7580_s5 + $0xa4] sm:$0xf0] }
 0x29b   :  { %1635 = vmatpush.bf16.msrb.mxu3 %v1195_v48  ;;  %v1178_v48 = vmax.f32 %v6168_v32, 0.0  ;;  %v4792_v32 = vld [vmem:[%s7580_s5 + $0x54] sm:$0xf0] }
 0x29c   :  { %v1129_v54 = vpop.f32.mrf.mxu2 }
 0x29d   :  { %v1055_v14 = vpop.f32.mrf.mxu1  ;;  %v1130_v11 = vadd.f32 %v1129_v54, %v1041_v33  ;;  %v1202_v59 = vpack.c.bf16 %v1179_v35, %v1178_v48  ;;  %v4179_v54 = vld [vmem:[%s7580_s5 + $0x50] sm:$0xf] }
 0x29e   :  { %v1056_v40 = vadd.f32 %v1055_v14, %v6054_v47  ;;  %v4165_v14 = vld [vmem:[%s7580_s5 + $0x38] sm:$0xf0] }
 0x29f   :  { %1636 = vmatpush.bf16.msrb.mxu3 %v6103_v63  ;;  %v4155_v63 = vld [vmem:[%s7580_s5 + $0x20] sm:$0xf]  ;;  %v1181_v60 = vmax.f32 %v1130_v11, 0.0 }
 0x2a0   :  { %v4156_v42 = vor.u32 %v4786_v51, %v4155_v63  ;;  %v6261_v51 = vpop.permute.xlu2 %1431 }
 0x2a1   :  { %v1203_v26 = vpack.c.bf16 %v1181_v60, %v1180_v3 }
 0x2a2   :  { %1637 = vmatmul.bf16.vlgmr.msrb.gmra.mxu3 %v4140_v0  ;;  %v4180_v0 = vor.u32 %v4792_v32, %v4179_v54 }
 0x2a4   :  { %v1132_v15 = vpop.f32.mrf.mxu2 }
 0x2a5   :  { %v1133_v38 = vadd.f32 %v1132_v15, %v1044_v62  ;;  %v4149_v15 = vld [vmem:[%s7580_s5 + $0x18] sm:$0xf0]  ;;  %v4211_v62 = vld [vmem:[%s7580_s5 + $0x90] sm:$0xf] }
 0x2a6   :  { %v4152_v24 = vor.u32 %v4783_v1, %v4149_v15  ;;  %v4197_v1 = vld [vmem:[%s7580_s5 + $0x78] sm:$0xf0] }
 0x2a7   :  { %v1182_v31 = vmax.f32 %v1133_v38, 0.0  ;;  %v4791_v38 = vld [vmem:[%s7580_s5 + $0x54] sm:$0xf] }
 0x2ac   :  { %v1134_v55 = vpop.f32.mrf.mxu2 }
 0x2ad   :  { %v1135_v12 = vadd.f32 %v1134_v55, %v1046_v43  ;;  %v6253_v55 = vpop.permute.xlu1 %1426 }
 0x2af   :  { %v1183_v21 = vmax.f32 %v1135_v12, 0.0  ;;  %v4800_v12 = vld [vmem:[%s7580_s5 + $0x94] sm:$0xf0] }
 0x2b0   :  { %v4212_v23 = vor.u32 %v4800_v12, %v4211_v62 }
 0x2b1   :  { %v1204_v29 = vpack.c.bf16 %v1183_v21, %v1182_v31  ;;  %v4219_v31 = vld [vmem:[%s7580_s5 + $0xa0] sm:$0xf] }
 0x2b2   :  { %1642 = vmatmul.bf16.gmra.mxu3 %v4148_v36  ;;  %v4188_v36 = vor.u32 %v4794_v61, %v4187_v6  ;;  %v4220_v60 = vor.u32 %v4802_v34, %v4219_v31 }
 0x2b4   :  { %v1137_v58 = vpop.f32.mrf.mxu2 }
 0x2b5   :  { %v1138_v30 = vadd.f32 %v1137_v58, %v1049_v5  ;;  %v4157_v58 = vld [vmem:[%s7580_s5 + $0x28] sm:$0xf0]  ;;  %v4789_v5 = vld [vmem:[%s7580_s5 + $0x44] sm:$0xf] }
 0x2b6   :  { %v4160_v63 = vor.u32 %v4785_v44, %v4157_v58  ;;  %v4235_v44 = vld [vmem:[%s7580_s5 + $0xc0] sm:$0xf]  ;;  %v4806_v58 = vld [vmem:[%s7580_s5 + $0xc4] sm:$0xf0] }
 0x2b7   :  { %v1184_v41 = vmax.f32 %v1138_v30, 0.0 }
 0x2bc   :  { %v1139_v45 = vpop.f32.mrf.mxu2 }
 0x2bd   :  { %v1140_v4 = vadd.f32 %v1139_v45, %v1051_v25  ;;  %v6264_v45 = vpop.permute.xlu1 %1351  ;;  %v4168_v25 = vor.u32 %v4787_v28, %v4165_v14  ;;  %v4797_v28 = vld [vmem:[%s7580_s5 + $0x84] sm:$0xf]  ;;  %v4205_v14 = vld [vmem:[%s7580_s5 + $0x88] sm:$0xf0] }
 0x2bf   :  { %v1185_v19 = vmax.f32 %v1140_v4, 0.0  ;;  %v4173_v4 = vld [vmem:[%s7580_s5 + $0x48] sm:$0xf0] }
 0x2c1   :  { %v1205_v39 = vpack.c.bf16 %v1185_v19, %v1184_v41  ;;  %v4181_v41 = vld [vmem:[%s7580_s5 + $0x58] sm:$0xf0] }
 0x2c2   :  { %1647 = vmatmul.bf16.gmra.mxu3 %v4156_v42  ;;  %v4196_v42 = vor.u32 %v4796_v2, %v4195_v18  ;;  %v4184_v11 = vor.u32 %v4791_v38, %v4181_v41  ;;  %v4236_v2 = vor.u32 %v4806_v58, %v4235_v44  ;;  %v4243_v38 = vld [vmem:[%s7580_s5 + $0xd0] sm:$0xf]  ;;  %v4808_v41 = vld [vmem:[%s7580_s5 + $0xd4] sm:$0xf0]  ;;  %v4251_v58 = vld [vmem:[%s7580_s5 + $0xe0] sm:$0xf] }
 0x2c3   :  { %v4244_v34 = vor.u32 %v4808_v41, %v4243_v38  ;;  %v4259_v41 = vld [vmem:[%s7580_s5 + $0xf0] sm:$0xf] }
 0x2c4   :  { %v1142_v8 = vpop.f32.mrf.mxu2 }
 0x2c5   :  { %v1143_v49 = vadd.f32 %v1142_v8, %v1054_v37  ;;  %v6272_v8 = vpop.permute.xlu2 %1416  ;;  %v6280_v37 = vpop.permute.xlu1 %1336 }
 0x2c7   :  { %v1186_v52 = vmax.f32 %v1143_v49, 0.0 }
 0x2cc   :  { %v1144_v53 = vpop.f32.mrf.mxu2 }
 0x2cd   :  { %v1145_v56 = vadd.f32 %v1144_v53, %v1056_v40  ;;  %v6283_v40 = vpop.permute.xlu2 %1341  ;;  %v6285_v49 = vpop.permute.xlu1 %1411  ;;  %v4204_v53 = vor.u32 %v4798_v57, %v4203_v17  ;;  %v4208_v57 = vor.u32 %v4797_v28, %v4205_v14 }
 0x2cf   :  { %v1187_v47 = vmax.f32 %v1145_v56, 0.0  ;;  %v6299_v56 = vpop.permute.xlu0 %1346 }
 0x2d1   :  { %v1206_v20 = vpack.c.bf16 %v1187_v47, %v1186_v52 }
 0x2d2   :  { %1652 = vmatmul.bf16.gmra.mxu3 %v4164_v7  ;;  %v4176_v7 = vor.u32 %v4789_v5, %v4173_v4 }
 0x2d3   :  { %1721 = vmatpush.bf16.msrb.mxu0 %v1206_v20 }
 0x2d5   :  { %v6301_v43 = vpop.permute.xlu2 %1326  ;;  %v6303_v30 = vpop.permute.xlu1 %1396 }
 0x2d7   :  { %1722 = vmatpush.bf16.msrb.mxu0 %v1205_v39  ;;  %v6306_v47 = vpop.permute.xlu0 %1421 }
 0x2db   :  { %1723 = vmatpush.bf16.msrb.mxu0 %v1204_v29 }
 0x2dd   :  { %v6314_v19 = vpop.permute.xlu2 %1401  ;;  %v6316_v33 = vpop.permute.xlu1 %1321 }
 0x2df   :  { %1724 = vmatpush.bf16.msrb.mxu0 %v1203_v26  ;;  %v6324_v21 = vpop.permute.xlu0 %1406  ;;  %v4192_v26 = vor.u32 %v4793_v27, %v4189_v10 }
 0x2e2   :  { %1657 = vmatmul.bf16.gmra.mxu3 %v4172_v9 }
 0x2e3   :  { %1725 = vmatpush.bf16.msrb.mxu0 %v1202_v59  ;;  %v4227_v59 = vld [vmem:[%s7580_s5 + $0xb0] sm:$0xf] }
 0x2e5   :  { %v6329_v13 = vpop.permute.xlu2 %1386  ;;  %v6331_v46 = vpop.permute.xlu1 %1306 }
 0x2e6   :  { %4265 = vmatmul.msk.bf16.vlgmr.msrb.gmra.mxu0 %vm932_vm3, %v4144_v22  ;;  %v4804_v22 = vld [vmem:[%s7580_s5 + $0xb4] sm:$0xf0] }
 0x2e7   :  { %v6339_v29 = vpop.permute.xlu0 %1331  ;;  %v4228_v32 = vor.u32 %v4804_v22, %v4227_v59 }
 0x2ed   :  { %v6347_v35 = vpop.permute.xlu2 %1311  ;;  %v6349_v9 = vpop.permute.xlu1 %1381 }
 0x2ef   :  { %v6352_v48 = vpop.permute.xlu0 %1316 }
 0x2f2   :  { %1662 = vmatmul.bf16.gmra.mxu3 %v4180_v0  ;;  %v4795_v0 = vld [vmem:[%s7580_s5 + $0x74] sm:$0xf] }
 0x2f3   :  { %v4200_v15 = vor.u32 %v4795_v0, %v4197_v1 }
 0x2f5   :  { %v6356_v50 = vpop.permute.xlu2 %1296  ;;  %v6364_v54 = vpop.permute.xlu1 %1366 }
 0x2f6   :  { %4266 = vmatmul.msk.bf16.gmra.mxu0 %vm932_vm3, %v4152_v24 }
 0x2f7   :  { %v6372_v24 = vpop.permute.xlu0 %1391 }
 0x2fd   :  { %v6374_v61 = vpop.permute.xlu2 %1371 }
 0x302   :  { %1667 = vmatmul.bf16.gmra.mxu3 %v4188_v36  ;;  %v1292_v36 = vpop.permute.xlu1 %1291 }
 0x306   :  { %4267 = vmatmul.msk.bf16.gmra.mxu0 %vm932_vm3, %v4160_v63  ;;  %v6383_v63 = vpop.permute.xlu0 %1376 }
 0x30e   :  { %v1302_v4 = vpop.permute.xlu0 %1301 }
 0x312   :  { %1672 = vmatmul.bf16.gmra.mxu3 %v4196_v42  ;;  %v6387_v42 = vpop.permute.xlu2 %1356 }
 0x316   :  { %4268 = vmatmul.msk.bf16.gmra.mxu0 %vm932_vm3, %v4168_v25  ;;  %v1277_v25 = vpop.permute.xlu1 %1276  ;;  %v1287_v10 = vpop.permute.xlu0 %1286 }
 0x31a   :  { %v1282_v62 = vpop.permute.xlu2 %1281 }
 0x322   :  { %1677 = vmatmul.bf16.gmra.mxu3 %v4204_v53 }
 0x325   :  { %v1638_v52 = vpop.f32.mrf.mxu3 }
 0x326   :  { %4269 = vmatmul.msk.bf16.gmra.mxu0 %vm932_vm3, %v4176_v7  ;;  %v1639_v17 = vadd.f32 %v1638_v52, %v1277_v25 }
 0x32d   :  { %v1640_v20 = vpop.f32.mrf.mxu3 }
 0x32e   :  { %v1641_v12 = vadd.f32 %v1640_v20, %v1282_v62  ;;  %v4213_v20 = vld [vmem:[%s7580_s5 + $0x98] sm:$0xf0] }
 0x332   :  { %1682 = vmatmul.bf16.gmra.mxu3 %v4212_v23 }
 0x335   :  { %v6326_v39 = vpop.f32.mrf.mxu3 }
 0x336   :  { %4270 = vmatmul.msk.bf16.gmra.mxu0 %vm932_vm3, %v4184_v11  ;;  %v1644_v59 = vadd.f32 %v6326_v39, %v1287_v10 }
 0x33d   :  { %v1645_v3 = vpop.f32.mrf.mxu3 }
 0x33e   :  { %v1646_v1 = vadd.f32 %v1645_v3, %v1292_v36  ;;  %v4221_v3 = vld [vmem:[%s7580_s5 + $0xa8] sm:$0xf0] }
 0x342   :  { %1687 = vmatmul.bf16.gmra.mxu3 %v4220_v60  ;;  %v4799_v60 = vld [vmem:[%s7580_s5 + $0x94] sm:$0xf] }
 0x343   :  { %v4216_v22 = vor.u32 %v4799_v60, %v4213_v20  ;;  %v4803_v60 = vld [vmem:[%s7580_s5 + $0xb4] sm:$0xf] }
 0x345   :  { %v6354_v16 = vpop.f32.mrf.mxu3 }
 0x346   :  { %4271 = vmatmul.msk.bf16.gmra.mxu0 %vm932_vm3, %v4192_v26 }
 0x34d   :  { %v1650_v6 = vpop.f32.mrf.mxu3 }
 0x352   :  { %1692 = vmatmul.bf16.gmra.mxu3 %v4228_v32 }
 0x355   :  { %v6385_v18 = vpop.f32.mrf.mxu3 }
 0x356   :  { %4272 = vmatmul.msk.bf16.gmra.mxu0 %vm932_vm3, %v4200_v15  ;;  %v1654_v20 = vadd.f32 %v6385_v18, %v6331_v46  ;;  %v4237_v46 = vld [vmem:[%s7580_s5 + $0xc8] sm:$0xf0] }
 0x35d   :  { %v1655_v7 = vpop.f32.mrf.mxu3 }
 0x362   :  { %1697 = vmatmul.bf16.gmra.mxu3 %v4236_v2  ;;  %v4810_v2 = vld [vmem:[%s7580_s5 + $0xe4] sm:$0xf0] }
 0x363   :  { %v1727_v53 = vpop.f32.mrf.mxu0  ;;  %v4252_v25 = vor.u32 %v4810_v2, %v4251_v58 }
 0x364   :  { %v1728_v5 = vadd.f32 %v1727_v53, %v1639_v17  ;;  %v4801_v17 = vld [vmem:[%s7580_s5 + $0xa4] sm:$0xf] }
 0x365   :  { %v1658_v26 = vpop.f32.mrf.mxu3  ;;  %v4224_v53 = vor.u32 %v4801_v17, %v4221_v3 }
 0x366   :  { %4273 = vmatmul.msk.bf16.gmra.mxu0 %vm932_vm3, %v4208_v57  ;;  %v1807_v11 = vmax.f32 %v1728_v5, 0.0  ;;  %v1649_v57 = vadd.f32 %v6354_v16, %v6356_v50 }
 0x36b   :  { %v1729_v23 = vpop.f32.mrf.mxu0 }
 0x36c   :  { %v1730_v52 = vadd.f32 %v1729_v23, %v1641_v12  ;;  %v1651_v23 = vadd.f32 %v1650_v6, %v1302_v4  ;;  %v4229_v6 = vld [vmem:[%s7580_s5 + $0xb8] sm:$0xf0] }
 0x36d   :  { %v6412_v15 = vpop.f32.mrf.mxu3  ;;  %v4232_v10 = vor.u32 %v4803_v60, %v4229_v6  ;;  %v4261_v60 = vld [vmem:[%s7580_s5 + $0xf8] sm:$0x10] }
 0x36e   :  { %v1808_v31 = vmax.f32 %v1730_v52, 0.0  ;;  %v4812_v52 = vld [vmem:[%s7580_s5 + $0xf4] sm:$0x10] }
 0x370   :  { %v6408_v27 = vpack.c.bf16 %v1808_v31, %v1807_v11  ;;  %v4260_v31 = vor.u32 %v4812_v52, %v4259_v41 }
 0x372   :  { %1702 = vmatmul.bf16.gmra.mxu3 %v4244_v34 }
 0x373   :  { %v1732_v32 = vpop.f32.mrf.mxu0 }
 0x374   :  { %v1733_v0 = vadd.f32 %v1732_v32, %v1644_v59 }
 0x375   :  { %v6430_v12 = vpop.f32.mrf.mxu3 }
 0x376   :  { %4274 = vmatmul.msk.bf16.gmra.mxu0 %vm932_vm3, %v4216_v22  ;;  %v1809_v39 = vmax.f32 %v1733_v0, 0.0  ;;  %v1656_v0 = vadd.f32 %v1655_v7, %v6347_v35 }
 0x37b   :  { %v1734_v44 = vpop.f32.mrf.mxu0 }
 0x37c   :  { %v1735_v28 = vadd.f32 %v1734_v44, %v1646_v1 }
 0x37d   :  { %v1665_v34 = vpop.f32.mrf.mxu3 }
 0x37e   :  { %v1810_v14 = vmax.f32 %v1735_v28, 0.0  ;;  %v4805_v28 = vld [vmem:[%s7580_s5 + $0xc4] sm:$0xf] }
 0x380   :  { %v6426_v36 = vpack.c.bf16 %v1810_v14, %v1809_v39  ;;  %v1659_v39 = vadd.f32 %v1658_v26, %v6352_v48  ;;  %v4240_v14 = vor.u32 %v4805_v28, %v4237_v46  ;;  %v1666_v46 = vadd.f32 %v1665_v34, %v6339_v29 }
 0x382   :  { %1707 = vmatmul.bf16.gmra.mxu3 %v4252_v25 }
 0x383   :  { %v1737_v5 = vpop.f32.mrf.mxu0 }
 0x384   :  { %v1738_v62 = vadd.f32 %v1737_v5, %v1649_v57  ;;  %v4807_v57 = vld [vmem:[%s7580_s5 + $0xd4] sm:$0xf] }
 0x385   :  { %v1668_v32 = vpop.f32.mrf.mxu3 }
 0x386   :  { %4275 = vmatmul.msk.bf16.gmra.mxu0 %vm932_vm3, %v4224_v53  ;;  %v1811_v16 = vmax.f32 %v1738_v62, 0.0  ;;  %v4245_v53 = vld [vmem:[%s7580_s5 + $0xd8] sm:$0xf0] }
 0x387   :  { %v4248_v5 = vor.u32 %v4807_v57, %v4245_v53 }
 0x38b   :  { %v1739_v38 = vpop.f32.mrf.mxu0 }
 0x38c   :  { %v1740_v11 = vadd.f32 %v1739_v38, %v1651_v23  ;;  %v4809_v23 = vld [vmem:[%s7580_s5 + $0xe4] sm:$0xf]  ;;  %v4253_v38 = vld [vmem:[%s7580_s5 + $0xe8] sm:$0xf0] }
 0x38d   :  { %v1670_v25 = vpop.f32.mrf.mxu3  ;;  %v4256_v52 = vor.u32 %v4809_v23, %v4253_v38 }
 0x38e   :  { %v1812_v50 = vmax.f32 %v1740_v11, 0.0 }
 0x390   :  { %v6445_v4 = vpack.c.bf16 %v1812_v50, %v1811_v16 }
 0x392   :  { %1712 = vmatmul.bf16.gmra.mxu3 %v4260_v31  ;;  %v4811_v31 = vld [vmem:[%s7580_s5 + $0xf4] sm:$0xf] }
 0x393   :  { %v1742_v59 = vpop.f32.mrf.mxu0  ;;  %v4264_v6 = vor.u32 %v4811_v31, %v4261_v60 }
 0x394   :  { %v1743_v22 = vadd.f32 %v1742_v59, %v1654_v20 }
 0x395   :  { %v1673_v3 = vpop.f32.mrf.mxu3 }
 0x396   :  { %4276 = vmatmul.msk.bf16.gmra.mxu0 %vm932_vm3, %v4232_v10  ;;  %v1813_v58 = vmax.f32 %v1743_v22, 0.0  ;;  %v1674_v59 = vadd.f32 %v1673_v3, %v6299_v56  ;;  %v1671_v22 = vadd.f32 %v1670_v25, %v6283_v40  ;;  %v1664_v56 = vadd.f32 %v6430_v12, %v6301_v43 }
 0x39b   :  { %v1744_v1 = vpop.f32.mrf.mxu0 }
 0x39c   :  { %v1745_v44 = vadd.f32 %v1744_v1, %v1656_v0 }
 0x39d   :  { %v1675_v48 = vpop.f32.mrf.mxu3 }
 0x39e   :  { %v1814_v2 = vmax.f32 %v1745_v44, 0.0  ;;  %v1676_v0 = vadd.f32 %v1675_v48, %v6264_v45  ;;  %v1661_v45 = vadd.f32 %v6412_v15, %v6316_v33 }
 0x3a0   :  { %v6457_v18 = vpack.c.bf16 %v1814_v2, %v1813_v58  ;;  %v1669_v58 = vadd.f32 %v1668_v32, %v6280_v37 }
 0x3a3   :  { %v1747_v17 = vpop.f32.mrf.mxu0 }
 0x3a4   :  { %v1748_v35 = vadd.f32 %v1747_v17, %v1659_v39 }
 0x3a5   :  { %v1678_v41 = vpop.f32.mrf.mxu3 }
 0x3a6   :  { %4277 = vmatmul.msk.bf16.gmra.mxu0 %vm932_vm3, %v4240_v14  ;;  %v1679_v37 = vadd.f32 %v1678_v41, %v6387_v42  ;;  %v4814_v41 = vld [vmem:[%s7582_s7 + $0x4] sm:$0xf0] }
 0x3ab   :  { %v1749_v7 = vpop.f32.mrf.mxu0 }
 0x3ac   :  { %v1750_v34 = vadd.f32 %v1749_v7, %v1661_v45 }
 0x3ad   :  { %v6475_v16 = vpop.f32.mrf.mxu3 }
 0x3ae   :  { %v1816_v43 = vmax.f32 %v1750_v34, 0.0 }
 0x3b3   :  { %v1752_v62 = vpop.f32.mrf.mxu0 }
 0x3b4   :  { %v1753_v32 = vadd.f32 %v1752_v62, %v1664_v56  ;;  %v4820_v56 = vld [vmem:[%s7582_s7 + $0x34] sm:$0xf0] }
 0x3b5   :  { %v1683_v10 = vpop.f32.mrf.mxu3 }
 0x3b6   :  { %4278 = vmatmul.msk.bf16.gmra.mxu0 %vm932_vm3, %v4248_v5  ;;  %v1817_v38 = vmax.f32 %v1753_v32, 0.0  ;;  %v1684_v42 = vadd.f32 %v1683_v10, %v6364_v54  ;;  %v4822_v32 = vld [vmem:[%s7582_s7 + $0x44] sm:$0xf0] }
 0x3bb   :  { %v1754_v26 = vpop.f32.mrf.mxu0 }
 0x3bc   :  { %v1755_v3 = vadd.f32 %v1754_v26, %v1666_v46 }
 0x3bd   :  { %v6489_v57 = vpop.f32.mrf.mxu3 }
 0x3be   :  { %v1818_v5 = vmax.f32 %v1755_v3, 0.0 }
 0x3c0   :  { %v1844_v12 = vpack.c.bf16 %v1818_v5, %v1817_v38  ;;  %v4824_v38 = vld [vmem:[%s7582_s7 + $0x54] sm:$0xf0] }
 0x3c3   :  { %v1757_v11 = vpop.f32.mrf.mxu0 }
 0x3c4   :  { %v1758_v39 = vadd.f32 %v1757_v11, %v1669_v58 }
 0x3c5   :  { %v1688_v26 = vpop.f32.mrf.mxu3 }
 0x3c6   :  { %4279 = vmatmul.msk.bf16.gmra.mxu0 %vm932_vm3, %v4256_v52  ;;  %v1819_v53 = vmax.f32 %v1758_v39, 0.0  ;;  %v1815_v52 = vmax.f32 %v1748_v35, 0.0  ;;  %v4283_v35 = vld [vmem:[%s7582_s7] sm:$0xf]  ;;  %v1689_v31 = vadd.f32 %v1688_v26, %v6383_v63 }
 0x3c8   :  { %v1843_v33 = vpack.c.bf16 %v1816_v43, %v1815_v52 }
 0x3cb   :  { %v1759_v50 = vpop.f32.mrf.mxu0 }
 0x3cc   :  { %v1760_v2 = vadd.f32 %v1759_v50, %v1671_v22  ;;  %v4284_v50 = vor.u32 %v4814_v41, %v4283_v35  ;;  %v4331_v41 = vld [vmem:[%s7582_s7 + $0x60] sm:$0xf] }
 0x3cd   :  { %v6502_v15 = vpop.f32.mrf.mxu3 }
 0x3ce   :  { %v1820_v40 = vmax.f32 %v1760_v2, 0.0 }
 0x3d0   :  { %v1845_v23 = vpack.c.bf16 %v1820_v40, %v1819_v53 }
 0x3d3   :  { %v1762_v20 = vpop.f32.mrf.mxu0 }
 0x3d4   :  { %v1763_v1 = vadd.f32 %v1762_v20, %v1674_v59  ;;  %v4816_v20 = vld [vmem:[%s7582_s7 + $0x14] sm:$0xf0] }
 0x3d6   :  { %4280 = vmatmul.msk.bf16.gmra.mxu0 %vm932_vm3, %v4264_v6  ;;  %v1821_v14 = vmax.f32 %v1763_v1, 0.0  ;;  %v4291_v6 = vld [vmem:[%s7582_s7 + $0x10] sm:$0xf]  ;;  %v4299_v1 = vld [vmem:[%s7582_s7 + $0x20] sm:$0xf] }
 0x3d7   :  { %v4292_v59 = vor.u32 %v4816_v20, %v4291_v6 }
 0x3db   :  { %v1764_v44 = vpop.f32.mrf.mxu0 }
 0x3dc   :  { %v1765_v28 = vadd.f32 %v1764_v44, %v1676_v0  ;;  %v4818_v44 = vld [vmem:[%s7582_s7 + $0x24] sm:$0xf0] }
 0x3de   :  { %v1822_v17 = vmax.f32 %v1765_v28, 0.0  ;;  %v4300_v28 = vor.u32 %v4818_v44, %v4299_v1 }
 0x3e0   :  { %v1846_v25 = vpack.c.bf16 %v1822_v17, %v1821_v14  ;;  %v4307_v17 = vld [vmem:[%s7582_s7 + $0x30] sm:$0xf] }
 0x3e1   :  { %v4308_v40 = vor.u32 %v4820_v56, %v4307_v17 }
 0x3e2   :  { %2274 = vmatpush.bf16.msrb.mxu1 %v1846_v25 }
 0x3e3   :  { %v1767_v29 = vpop.f32.mrf.mxu0 }
 0x3e4   :  { %v6496_v48 = vadd.f32 %v1767_v29, %v1679_v37 }
 0x3e6   :  { %2275 = vmatpush.bf16.msrb.mxu1 %v1845_v23  ;;  %v4323_v23 = vld [vmem:[%s7582_s7 + $0x50] sm:$0xf] }
 0x3e7   :  { %v4324_v26 = vor.u32 %v4824_v38, %v4323_v23 }
 0x3ea   :  { %2276 = vmatpush.bf16.msrb.mxu1 %v1844_v12 }
 0x3eb   :  { %v6498_v11 = vpop.f32.mrf.mxu0 }
 0x3ee   :  { %2277 = vmatpush.bf16.msrb.mxu1 %v1843_v33 }
 0x3f2   :  { %2278 = vmatpush.bf16.msrb.mxu1 %v6457_v18  ;;  %v1693_v18 = vpop.f32.mrf.mxu3 }
 0x3f3   :  { %v1772_v7 = vpop.f32.mrf.mxu0  ;;  %v1694_v63 = vadd.f32 %v1693_v18, %v6329_v13  ;;  %v4826_v18 = vld [vmem:[%s7582_s7 + $0x64] sm:$0xf0] }
 0x3f4   :  { %v6504_v62 = vadd.f32 %v1772_v7, %v1684_v42 }
 0x3f6   :  { %2279 = vmatpush.bf16.msrb.mxu1 %v6445_v4 }
 0x3fa   :  { %2280 = vmatpush.bf16.msrb.mxu1 %v6426_v36  ;;  %v6520_v36 = vpop.f32.mrf.mxu3 }
 0x3fb   :  { %v6514_v54 = vpop.f32.mrf.mxu0 }
 0x3fe   :  { %2281 = vmatpush.bf16.msrb.mxu1 %v6408_v27 }
 0x401   :  { %2282 = vmatmul.bf16.vlgmr.msrb.gmra.mxu1 %v4284_v50 }
 0x402   :  { %v1698_v27 = vpop.f32.mrf.mxu3 }
 0x403   :  { %v1777_v4 = vpop.f32.mrf.mxu0  ;;  %v1699_v46 = vadd.f32 %v1698_v27, %v6303_v30  ;;  %v4315_v30 = vld [vmem:[%s7582_s7 + $0x40] sm:$0xf] }
 0x404   :  { %v6518_v60 = vadd.f32 %v1777_v4, %v1689_v31  ;;  %v4316_v29 = vor.u32 %v4822_v32, %v4315_v30  ;;  %v4339_v30 = vld [vmem:[%s7582_s7 + $0x70] sm:$0xf]  ;;  %v1686_v32 = vadd.f32 %v6489_v57, %v6374_v61  ;;  %v1825_v61 = vmax.f32 %v6504_v62, 0.0  ;;  %v4285_v62 = vld [vmem:[%s7582_s7 + $0x8] sm:$0xf0] }
 0x40a   :  { %v1700_v58 = vpop.f32.mrf.mxu3 }
 0x40b   :  { %v6528_v10 = vpop.f32.mrf.mxu0 }
 0x411   :  { %2287 = vmatmul.bf16.gmra.mxu1 %v4292_v59  ;;  %v4332_v59 = vor.u32 %v4826_v18, %v4331_v41  ;;  %v4363_v41 = vld [vmem:[%s7582_s7 + $0xa0] sm:$0xf]  ;;  %v4834_v18 = vld [vmem:[%s7582_s7 + $0xa4] sm:$0xf0] }
 0x412   :  { %v1703_v13 = vpop.f32.mrf.mxu3 }
 0x413   :  { %v1782_v22 = vpop.f32.mrf.mxu0  ;;  %v1704_v1 = vadd.f32 %v1703_v13, %v6324_v21 }
 0x414   :  { %v6531_v0 = vadd.f32 %v1782_v22, %v1694_v63 }
 0x41a   :  { %v1705_v25 = vpop.f32.mrf.mxu3 }
 0x41b   :  { %v1784_v2 = vpop.f32.mrf.mxu0 }
 0x421   :  { %2292 = vmatmul.bf16.gmra.mxu1 %v4300_v28 }
 0x422   :  { %v1708_v37 = vpop.f32.mrf.mxu3 }
 0x423   :  { %v1787_v39 = vpop.f32.mrf.mxu0  ;;  %v1709_v6 = vadd.f32 %v1708_v37, %v6272_v8 }
 0x424   :  { %v6540_v14 = vadd.f32 %v1787_v39, %v1699_v46 }
 0x42a   :  { %v1710_v34 = vpop.f32.mrf.mxu3 }
 0x42b   :  { %v1789_v3 = vpop.f32.mrf.mxu0  ;;  %v1711_v50 = vadd.f32 %v1710_v34, %v6306_v47  ;;  %v1701_v47 = vadd.f32 %v1700_v58, %v6314_v19  ;;  %v4828_v19 = vld [vmem:[%s7582_s7 + $0x74] sm:$0xf0]  ;;  %v1691_v58 = vadd.f32 %v6502_v15, %v6349_v9  ;;  %v1362_v9 = vpop.permute.xlu0 %1361 }
 0x42c   :  { %v1681_v15 = vadd.f32 %v6475_v16, %v1362_v9  ;;  %v4830_v16 = vld [vmem:[%s7582_s7 + $0x84] sm:$0xf0]  ;;  %v4825_v9 = vld [vmem:[%s7582_s7 + $0x64] sm:$0xf] }
 0x42d   :  { %v1790_v8 = vadd.f32 %v1789_v3, %v1701_v47  ;;  %v1831_v3 = vmax.f32 %v6540_v14, 0.0  ;;  %v1827_v14 = vmax.f32 %v6518_v60, 0.0  ;;  %v1823_v60 = vmax.f32 %v6496_v48, 0.0  ;;  %v4355_v48 = vld [vmem:[%s7582_s7 + $0x90] sm:$0xf]  ;;  %v6659_v47 = vpop.permute.xlu1 %1996 }
 0x42f   :  { %v1832_v21 = vmax.f32 %v1790_v8, 0.0 }
 0x431   :  { %2297 = vmatmul.bf16.gmra.mxu1 %v4308_v40 }
 0x432   :  { %v1713_v12 = vpop.f32.mrf.mxu3 }
 0x433   :  { %v1792_v45 = vpop.f32.mrf.mxu0  ;;  %v1714_v42 = vadd.f32 %v1713_v12, %v6253_v55 }
 0x434   :  { %v1793_v39 = vadd.f32 %v1792_v45, %v1704_v1  ;;  %v4340_v45 = vor.u32 %v4828_v19, %v4339_v30  ;;  %v6649_v1 = vpop.permute.xlu0 %1991  ;;  %v4840_v30 = vld [vmem:[%s7582_s7 + $0xd4] sm:$0xf0]  ;;  %v4823_v19 = vld [vmem:[%s7582_s7 + $0x54] sm:$0xf] }
 0x43a   :  { %v1715_v33 = vpop.f32.mrf.mxu3 }
 0x43b   :  { %v1794_v53 = vpop.f32.mrf.mxu0  ;;  %v1716_v7 = vadd.f32 %v1715_v33, %v6261_v51  ;;  %v1706_v51 = vadd.f32 %v1705_v25, %v6285_v49  ;;  %v1696_v49 = vadd.f32 %v6520_v36, %v6372_v24  ;;  %v1833_v25 = vmax.f32 %v1793_v39, 0.0  ;;  %v4815_v33 = vld [vmem:[%s7582_s7 + $0x14] sm:$0xf]  ;;  %v4821_v39 = vld [vmem:[%s7582_s7 + $0x44] sm:$0xf] }
 0x43c   :  { %v1780_v24 = vadd.f32 %v6528_v10, %v1691_v58  ;;  %v1770_v10 = vadd.f32 %v6498_v11, %v1681_v15  ;;  %v4813_v11 = vld [vmem:[%s7582_s7 + $0x4] sm:$0xf]  ;;  %v6667_v8 = vpop.permute.xlu0 %1986  ;;  %v4325_v58 = vld [vmem:[%s7582_s7 + $0x58] sm:$0xf0]  ;;  %v4333_v15 = vld [vmem:[%s7582_s7 + $0x68] sm:$0xf0] }
 0x43d   :  { %v1795_v44 = vadd.f32 %v1794_v53, %v1706_v51  ;;  %v1785_v37 = vadd.f32 %v1784_v2, %v1696_v49  ;;  %v1851_v2 = vpack.c.bf16 %v1832_v21, %v1831_v3  ;;  %v1829_v53 = vmax.f32 %v6531_v0, 0.0  ;;  %v4309_v51 = vld [vmem:[%s7582_s7 + $0x38] sm:$0xf0] }
 0x43e   :  { %v1828_v34 = vmax.f32 %v1780_v24, 0.0  ;;  %v1824_v57 = vmax.f32 %v1770_v10, 0.0  ;;  %v4328_v24 = vor.u32 %v4823_v19, %v4325_v58 }
 0x43f   :  { %v1834_v56 = vmax.f32 %v1795_v44, 0.0  ;;  %v1830_v36 = vmax.f32 %v1785_v37, 0.0 }
 0x440   :  { %v1849_v38 = vpack.c.bf16 %v1828_v34, %v1827_v14  ;;  %v4842_v34 = vld [vmem:[%s7582_s7 + $0xe4] sm:$0xf0] }
 0x441   :  { %2302 = vmatmul.bf16.gmra.mxu1 %v4316_v29  ;;  %v1852_v13 = vpack.c.bf16 %v1834_v56, %v1833_v25  ;;  %v1775_v29 = vadd.f32 %v6514_v54, %v1686_v32  ;;  %v4347_v54 = vld [vmem:[%s7582_s7 + $0x80] sm:$0xf]  ;;  %v6672_v25 = vpop.permute.xlu1 %2071  ;;  %v6697_v32 = vpop.permute.xlu2 %1981 }
 0x442   :  { %v4348_v12 = vor.u32 %v4830_v16, %v4347_v54  ;;  %v4403_v54 = vld [vmem:[%s7582_s7 + $0xf0] sm:$0xf]  ;;  %v4844_v16 = vld [vmem:[%s7582_s7 + $0xf4] sm:$0x10] }
 0x443   :  { %v1797_v5 = vpop.f32.mrf.mxu0  ;;  %v1826_v23 = vmax.f32 %v1775_v29, 0.0  ;;  %v4395_v29 = vld [vmem:[%s7582_s7 + $0xe0] sm:$0xf] }
 0x444   :  { %v1798_v63 = vadd.f32 %v1797_v5, %v1709_v6  ;;  %v1850_v5 = vpack.c.bf16 %v1830_v36, %v1829_v53  ;;  %v6674_v37 = vpop.permute.xlu0 %1971  ;;  %v4396_v10 = vor.u32 %v4842_v34, %v4395_v29 }
 0x445   :  { %v1848_v0 = vpack.c.bf16 %v1826_v23, %v1825_v61  ;;  %v4336_v23 = vor.u32 %v4825_v9, %v4333_v15 }
 0x446   :  { %v1835_v17 = vmax.f32 %v1798_v63, 0.0 }
 0x449   :  { %v6690_v36 = vpop.permute.xlu1 %1976 }
 0x44b   :  { %v1799_v43 = vpop.f32.mrf.mxu0 }
 0x44c   :  { %v1800_v20 = vadd.f32 %v1799_v43, %v1711_v50  ;;  %v1847_v43 = vpack.c.bf16 %v1824_v57, %v1823_v60  ;;  %v4817_v50 = vld [vmem:[%s7582_s7 + $0x24] sm:$0xf] }
 0x44e   :  { %v1836_v28 = vmax.f32 %v1800_v20, 0.0  ;;  %v4371_v20 = vld [vmem:[%s7582_s7 + $0xb0] sm:$0xf] }
 0x450   :  { %v1853_v40 = vpack.c.bf16 %v1836_v28, %v1835_v17  ;;  %v4379_v28 = vld [vmem:[%s7582_s7 + $0xc0] sm:$0xf]  ;;  %v4317_v17 = vld [vmem:[%s7582_s7 + $0x48] sm:$0xf0] }
 0x451   :  { %2307 = vmatmul.bf16.gmra.mxu1 %v4324_v26  ;;  %v4288_v26 = vor.u32 %v4813_v11, %v4285_v62  ;;  %v6699_v53 = vpop.permute.xlu1 %2061  ;;  %v4827_v11 = vld [vmem:[%s7582_s7 + $0x74] sm:$0xf]  ;;  %v4341_v62 = vld [vmem:[%s7582_s7 + $0x78] sm:$0xf0] }
 0x453   :  { %v1802_v52 = vpop.f32.mrf.mxu0 }
 0x454   :  { %v1803_v35 = vadd.f32 %v1802_v52, %v1714_v42  ;;  %v4832_v52 = vld [vmem:[%s7582_s7 + $0x94] sm:$0xf0]  ;;  %v4293_v42 = vld [vmem:[%s7582_s7 + $0x18] sm:$0xf0] }
 0x456   :  { %v1837_v55 = vmax.f32 %v1803_v35, 0.0  ;;  %v4296_v35 = vor.u32 %v4815_v33, %v4293_v42 }
 0x459   :  { %v6720_v61 = vpop.permute.xlu1 %1956 }
 0x45b   :  { %v1804_v31 = vpop.f32.mrf.mxu0 }
 0x45c   :  { %v1805_v4 = vadd.f32 %v1804_v31, %v1716_v7  ;;  %v4356_v7 = vor.u32 %v4832_v52, %v4355_v48  ;;  %v4301_v31 = vld [vmem:[%s7582_s7 + $0x28] sm:$0xf0] }
 0x45d   :  { %v4304_v6 = vor.u32 %v4817_v50, %v4301_v31 }
 0x45e   :  { %v1838_v27 = vmax.f32 %v1805_v4, 0.0  ;;  %v4364_v4 = vor.u32 %v4834_v18, %v4363_v41  ;;  %v4349_v41 = vld [vmem:[%s7582_s7 + $0x88] sm:$0xf0] }
 0x460   :  { %v1854_v22 = vpack.c.bf16 %v1838_v27, %v1837_v55  ;;  %v4819_v27 = vld [vmem:[%s7582_s7 + $0x34] sm:$0xf] }
 0x461   :  { %2312 = vmatmul.bf16.gmra.mxu1 %v4332_v59  ;;  %v4836_v59 = vld [vmem:[%s7582_s7 + $0xb4] sm:$0xf0] }
 0x462   :  { %v2272_v46 = vsel %vm421_vm1, %v1854_v22, 0  ;;  %v4372_v63 = vor.u32 %v4836_v59, %v4371_v20  ;;  %v4312_v22 = vor.u32 %v4819_v27, %v4309_v51 }
 0x463   :  { %2363 = vmatpush.bf16.msrb.mxu2 %v2272_v46  ;;  %v4838_v46 = vld [vmem:[%s7582_s7 + $0xc4] sm:$0xf0] }
 0x464   :  { %v4380_v56 = vor.u32 %v4838_v46, %v4379_v28 }
 0x467   :  { %2364 = vmatpush.bf16.msrb.mxu2 %v1853_v40  ;;  %v4320_v40 = vor.u32 %v4821_v39, %v4317_v17 }
 0x46b   :  { %2365 = vmatpush.bf16.msrb.mxu2 %v1852_v13  ;;  %v4387_v13 = vld [vmem:[%s7582_s7 + $0xd0] sm:$0xf] }
 0x46c   :  { %v4388_v3 = vor.u32 %v4840_v30, %v4387_v13 }
 0x46f   :  { %2366 = vmatpush.bf16.msrb.mxu2 %v1851_v2  ;;  %v6692_v2 = vpop.permute.xlu0 %1966 }
 0x471   :  { %2317 = vmatmul.bf16.gmra.mxu1 %v4340_v45 }
 0x473   :  { %2367 = vmatpush.bf16.msrb.mxu2 %v1850_v5 }
 0x477   :  { %2368 = vmatpush.bf16.msrb.mxu2 %v1849_v38  ;;  %v6707_v5 = vpop.permute.xlu0 %1951  ;;  %v6717_v38 = vpop.permute.xlu2 %2076 }
 0x47b   :  { %2369 = vmatpush.bf16.msrb.mxu2 %v1848_v0 }
 0x47e   :  { %v6640_v55 = vpop.f32.mrf.mxu1 }
 0x47f   :  { %2370 = vmatpush.bf16.msrb.mxu2 %v1847_v43  ;;  %v6722_v57 = vpop.permute.xlu0 %2056  ;;  %v6732_v60 = vpop.permute.xlu2 %1961 }
 0x480   :  { %v1942_v43 = vpop.permute.xlu1 %1941 }
 0x481   :  { %2322 = vmatmul.bf16.gmra.mxu1 %v4348_v12  ;;  %v4404_v12 = vor.u32 %v4844_v16, %v4403_v54 }
 0x482   :  { %4409 = vmatmul.msk.bf16.vlgmr.msrb.gmra.mxu2 %vm932_vm3, %v4288_v26  ;;  %v4344_v26 = vor.u32 %v4827_v11, %v4341_v62 }
 0x486   :  { %v6651_v44 = vpop.f32.mrf.mxu1 }
 0x487   :  { %v6740_v48 = vpop.permute.xlu0 %2041  ;;  %v6745_v33 = vpop.permute.xlu2 %2066 }
 0x488   :  { %v6747_v42 = vpop.permute.xlu1 %2046 }
 0x48e   :  { %v6669_v49 = vpop.f32.mrf.mxu1 }
 0x48f   :  { %v6755_v50 = vpop.permute.xlu2 %2051 }
 0x490   :  { %v6757_v31 = vpop.permute.xlu1 %2031 }
 0x491   :  { %2327 = vmatmul.bf16.gmra.mxu1 %v4356_v7  ;;  %v1937_v7 = vpop.permute.xlu0 %1936 }
 0x492   :  { %4410 = vmatmul.msk.bf16.gmra.mxu2 %vm932_vm3, %v4296_v35  ;;  %v4829_v35 = vld [vmem:[%s7582_s7 + $0x84] sm:$0xf] }
 0x493   :  { %v4352_v18 = vor.u32 %v4829_v35, %v4349_v41 }
 0x496   :  { %v6676_v21 = vpop.f32.mrf.mxu1 }
 0x497   :  { %v1947_v27 = vpop.permute.xlu2 %1946  ;;  %v2291_v29 = vadd.f32 %v6676_v21, %v1937_v7  ;;  %v4835_v21 = vld [vmem:[%s7582_s7 + $0xb4] sm:$0xf] }
 0x498   :  { %v1927_v51 = vpop.permute.xlu1 %1926 }
 0x499   :  { %v2286_v28 = vadd.f32 %v6651_v44, %v1927_v51  ;;  %v4365_v44 = vld [vmem:[%s7582_s7 + $0xa8] sm:$0xf0] }
 0x49e   :  { %v6695_v45 = vpop.f32.mrf.mxu1 }
 0x49f   :  { %v1932_v13 = vpop.permute.xlu2 %1931  ;;  %v2294_v16 = vadd.f32 %v6695_v45, %v1942_v43 }
 0x4a0   :  { %v2289_v19 = vadd.f32 %v6669_v49, %v1932_v13 }
 0x4a1   :  { %2332 = vmatmul.bf16.gmra.mxu1 %v4364_v4  ;;  %v1922_v4 = vpop.permute.xlu0 %1921 }
 0x4a2   :  { %4411 = vmatmul.msk.bf16.gmra.mxu2 %vm932_vm3, %v4304_v6  ;;  %v2284_v6 = vadd.f32 %v6640_v55, %v1922_v4 }
 0x4a6   :  { %v6715_v14 = vpop.f32.mrf.mxu1 }
 0x4a7   :  { %v2296_v7 = vadd.f32 %v6715_v14, %v1947_v27  ;;  %v4837_v14 = vld [vmem:[%s7582_s7 + $0xc4] sm:$0xf]  ;;  %v4381_v27 = vld [vmem:[%s7582_s7 + $0xc8] sm:$0xf0] }
 0x4ae   :  { %v6724_v0 = vpop.f32.mrf.mxu1 }
 0x4b1   :  { %2337 = vmatmul.bf16.gmra.mxu1 %v4372_v63  ;;  %v4831_v63 = vld [vmem:[%s7582_s7 + $0x94] sm:$0xf] }
 0x4b2   :  { %4412 = vmatmul.msk.bf16.gmra.mxu2 %vm932_vm3, %v4312_v22  ;;  %v4357_v22 = vld [vmem:[%s7582_s7 + $0x98] sm:$0xf0] }
 0x4b3   :  { %v4360_v17 = vor.u32 %v4831_v63, %v4357_v22 }
 0x4b6   :  { %v6742_v52 = vpop.f32.mrf.mxu1 }
 0x4b7   :  { %v2301_v22 = vadd.f32 %v6742_v52, %v6720_v61  ;;  %v4389_v61 = vld [vmem:[%s7582_s7 + $0xd8] sm:$0xf0] }
 0x4be   :  { %v2303_v30 = vpop.f32.mrf.mxu1 }
 0x4c1   :  { %2342 = vmatmul.bf16.gmra.mxu1 %v4380_v56 }
 0x4c2   :  { %4413 = vmatmul.msk.bf16.gmra.mxu2 %vm932_vm3, %v4320_v40 }
 0x4c6   :  { %v6779_v34 = vpop.f32.mrf.mxu1 }
 0x4d1   :  { %2347 = vmatmul.bf16.gmra.mxu1 %v4388_v3 }
 0x4d2   :  { %4414 = vmatmul.msk.bf16.gmra.mxu2 %vm932_vm3, %v4328_v24  ;;  %v4833_v24 = vld [vmem:[%s7582_s7 + $0xa4] sm:$0xf] }
 0x4e1   :  { %2352 = vmatmul.bf16.gmra.mxu1 %v4396_v10  ;;  %v4368_v10 = vor.u32 %v4833_v24, %v4365_v44 }
 0x4e2   :  { %4415 = vmatmul.msk.bf16.gmra.mxu2 %vm932_vm3, %v4336_v23 }
 0x4f1   :  { %2357 = vmatmul.bf16.gmra.mxu1 %v4404_v12  ;;  %v6785_v12 = vpop.f32.mrf.mxu1 }
 0x4f2   :  { %4416 = vmatmul.msk.bf16.gmra.mxu2 %vm932_vm3, %v4344_v26  ;;  %v4373_v26 = vld [vmem:[%s7582_s7 + $0xb8] sm:$0xf0] }
 0x4f9   :  { %v2310_v45 = vpop.f32.mrf.mxu1 }
 0x501   :  { %v2313_v63 = vpop.f32.mrf.mxu1 }
 0x502   :  { %4417 = vmatmul.msk.bf16.gmra.mxu2 %vm932_vm3, %v4352_v18  ;;  %v4376_v18 = vor.u32 %v4835_v21, %v4373_v26 }
 0x505   :  { %v2372_v20 = vpop.f32.mrf.mxu2 }
 0x506   :  { %v2373_v59 = vadd.f32 %v2372_v20, %v2284_v6  ;;  %v2299_v20 = vadd.f32 %v6724_v0, %v6707_v5  ;;  %v2304_v0 = vadd.f32 %v2303_v30, %v6732_v60  ;;  %v4841_v60 = vld [vmem:[%s7582_s7 + $0xe4] sm:$0xf]  ;;  %v4397_v30 = vld [vmem:[%s7582_s7 + $0xe8] sm:$0xf0] }
 0x508   :  { %v2452_v56 = vmax.f32 %v2373_v59, 0.0 }
 0x50d   :  { %v2374_v46 = vpop.f32.mrf.mxu2 }
 0x50e   :  { %v2375_v39 = vadd.f32 %v2374_v46, %v2286_v28 }
 0x510   :  { %v2453_v40 = vmax.f32 %v2375_v39, 0.0  ;;  %v4384_v39 = vor.u32 %v4837_v14, %v4381_v27  ;;  %v2311_v27 = vadd.f32 %v2310_v45, %v6690_v36 }
 0x512   :  { %4418 = vmatmul.msk.bf16.gmra.mxu2 %vm932_vm3, %v4360_v17  ;;  %v6769_v55 = vpack.c.bf16 %v2453_v40, %v2452_v56  ;;  %v2315_v40 = vpop.f32.mrf.mxu1 }
 0x515   :  { %v2377_v58 = vpop.f32.mrf.mxu2 }
 0x516   :  { %v2378_v3 = vadd.f32 %v2377_v58, %v2289_v19  ;;  %v4839_v58 = vld [vmem:[%s7582_s7 + $0xd4] sm:$0xf] }
 0x518   :  { %v2454_v23 = vmax.f32 %v2378_v3, 0.0  ;;  %v4392_v3 = vor.u32 %v4839_v58, %v4389_v61 }
 0x51a   :  { %v2318_v24 = vpop.f32.mrf.mxu1 }
 0x51d   :  { %v2379_v9 = vpop.f32.mrf.mxu2 }
 0x51e   :  { %v2380_v15 = vadd.f32 %v2379_v9, %v2291_v29 }
 0x520   :  { %v2455_v54 = vmax.f32 %v2380_v15, 0.0  ;;  %v4400_v15 = vor.u32 %v4841_v60, %v4397_v30 }
 0x522   :  { %4419 = vmatmul.msk.bf16.gmra.mxu2 %vm932_vm3, %v4368_v10  ;;  %v6782_v49 = vpack.c.bf16 %v2455_v54, %v2454_v23  ;;  %v2320_v29 = vpop.f32.mrf.mxu1  ;;  %v4843_v54 = vld [vmem:[%s7582_s7 + $0xf4] sm:$0xf] }
 0x525   :  { %v2382_v11 = vpop.f32.mrf.mxu2 }
 0x526   :  { %v2383_v62 = vadd.f32 %v2382_v11, %v2294_v16  ;;  %v4405_v16 = vld [vmem:[%s7582_s7 + $0xf8] sm:$0x10]  ;;  %s4969_s7 = smov 8  }
 0x527   :  { %v4408_v21 = vor.u32 %v4843_v54, %v4405_v16 }
 0x528   :  { %v2456_v4 = vmax.f32 %v2383_v62, 0.0 }
 0x52a   :  { %v2323_v10 = vpop.f32.mrf.mxu1 }
 0x52d   :  { %v2384_v35 = vpop.f32.mrf.mxu2 }
 0x52e   :  { %v2385_v41 = vadd.f32 %v2384_v35, %v2296_v7  ;;  %v6834_v35 = vpop.permute.xlu0 %2026 }
 0x530   :  { %v2457_v6 = vmax.f32 %v2385_v41, 0.0  ;;  %v2319_v41 = vadd.f32 %v2318_v24, %v6649_v1  ;;  %v2309_v1 = vadd.f32 %v6785_v12, %v6674_v37 }
 0x532   :  { %4420 = vmatmul.msk.bf16.gmra.mxu2 %vm932_vm3, %v4376_v18  ;;  %v6795_v43 = vpack.c.bf16 %v2457_v6, %v2456_v4  ;;  %v6831_v11 = vpop.f32.mrf.mxu1  ;;  %v2316_v18 = vadd.f32 %v2315_v40, %v6667_v8  ;;  %v2321_v4 = vadd.f32 %v2320_v29, %v6659_v47 }
 0x535   :  { %v2387_v59 = vpop.f32.mrf.mxu2 }
 0x536   :  { %v2388_v51 = vadd.f32 %v2387_v59, %v2299_v20  ;;  %v2314_v59 = vadd.f32 %v2313_v63, %v6697_v32  ;;  %v2002_v47 = vpop.permute.xlu0 %2001 }
 0x537   :  { %v2324_v32 = vadd.f32 %v2323_v10, %v2002_v47  ;;  %v4846_v10 = vld [vmem:[%s7584_s9 + $0x4] sm:$0xf0] }
 0x538   :  { %v2458_v17 = vmax.f32 %v2388_v51, 0.0 }
 0x53a   :  { %v2328_v7 = vpop.f32.mrf.mxu1 }
 0x53d   :  { %v2389_v28 = vpop.f32.mrf.mxu2 }
 0x53e   :  { %v2390_v46 = vadd.f32 %v2389_v28, %v2301_v22 }
 0x540   :  { %v2459_v56 = vmax.f32 %v2390_v46, 0.0 }
 0x542   :  { %4421 = vmatmul.msk.bf16.gmra.mxu2 %vm932_vm3, %v4384_v39  ;;  %v6808_v5 = vpack.c.bf16 %v2459_v56, %v2458_v17  ;;  %v6841_v39 = vpop.f32.mrf.mxu1 }
 0x545   :  { %v2392_v13 = vpop.f32.mrf.mxu2 }
 0x546   :  { %v2393_v19 = vadd.f32 %v2392_v13, %v2304_v0  ;;  %v2306_v0 = vadd.f32 %v6779_v34, %v6692_v2  ;;  %v2012_v34 = vpop.permute.xlu1 %2011 }
 0x548   :  { %v2460_v29 = vmax.f32 %v2393_v19, 0.0  ;;  %v4427_v19 = vld [vmem:[%s7584_s9] sm:$0xf] }
 0x549   :  { %v4428_v54 = vor.u32 %v4846_v10, %v4427_v19  ;;  %v4475_v10 = vld [vmem:[%s7584_s9 + $0x60] sm:$0xf] }
 0x54a   :  { %v2333_v24 = vpop.f32.mrf.mxu1 }
 0x54d   :  { %v2394_v52 = vpop.f32.mrf.mxu2 }
 0x54e   :  { %v2395_v45 = vadd.f32 %v2394_v52, %v2306_v0 }
 0x550   :  { %v2461_v37 = vmax.f32 %v2395_v45, 0.0 }
 0x552   :  { %4422 = vmatmul.msk.bf16.gmra.mxu2 %vm932_vm3, %v4392_v3  ;;  %v2488_v2 = vpack.c.bf16 %v2461_v37, %v2460_v29  ;;  %v6852_v52 = vpop.f32.mrf.mxu1  ;;  %v4856_v37 = vld [vmem:[%s7584_s9 + $0x54] sm:$0xf0] }
 0x555   :  { %v2397_v44 = vpop.f32.mrf.mxu2 }
 0x556   :  { %v2398_v63 = vadd.f32 %v2397_v44, %v2309_v1  ;;  %v2329_v44 = vadd.f32 %v2328_v7, %v2012_v34  ;;  %v4848_v7 = vld [vmem:[%s7584_s9 + $0x14] sm:$0xf0] }
 0x558   :  { %v2462_v3 = vmax.f32 %v2398_v63, 0.0 }
 0x55d   :  { %v2399_v9 = vpop.f32.mrf.mxu2 }
 0x55e   :  { %v2400_v17 = vadd.f32 %v2399_v9, %v2311_v27 }
 0x560   :  { %v2463_v13 = vmax.f32 %v2400_v17, 0.0  ;;  %v4451_v17 = vld [vmem:[%s7584_s9 + $0x30] sm:$0xf] }
 0x562   :  { %4423 = vmatmul.msk.bf16.gmra.mxu2 %vm932_vm3, %v4400_v15  ;;  %v2489_v12 = vpack.c.bf16 %v2463_v13, %v2462_v3  ;;  %v6857_v15 = vpop.permute.xlu2 %2036  ;;  %v4467_v3 = vld [vmem:[%s7584_s9 + $0x50] sm:$0xf] }
 0x563   :  { %v4468_v29 = vor.u32 %v4856_v37, %v4467_v3 }
 0x565   :  { %v2402_v23 = vpop.f32.mrf.mxu2 }
 0x566   :  { %v2403_v22 = vadd.f32 %v2402_v23, %v2314_v59  ;;  %v2338_v23 = vpop.f32.mrf.mxu1  ;;  %v4443_v59 = vld [vmem:[%s7584_s9 + $0x20] sm:$0xf] }
 0x568   :  { %v2464_v40 = vmax.f32 %v2403_v22, 0.0 }
 0x56a   :  { %v2022_v16 = vpop.permute.xlu2 %2021 }
 0x56d   :  { %v2404_v62 = vpop.f32.mrf.mxu2 }
 0x56e   :  { %v2405_v51 = vadd.f32 %v2404_v62, %v2316_v18 }
 0x570   :  { %v2465_v8 = vmax.f32 %v2405_v51, 0.0  ;;  %v4850_v51 = vld [vmem:[%s7584_s9 + $0x24] sm:$0xf0] }
 0x571   :  { %v4444_v22 = vor.u32 %v4850_v51, %v4443_v59 }
 0x572   :  { %4424 = vmatmul.msk.bf16.gmra.mxu2 %vm932_vm3, %v4408_v21  ;;  %v2490_v61 = vpack.c.bf16 %v2465_v8, %v2464_v40  ;;  %v4852_v8 = vld [vmem:[%s7584_s9 + $0x34] sm:$0xf0]  ;;  %v4854_v40 = vld [vmem:[%s7584_s9 + $0x44] sm:$0xf0] }
 0x573   :  { %v4452_v47 = vor.u32 %v4852_v8, %v4451_v17 }
 0x575   :  { %v2407_v26 = vpop.f32.mrf.mxu2 }
 0x576   :  { %v2408_v6 = vadd.f32 %v2407_v26, %v2319_v41  ;;  %v4435_v26 = vld [vmem:[%s7584_s9 + $0x10] sm:$0xf] }
 0x577   :  { %v4436_v18 = vor.u32 %v4848_v7, %v4435_v26 }
 0x578   :  { %v2466_v28 = vmax.f32 %v2408_v6, 0.0 }
 0x57d   :  { %v2409_v20 = vpop.f32.mrf.mxu2 }
 0x57e   :  { %v2410_v14 = vadd.f32 %v2409_v20, %v2321_v4  ;;  %v2339_v4 = vadd.f32 %v2338_v23, %v6757_v31  ;;  %v4858_v23 = vld [vmem:[%s7584_s9 + $0x64] sm:$0xf0] }
 0x57f   :  { %v4476_v7 = vor.u32 %v4858_v23, %v4475_v10 }
 0x580   :  { %v2467_v46 = vmax.f32 %v2410_v14, 0.0 }
 0x582   :  { %v2491_v56 = vpack.c.bf16 %v2467_v46, %v2466_v28 }
 0x584   :  { %2919 = vmatpush.bf16.msra.mxu3 %v2491_v56 }
 0x585   :  { %v2412_v36 = vpop.f32.mrf.mxu2 }
 0x586   :  { %v6847_v58 = vadd.f32 %v2412_v36, %v2324_v32 }
 0x588   :  { %2920 = vmatpush.bf16.msra.mxu3 %v2490_v61 }
 0x58c   :  { %2921 = vmatpush.bf16.msra.mxu3 %v2489_v12 }
 0x58d   :  { %v6849_v60 = vpop.f32.mrf.mxu2 }
 0x590   :  { %2922 = vmatpush.bf16.msra.mxu3 %v2488_v2 }
 0x594   :  { %2923 = vmatpush.bf16.msra.mxu3 %v6808_v5 }
 0x595   :  { %v2417_v30 = vpop.f32.mrf.mxu2 }
 0x596   :  { %v6854_v9 = vadd.f32 %v2417_v30, %v2329_v44 }
 0x598   :  { %2924 = vmatpush.bf16.msra.mxu3 %v6795_v43  ;;  %v2334_v43 = vadd.f32 %v2333_v24, %v2022_v16 }
 0x59c   :  { %2925 = vmatpush.bf16.msra.mxu3 %v6782_v49  ;;  %v6871_v49 = vpop.f32.mrf.mxu1 }
 0x59d   :  { %v6866_v5 = vpop.f32.mrf.mxu2 }
 0x5a0   :  { %2926 = vmatpush.bf16.msra.mxu3 %v6769_v55 }
 0x5a3   :  { %2927 = vmatmul.bf16.vlgmr.msra.gmra.mxu3 %v4428_v54 }
 0x5a4   :  { %v2343_v55 = vpop.f32.mrf.mxu1 }
 0x5a5   :  { %v2422_v62 = vpop.f32.mrf.mxu2  ;;  %v2344_v28 = vadd.f32 %v2343_v55, %v6740_v48  ;;  %v4459_v48 = vld [vmem:[%s7584_s9 + $0x40] sm:$0xf] }
 0x5a6   :  { %v6869_v21 = vadd.f32 %v2422_v62, %v2334_v43  ;;  %v4460_v45 = vor.u32 %v4854_v40, %v4459_v48  ;;  %v2017_v48 = vpop.permute.xlu2 %2016 }
 0x5a7   :  { %v2331_v40 = vadd.f32 %v6841_v39, %v2017_v48  ;;  %v2470_v39 = vmax.f32 %v6854_v9, 0.0  ;;  %v4429_v9 = vld [vmem:[%s7584_s9 + $0x8] sm:$0xf0]  ;;  %v4872_v48 = vld [vmem:[%s7584_s9 + $0xd4] sm:$0xf0] }
 0x5ac   :  { %v2345_v14 = vpop.f32.mrf.mxu1 }
 0x5ad   :  { %v6879_v41 = vpop.f32.mrf.mxu2 }
 0x5ae   :  { %v6971_v23 = vpop.permute.xlu2 %2716 }
 0x5b3   :  { %2932 = vmatmul.bf16.gmra.mxu3 %v4436_v18 }
 0x5b4   :  { %v2348_v31 = vpop.f32.mrf.mxu1 }
 0x5b5   :  { %v2427_v6 = vpop.f32.mrf.mxu2 }
 0x5b6   :  { %v6882_v20 = vadd.f32 %v2427_v6, %v2339_v4  ;;  %v2349_v6 = vadd.f32 %v2348_v31, %v6755_v50 }
 0x5bc   :  { %v2350_v0 = vpop.f32.mrf.mxu1 }
 0x5bd   :  { %v2429_v27 = vpop.f32.mrf.mxu2 }
 0x5c3   :  { %2937 = vmatmul.bf16.gmra.mxu3 %v4444_v22 }
 0x5c4   :  { %v2353_v63 = vpop.f32.mrf.mxu1 }
 0x5c5   :  { %v2432_v46 = vpop.f32.mrf.mxu2  ;;  %v2354_v62 = vadd.f32 %v2353_v63, %v6699_v53  ;;  %v4483_v63 = vld [vmem:[%s7584_s9 + $0x70] sm:$0xf] }
 0x5c6   :  { %v6891_v1 = vadd.f32 %v2432_v46, %v2344_v28 }
 0x5cc   :  { %v2355_v13 = vpop.f32.mrf.mxu1 }
 0x5cd   :  { %v2434_v56 = vpop.f32.mrf.mxu2  ;;  %v2356_v54 = vadd.f32 %v2355_v13, %v6745_v33  ;;  %v2346_v33 = vadd.f32 %v2345_v14, %v6747_v42  ;;  %v4860_v42 = vld [vmem:[%s7584_s9 + $0x74] sm:$0xf0]  ;;  %v2336_v14 = vadd.f32 %v6852_v52, %v6834_v35  ;;  %v2007_v35 = vpop.permute.xlu1 %2006 }
 0x5ce   :  { %v2326_v52 = vadd.f32 %v6831_v11, %v2007_v35  ;;  %v4862_v11 = vld [vmem:[%s7584_s9 + $0x84] sm:$0xf0] }
 0x5cf   :  { %v2435_v53 = vadd.f32 %v2434_v56, %v2346_v33  ;;  %v2476_v56 = vmax.f32 %v6891_v1, 0.0  ;;  %v2472_v1 = vmax.f32 %v6869_v21, 0.0  ;;  %v2468_v21 = vmax.f32 %v6847_v58, 0.0  ;;  %v4499_v58 = vld [vmem:[%s7584_s9 + $0x90] sm:$0xf] }
 0x5d1   :  { %v2477_v50 = vmax.f32 %v2435_v53, 0.0 }
 0x5d3   :  { %2942 = vmatmul.bf16.gmra.mxu3 %v4452_v47 }
 0x5d4   :  { %v2358_v24 = vpop.f32.mrf.mxu1 }
 0x5d5   :  { %v2437_v32 = vpop.f32.mrf.mxu2  ;;  %v2359_v44 = vadd.f32 %v2358_v24, %v6672_v25 }
 0x5d6   :  { %v2438_v28 = vadd.f32 %v2437_v32, %v2349_v6  ;;  %v4484_v32 = vor.u32 %v4860_v42, %v4483_v63 }
 0x5d8   :  { %v2478_v47 = vmax.f32 %v2438_v28, 0.0 }
 0x5dc   :  { %v2360_v34 = vpop.f32.mrf.mxu1 }
 0x5dd   :  { %v2439_v36 = vpop.f32.mrf.mxu2  ;;  %v2361_v30 = vadd.f32 %v2360_v34, %v6717_v38  ;;  %v2351_v38 = vadd.f32 %v2350_v0, %v6722_v57  ;;  %v2341_v57 = vadd.f32 %v6871_v49, %v6857_v15  ;;  %v2425_v15 = vadd.f32 %v6879_v41, %v2336_v14  ;;  %v4864_v34 = vld [vmem:[%s7584_s9 + $0x94] sm:$0xf0] }
 0x5de   :  { %v2415_v41 = vadd.f32 %v6849_v60, %v2326_v52  ;;  %v4845_v60 = vld [vmem:[%s7584_s9 + $0x4] sm:$0xf] }
 0x5df   :  { %v2440_v59 = vadd.f32 %v2439_v36, %v2351_v38  ;;  %v2430_v0 = vadd.f32 %v2429_v27, %v2341_v57  ;;  %v2496_v27 = vpack.c.bf16 %v2477_v50, %v2476_v56  ;;  %v2474_v36 = vmax.f32 %v6882_v20, 0.0  ;;  %v4515_v38 = vld [vmem:[%s7584_s9 + $0xb0] sm:$0xf]  ;;  %v4870_v57 = vld [vmem:[%s7584_s9 + $0xc4] sm:$0xf0]  ;;  %v7027_v50 = vpop.permute.xlu1 %2636 }
 0x5e0   :  { %v2473_v13 = vmax.f32 %v2425_v15, 0.0  ;;  %v2469_v20 = vmax.f32 %v2415_v41, 0.0 }
 0x5e1   :  { %v2479_v17 = vmax.f32 %v2440_v59, 0.0  ;;  %v2475_v49 = vmax.f32 %v2430_v0, 0.0  ;;  %v4851_v59 = vld [vmem:[%s7584_s9 + $0x34] sm:$0xf]  ;;  %v4461_v0 = vld [vmem:[%s7584_s9 + $0x48] sm:$0xf0] }
 0x5e2   :  { %v2494_v37 = vpack.c.bf16 %v2473_v13, %v2472_v1  ;;  %v2492_v24 = vpack.c.bf16 %v2469_v20, %v2468_v21  ;;  %v4857_v20 = vld [vmem:[%s7584_s9 + $0x64] sm:$0xf] }
 0x5e3   :  { %2947 = vmatmul.bf16.gmra.mxu3 %v4460_v45  ;;  %v2497_v31 = vpack.c.bf16 %v2479_v17, %v2478_v47  ;;  %v2420_v45 = vadd.f32 %v6866_v5, %v2331_v40  ;;  %v4491_v5 = vld [vmem:[%s7584_s9 + $0x80] sm:$0xf]  ;;  %v4853_v47 = vld [vmem:[%s7584_s9 + $0x44] sm:$0xf] }
 0x5e4   :  { %v4464_v63 = vor.u32 %v4853_v47, %v4461_v0 }
 0x5e5   :  { %v2442_v61 = vpop.f32.mrf.mxu2  ;;  %v2471_v3 = vmax.f32 %v2420_v45, 0.0  ;;  %v4469_v45 = vld [vmem:[%s7584_s9 + $0x58] sm:$0xf0] }
 0x5e6   :  { %v2443_v55 = vadd.f32 %v2442_v61, %v2354_v62  ;;  %v2495_v61 = vpack.c.bf16 %v2475_v49, %v2474_v36  ;;  %v4445_v62 = vld [vmem:[%s7584_s9 + $0x28] sm:$0xf0]  ;;  %v4855_v36 = vld [vmem:[%s7584_s9 + $0x54] sm:$0xf] }
 0x5e7   :  { %v7036_v15 = vpop.permute.xlu1 %2711 }
 0x5e8   :  { %v2480_v46 = vmax.f32 %v2443_v55, 0.0  ;;  %v4868_v55 = vld [vmem:[%s7584_s9 + $0xb4] sm:$0xf0] }
 0x5e9   :  { %v4516_v33 = vor.u32 %v4868_v55, %v4515_v38  ;;  %v4861_v55 = vld [vmem:[%s7584_s9 + $0x84] sm:$0xf] }
 0x5ed   :  { %v2444_v12 = vpop.f32.mrf.mxu2 }
 0x5ee   :  { %v2445_v26 = vadd.f32 %v2444_v12, %v2356_v54  ;;  %v2493_v12 = vpack.c.bf16 %v2471_v3, %v2470_v39  ;;  %v4507_v54 = vld [vmem:[%s7584_s9 + $0xa0] sm:$0xf] }
 0x5ef   :  { %v7056_v35 = vpop.permute.xlu1 %2696  ;;  %v4539_v3 = vld [vmem:[%s7584_s9 + $0xe0] sm:$0xf] }
 0x5f0   :  { %v2481_v51 = vmax.f32 %v2445_v26, 0.0 }
 0x5f2   :  { %v2498_v8 = vpack.c.bf16 %v2481_v51, %v2480_v46  ;;  %v4453_v51 = vld [vmem:[%s7584_s9 + $0x38] sm:$0xf0] }
 0x5f3   :  { %2952 = vmatmul.bf16.gmra.mxu3 %v4468_v29  ;;  %v4492_v29 = vor.u32 %v4862_v11, %v4491_v5  ;;  %v4456_v28 = vor.u32 %v4851_v59, %v4453_v51  ;;  %v4493_v59 = vld [vmem:[%s7584_s9 + $0x88] sm:$0xf0] }
 0x5f5   :  { %v2447_v2 = vpop.f32.mrf.mxu2 }
 0x5f6   :  { %v2448_v19 = vadd.f32 %v2447_v2, %v2359_v44  ;;  %v4432_v2 = vor.u32 %v4845_v60, %v4429_v9  ;;  %v4847_v44 = vld [vmem:[%s7584_s9 + $0x14] sm:$0xf] }
 0x5f7   :  { %v7071_v39 = vpop.permute.xlu1 %2621 }
 0x5f8   :  { %v2482_v25 = vmax.f32 %v2448_v19, 0.0  ;;  %v4500_v19 = vor.u32 %v4864_v34, %v4499_v58  ;;  %v4547_v34 = vld [vmem:[%s7584_s9 + $0xf0] sm:$0xf] }
 0x5fd   :  { %v2449_v16 = vpop.f32.mrf.mxu2 }
 0x5fe   :  { %v2450_v43 = vadd.f32 %v2449_v16, %v2361_v30  ;;  %v4437_v30 = vld [vmem:[%s7584_s9 + $0x18] sm:$0xf0]  ;;  %v4866_v16 = vld [vmem:[%s7584_s9 + $0xa4] sm:$0xf0] }
 0x5ff   :  { %v4440_v10 = vor.u32 %v4847_v44, %v4437_v30  ;;  %v4508_v26 = vor.u32 %v4866_v16, %v4507_v54  ;;  %v4876_v44 = vld [vmem:[%s7584_s9 + $0xf4] sm:$0x10]  ;;  %v4859_v30 = vld [vmem:[%s7584_s9 + $0x74] sm:$0xf] }
 0x600   :  { %v2483_v18 = vmax.f32 %v2450_v43, 0.0  ;;  %v4849_v43 = vld [vmem:[%s7584_s9 + $0x24] sm:$0xf] }
 0x602   :  { %v2499_v4 = vpack.c.bf16 %v2483_v18, %v2482_v25  ;;  %v6985_v25 = vpop.permute.xlu0 %2721  ;;  %v6988_v18 = vpop.permute.xlu2 %2641 }
 0x603   :  { %2957 = vmatmul.bf16.gmra.mxu3 %v4476_v7  ;;  %v4448_v7 = vor.u32 %v4849_v43, %v4445_v62 }
 0x604   :  { %v2917_v22 = vsel %vm421_vm1, %v2499_v4, 0 }
 0x605   :  { %3008 = vmatpush.bf16.msra.mxu0 %v2917_v22 }
 0x609   :  { %3009 = vmatpush.bf16.msra.mxu0 %v2498_v8  ;;  %v4523_v8 = vld [vmem:[%s7584_s9 + $0xc0] sm:$0xf] }
 0x60a   :  { %v6996_v4 = vpop.permute.xlu0 %2706  ;;  %v7006_v22 = vpop.permute.xlu2 %2626 }
 0x60d   :  { %3010 = vmatpush.bf16.msra.mxu0 %v2497_v31  ;;  %v4524_v31 = vor.u32 %v4870_v57, %v4523_v8 }
 0x611   :  { %3011 = vmatpush.bf16.msra.mxu0 %v2496_v27 }
 0x612   :  { %v7009_v46 = vpop.permute.xlu0 %2631  ;;  %v7013_v17 = vpop.permute.xlu2 %2701 }
 0x613   :  { %2962 = vmatmul.bf16.gmra.mxu3 %v4484_v32  ;;  %v4531_v32 = vld [vmem:[%s7584_s9 + $0xd0] sm:$0xf] }
 0x614   :  { %v4532_v13 = vor.u32 %v4872_v48, %v4531_v32 }
 0x615   :  { %3012 = vmatpush.bf16.msra.mxu0 %v2495_v61  ;;  %v4472_v61 = vor.u32 %v4855_v36, %v4469_v45  ;;  %v4863_v45 = vld [vmem:[%s7584_s9 + $0x94] sm:$0xf] }
 0x619   :  { %3013 = vmatpush.bf16.msra.mxu0 %v2494_v37  ;;  %v4874_v37 = vld [vmem:[%s7584_s9 + $0xe4] sm:$0xf0] }
 0x61a   :  { %v7029_v42 = vpop.permute.xlu0 %2616  ;;  %v7033_v56 = vpop.permute.xlu2 %2686  ;;  %v4540_v21 = vor.u32 %v4874_v37, %v4539_v3 }
 0x61d   :  { %3014 = vmatpush.bf16.msra.mxu0 %v2493_v12  ;;  %v4477_v12 = vld [vmem:[%s7584_s9 + $0x68] sm:$0xf0] }
 0x61e   :  { %v4480_v60 = vor.u32 %v4857_v20, %v4477_v12 }
 0x621   :  { %3015 = vmatpush.bf16.msra.mxu0 %v2492_v24  ;;  %v7086_v24 = vpop.permute.xlu1 %2606 }
 0x622   :  { %v7038_v49 = vpop.permute.xlu0 %2691  ;;  %v7048_v40 = vpop.permute.xlu2 %2611 }
 0x623   :  { %2967 = vmatmul.bf16.gmra.mxu3 %v4492_v29 }
 0x624   :  { %4553 = vmatmul.msk.bf16.vlgmr.msra.gmra.mxu0 %vm932_vm3, %v4432_v2 }
 0x626   :  { %v6998_v6 = vpop.f32.mrf.mxu3 }
 0x629   :  { %v7104_v16 = vpop.permute.xlu1 %2681 }
 0x62a   :  { %v7059_v52 = vpop.permute.xlu0 %2676  ;;  %v7063_v41 = vpop.permute.xlu2 %2596 }
 0x62e   :  { %v7011_v53 = vpop.f32.mrf.mxu3 }
 0x632   :  { %v7079_v5 = vpop.permute.xlu0 %2601  ;;  %v7083_v9 = vpop.permute.xlu2 %2671 }
 0x633   :  { %2972 = vmatmul.bf16.gmra.mxu3 %v4500_v19  ;;  %v4485_v19 = vld [vmem:[%s7584_s9 + $0x78] sm:$0xf0] }
 0x634   :  { %4554 = vmatmul.msk.bf16.gmra.mxu0 %vm932_vm3, %v4440_v10  ;;  %v4548_v10 = vor.u32 %v4876_v44, %v4547_v34  ;;  %v4488_v54 = vor.u32 %v4859_v30, %v4485_v19 }
 0x636   :  { %v7031_v14 = vpop.f32.mrf.mxu3 }
 0x63a   :  { %v2587_v29 = vpop.permute.xlu0 %2586  ;;  %v7090_v58 = vpop.permute.xlu2 %2656 }
 0x63e   :  { %v7040_v27 = vpop.f32.mrf.mxu3 }
 0x642   :  { %v7106_v43 = vpop.permute.xlu0 %2661 }
 0x643   :  { %2977 = vmatmul.bf16.gmra.mxu3 %v4508_v26  ;;  %v2582_v26 = vpop.permute.xlu2 %2581 }
 0x644   :  { %4555 = vmatmul.msk.bf16.gmra.mxu0 %vm932_vm3, %v4448_v7  ;;  %v7109_v7 = vpop.permute.xlu1 %2666 }
 0x646   :  { %v7061_v1 = vpop.f32.mrf.mxu3 }
 0x64a   :  { %v7111_v38 = vpop.permute.xlu0 %2646 }
 0x64b   :  { %v2567_v51 = vpop.permute.xlu2 %2566 }
 0x64c   :  { %v2592_v47 = vpop.permute.xlu1 %2591 }
 0x64e   :  { %v7081_v11 = vpop.f32.mrf.mxu3 }
 0x652   :  { %v2572_v0 = vpop.permute.xlu0 %2571 }
 0x653   :  { %2982 = vmatmul.bf16.gmra.mxu3 %v4516_v33  ;;  %v2929_v33 = vadd.f32 %v6998_v6, %v2567_v51  ;;  %v4501_v6 = vld [vmem:[%s7584_s9 + $0x98] sm:$0xf0] }
 0x654   :  { %4556 = vmatmul.msk.bf16.gmra.mxu0 %vm932_vm3, %v4456_v28  ;;  %v4496_v28 = vor.u32 %v4861_v55, %v4493_v59  ;;  %v4504_v20 = vor.u32 %v4863_v45, %v4501_v6  ;;  %v2939_v55 = vadd.f32 %v7061_v1, %v2587_v29  ;;  %v4517_v1 = vld [vmem:[%s7584_s9 + $0xb8] sm:$0xf0] }
 0x656   :  { %v7088_v2 = vpop.f32.mrf.mxu3 }
 0x65e   :  { %v2945_v62 = vpop.f32.mrf.mxu3 }
 0x65f   :  { %v2946_v45 = vadd.f32 %v2945_v62, %v7079_v5 }
 0x663   :  { %2987 = vmatmul.bf16.gmra.mxu3 %v4524_v31  ;;  %v2931_v31 = vadd.f32 %v7011_v53, %v2572_v0 }
 0x664   :  { %4557 = vmatmul.msk.bf16.gmra.mxu0 %vm932_vm3, %v4464_v63 }
 0x666   :  { %v2948_v3 = vpop.f32.mrf.mxu3 }
 0x673   :  { %2992 = vmatmul.bf16.gmra.mxu3 %v4532_v13 }
 0x674   :  { %4558 = vmatmul.msk.bf16.gmra.mxu0 %vm932_vm3, %v4472_v61  ;;  %v2577_v61 = vpop.permute.xlu1 %2576 }
 0x675   :  { %v2934_v37 = vadd.f32 %v7031_v14, %v2577_v61  ;;  %v4509_v14 = vld [vmem:[%s7584_s9 + $0xa8] sm:$0xf0] }
 0x683   :  { %2997 = vmatmul.bf16.gmra.mxu3 %v4540_v21  ;;  %v2936_v21 = vadd.f32 %v7040_v27, %v2582_v26 }
 0x684   :  { %4559 = vmatmul.msk.bf16.gmra.mxu0 %vm932_vm3, %v4480_v60  ;;  %v7133_v60 = vpop.f32.mrf.mxu3 }
 0x68c   :  { %v7144_v51 = vpop.f32.mrf.mxu3 }
 0x693   :  { %3002 = vmatmul.bf16.gmra.mxu3 %v4548_v10  ;;  %v4865_v10 = vld [vmem:[%s7584_s9 + $0xa4] sm:$0xf] }
 0x694   :  { %4560 = vmatmul.msk.bf16.gmra.mxu0 %vm932_vm3, %v4488_v54  ;;  %v4512_v59 = vor.u32 %v4865_v10, %v4509_v14  ;;  %v4533_v10 = vld [vmem:[%s7584_s9 + $0xd8] sm:$0xf0] }
 0x6a1   :  { %v3017_v8 = vpop.f32.mrf.mxu0 }
 0x6a2   :  { %v3018_v57 = vadd.f32 %v3017_v8, %v2929_v33  ;;  %v2941_v33 = vadd.f32 %v7081_v11, %v2592_v47 }
 0x6a4   :  { %4561 = vmatmul.msk.bf16.gmra.mxu0 %vm932_vm3, %v4496_v28  ;;  %v3097_v48 = vmax.f32 %v3018_v57, 0.0 }
 0x6a9   :  { %v3019_v63 = vpop.f32.mrf.mxu0 }
 0x6aa   :  { %v3020_v32 = vadd.f32 %v3019_v63, %v2931_v31  ;;  %v2955_v31 = vpop.f32.mrf.mxu3  ;;  %v4867_v63 = vld [vmem:[%s7584_s9 + $0xb4] sm:$0xf] }
 0x6ac   :  { %v3098_v36 = vmax.f32 %v3020_v32, 0.0  ;;  %v2944_v32 = vadd.f32 %v7088_v2, %v7063_v41  ;;  %v4525_v41 = vld [vmem:[%s7584_s9 + $0xc8] sm:$0xf0] }
 0x6ae   :  { %v7128_v13 = vpack.c.bf16 %v3098_v36, %v3097_v48  ;;  %v4520_v48 = vor.u32 %v4867_v63, %v4517_v1  ;;  %v4549_v63 = vld [vmem:[%s7584_s9 + $0xf8] sm:$0x10] }
 0x6b1   :  { %v3022_v53 = vpop.f32.mrf.mxu0 }
 0x6b2   :  { %v3023_v12 = vadd.f32 %v3022_v53, %v2934_v37  ;;  %v2958_v36 = vpop.f32.mrf.mxu3  ;;  %v4869_v53 = vld [vmem:[%s7584_s9 + $0xc4] sm:$0xf] }
 0x6b4   :  { %4562 = vmatmul.msk.bf16.gmra.mxu0 %vm932_vm3, %v4504_v20  ;;  %v3099_v30 = vmax.f32 %v3023_v12, 0.0  ;;  %v2949_v12 = vadd.f32 %v2948_v3, %v7086_v24 }
 0x6b9   :  { %v3024_v34 = vpop.f32.mrf.mxu0 }
 0x6ba   :  { %v3025_v44 = vadd.f32 %v3024_v34, %v2936_v21  ;;  %v4528_v21 = vor.u32 %v4869_v53, %v4525_v41  ;;  %v2960_v34 = vpop.f32.mrf.mxu3  ;;  %v2956_v41 = vadd.f32 %v2955_v31, %v7071_v39 }
 0x6bc   :  { %v3100_v19 = vmax.f32 %v3025_v44, 0.0 }
 0x6be   :  { %v7141_v54 = vpack.c.bf16 %v3100_v19, %v3099_v30  ;;  %v4871_v19 = vld [vmem:[%s7584_s9 + $0xd4] sm:$0xf] }
 0x6bf   :  { %v4536_v14 = vor.u32 %v4871_v19, %v4533_v10  ;;  %v2954_v10 = vadd.f32 %v7144_v51, %v7029_v42  ;;  %v2652_v51 = vpop.permute.xlu1 %2651 }
 0x6c1   :  { %v3027_v27 = vpop.f32.mrf.mxu0 }
 0x6c2   :  { %v3028_v26 = vadd.f32 %v3027_v27, %v2939_v55  ;;  %v2963_v30 = vpop.f32.mrf.mxu3  ;;  %v4541_v27 = vld [vmem:[%s7584_s9 + $0xe8] sm:$0xf0] }
 0x6c4   :  { %4563 = vmatmul.msk.bf16.gmra.mxu0 %vm932_vm3, %v4512_v59  ;;  %v3101_v57 = vmax.f32 %v3028_v26, 0.0  ;;  %v4873_v59 = vld [vmem:[%s7584_s9 + $0xe4] sm:$0xf] }
 0x6c9   :  { %v3029_v28 = vpop.f32.mrf.mxu0 }
 0x6ca   :  { %v3030_v8 = vadd.f32 %v3029_v28, %v2941_v33  ;;  %v2965_v24 = vpop.f32.mrf.mxu3  ;;  %v4544_v33 = vor.u32 %v4873_v59, %v4541_v27 }
 0x6cc   :  { %v3102_v0 = vmax.f32 %v3030_v8, 0.0 }
 0x6ce   :  { %v7154_v29 = vpack.c.bf16 %v3102_v0, %v3101_v57  ;;  %v4875_v0 = vld [vmem:[%s7584_s9 + $0xf4] sm:$0xf] }
 0x6cf   :  { %v4552_v1 = vor.u32 %v4875_v0, %v4549_v63 }
 0x6d1   :  { %v3032_v11 = vpop.f32.mrf.mxu0 }
 0x6d2   :  { %v3033_v47 = vadd.f32 %v3032_v11, %v2944_v32  ;;  %v2968_v26 = vpop.f32.mrf.mxu3  ;;  %v2964_v11 = vadd.f32 %v2963_v30, %v7027_v50 }
 0x6d4   :  { %4564 = vmatmul.msk.bf16.gmra.mxu0 %vm932_vm3, %v4520_v48  ;;  %v3103_v37 = vmax.f32 %v3033_v47, 0.0  ;;  %v2961_v47 = vadd.f32 %v2960_v34, %v7009_v46  ;;  %v2969_v34 = vadd.f32 %v2968_v26, %v7111_v38 }
 0x6d9   :  { %v3034_v6 = vpop.f32.mrf.mxu0 }
 0x6da   :  { %v3035_v61 = vadd.f32 %v3034_v6, %v2946_v45  ;;  %v2970_v8 = vpop.f32.mrf.mxu3  ;;  %v2966_v45 = vadd.f32 %v2965_v24, %v6988_v18  ;;  %v2951_v18 = vadd.f32 %v7133_v60, %v7048_v40 }
 0x6dc   :  { %v3104_v20 = vmax.f32 %v3035_v61, 0.0 }
 0x6de   :  { %v7166_v2 = vpack.c.bf16 %v3104_v20, %v3103_v37  ;;  %v2959_v37 = vadd.f32 %v2958_v36, %v7006_v22 }
 0x6e1   :  { %v3037_v44 = vpop.f32.mrf.mxu0 }
 0x6e2   :  { %v7169_v5 = vadd.f32 %v3037_v44, %v2949_v12  ;;  %v2973_v48 = vpop.f32.mrf.mxu3 }
 0x6e3   :  { %v2974_v0 = vadd.f32 %v2973_v48, %v7090_v58 }
 0x6e4   :  { %4565 = vmatmul.msk.bf16.gmra.mxu0 %vm932_vm3, %v4528_v21 }
 0x6e9   :  { %v3039_v62 = vpop.f32.mrf.mxu0 }
 0x6ea   :  { %v2975_v19 = vpop.f32.mrf.mxu3  ;;  %v3040_v39 = vadd.f32 %v3039_v62, %v2951_v18  ;;  %v4587_v18 = vld [vmem:[%s7586_s11 + $0x20] sm:$0xf] }
 0x6f1   :  { %v3042_v55 = vpop.f32.mrf.mxu0 }
 0x6f2   :  { %v3043_v22 = vadd.f32 %v3042_v55, %v2954_v10 }
 0x6f4   :  { %4566 = vmatmul.msk.bf16.gmra.mxu0 %vm932_vm3, %v4536_v14  ;;  %v3107_v27 = vmax.f32 %v3043_v22, 0.0 }
 0x6f9   :  { %v3044_v3 = vpop.f32.mrf.mxu0 }
 0x6fa   :  { %v3045_v50 = vadd.f32 %v3044_v3, %v2956_v41  ;;  %v2978_v3 = vpop.f32.mrf.mxu3  ;;  %v4880_v41 = vld [vmem:[%s7586_s11 + $0x14] sm:$0xf0] }
 0x6fc   :  { %v3108_v31 = vmax.f32 %v3045_v50, 0.0 }
 0x6fe   :  { %v3134_v42 = vpack.c.bf16 %v3108_v31, %v3107_v27 }
 0x701   :  { %v3047_v28 = vpop.f32.mrf.mxu0 }
 0x702   :  { %v3048_v12 = vadd.f32 %v3047_v28, %v2959_v37  ;;  %v2971_v28 = vadd.f32 %v2970_v8, %v2652_v51  ;;  %v2980_v63 = vpop.f32.mrf.mxu3  ;;  %v4571_v8 = vld [vmem:[%s7586_s11] sm:$0xf]  ;;  %v4884_v51 = vld [vmem:[%s7586_s11 + $0x34] sm:$0xf0] }
 0x704   :  { %4567 = vmatmul.msk.bf16.gmra.mxu0 %vm932_vm3, %v4544_v33  ;;  %v3109_v36 = vmax.f32 %v3048_v12, 0.0  ;;  %v3106_v33 = vmax.f32 %v3040_v39, 0.0 }
 0x709   :  { %v3049_v57 = vpop.f32.mrf.mxu0 }
 0x70a   :  { %v3050_v20 = vadd.f32 %v3049_v57, %v2961_v47  ;;  %v3105_v57 = vmax.f32 %v7169_v5, 0.0  ;;  %v2976_v5 = vadd.f32 %v2975_v19, %v7106_v43  ;;  %v2979_v43 = vadd.f32 %v2978_v3, %v7109_v7 }
 0x70c   :  { %v3110_v30 = vmax.f32 %v3050_v20, 0.0  ;;  %v3133_v38 = vpack.c.bf16 %v3106_v33, %v3105_v57  ;;  %v2981_v20 = vadd.f32 %v2980_v63, %v7083_v9 }
 0x70e   :  { %v3135_v24 = vpack.c.bf16 %v3110_v30, %v3109_v36 }
 0x711   :  { %v3052_v32 = vpop.f32.mrf.mxu0 }
 0x712   :  { %v3053_v6 = vadd.f32 %v3052_v32, %v2964_v11  ;;  %v4878_v11 = vld [vmem:[%s7586_s11 + $0x4] sm:$0xf0] }
 0x713   :  { %v4572_v47 = vor.u32 %v4878_v11, %v4571_v8 }
 0x714   :  { %4568 = vmatmul.msk.bf16.gmra.mxu0 %vm932_vm3, %v4552_v1  ;;  %v3111_v21 = vmax.f32 %v3053_v6, 0.0 }
 0x719   :  { %v3054_v61 = vpop.f32.mrf.mxu0 }
 0x71a   :  { %v3055_v53 = vadd.f32 %v3054_v61, %v2966_v45 }
 0x71c   :  { %v3112_v44 = vmax.f32 %v3055_v53, 0.0  ;;  %v4579_v53 = vld [vmem:[%s7586_s11 + $0x10] sm:$0xf] }
 0x71e   :  { %v3136_v46 = vpack.c.bf16 %v3112_v44, %v3111_v21  ;;  %v4580_v21 = vor.u32 %v4880_v41, %v4579_v53 }
 0x720   :  { %3564 = vmatpush.bf16.msra.mxu1 %v3136_v46 }
 0x721   :  { %v3057_v14 = vpop.f32.mrf.mxu0 }
 0x722   :  { %v3058_v59 = vadd.f32 %v3057_v14, %v2969_v34  ;;  %v4882_v34 = vld [vmem:[%s7586_s11 + $0x24] sm:$0xf0] }
 0x723   :  { %v4588_v39 = vor.u32 %v4882_v34, %v4587_v18 }
 0x724   :  { %3565 = vmatpush.bf16.msra.mxu1 %v3135_v24  ;;  %v3113_v55 = vmax.f32 %v3058_v59, 0.0 }
 0x728   :  { %3566 = vmatpush.bf16.msra.mxu1 %v3134_v42  ;;  %v4595_v42 = vld [vmem:[%s7586_s11 + $0x30] sm:$0xf] }
 0x729   :  { %v3059_v40 = vpop.f32.mrf.mxu0 }
 0x72a   :  { %v3060_v60 = vadd.f32 %v3059_v40, %v2971_v28  ;;  %v4596_v28 = vor.u32 %v4884_v51, %v4595_v42  ;;  %v4581_v42 = vld [vmem:[%s7586_s11 + $0x18] sm:$0xf0] }
 0x72c   :  { %v3114_v26 = vmax.f32 %v3060_v60, 0.0  ;;  %3567 = vmatpush.bf16.msra.mxu1 %v3133_v38  ;;  %v4886_v60 = vld [vmem:[%s7586_s11 + $0x44] sm:$0xf0] }
 0x72e   :  { %v7204_v62 = vpack.c.bf16 %v3114_v26, %v3113_v55 }
 0x730   :  { %3568 = vmatpush.bf16.msra.mxu1 %v7166_v2  ;;  %v2983_v2 = vpop.f32.mrf.mxu3 }
 0x731   :  { %v3062_v1 = vpop.f32.mrf.mxu0  ;;  %v2984_v50 = vadd.f32 %v2983_v2, %v7059_v52 }
 0x732   :  { %v3063_v32 = vadd.f32 %v3062_v1, %v2974_v0  ;;  %v4611_v1 = vld [vmem:[%s7586_s11 + $0x50] sm:$0xf] }
 0x734   :  { %3569 = vmatpush.bf16.msra.mxu1 %v7154_v29  ;;  %v3115_v45 = vmax.f32 %v3063_v32, 0.0  ;;  %v4888_v32 = vld [vmem:[%s7586_s11 + $0x54] sm:$0xf0] }
 0x735   :  { %v4612_v11 = vor.u32 %v4888_v32, %v4611_v1 }
 0x738   :  { %3570 = vmatpush.bf16.msra.mxu1 %v7141_v54  ;;  %v2985_v37 = vpop.f32.mrf.mxu3 }
 0x739   :  { %v3064_v58 = vpop.f32.mrf.mxu0  ;;  %v2986_v46 = vadd.f32 %v2985_v37, %v7104_v16 }
 0x73a   :  { %v3065_v48 = vadd.f32 %v3064_v58, %v2976_v5 }
 0x73c   :  { %v3116_v6 = vmax.f32 %v3065_v48, 0.0  ;;  %3571 = vmatpush.bf16.msra.mxu1 %v7128_v13 }
 0x73e   :  { %v7218_v29 = vpack.c.bf16 %v3116_v6, %v3115_v45  ;;  %v4619_v6 = vld [vmem:[%s7586_s11 + $0x60] sm:$0xf] }
 0x73f   :  { %3572 = vmatmul.bf16.vlgmr.msra.gmra.mxu1 %v4572_v47 }
 0x740   :  { %v2988_v7 = vpop.f32.mrf.mxu3 }
 0x741   :  { %v3067_v54 = vpop.f32.mrf.mxu0  ;;  %v2989_v52 = vadd.f32 %v2988_v7, %v7033_v56  ;;  %v4603_v56 = vld [vmem:[%s7586_s11 + $0x40] sm:$0xf] }
 0x742   :  { %v3068_v61 = vadd.f32 %v3067_v54, %v2979_v43  ;;  %v4604_v26 = vor.u32 %v4886_v60, %v4603_v56  ;;  %v4890_v43 = vld [vmem:[%s7586_s11 + $0x64] sm:$0xf0]  ;;  %v4659_v60 = vld [vmem:[%s7586_s11 + $0xb0] sm:$0xf] }
 0x743   :  { %v4620_v41 = vor.u32 %v4890_v43, %v4619_v6  ;;  %v4675_v43 = vld [vmem:[%s7586_s11 + $0xd0] sm:$0xf] }
 0x744   :  { %v3117_v44 = vmax.f32 %v3068_v61, 0.0 }
 0x748   :  { %v2990_v22 = vpop.f32.mrf.mxu3 }
 0x749   :  { %v3069_v12 = vpop.f32.mrf.mxu0 }
 0x74a   :  { %v3070_v13 = vadd.f32 %v3069_v12, %v2981_v20 }
 0x74c   :  { %v3118_v19 = vmax.f32 %v3070_v13, 0.0 }
 0x74e   :  { %v7228_v10 = vpack.c.bf16 %v3118_v19, %v3117_v44 }
 0x74f   :  { %3577 = vmatmul.bf16.gmra.mxu1 %v4580_v21 }
 0x750   :  { %v2993_v33 = vpop.f32.mrf.mxu3 }
 0x751   :  { %v3072_v9 = vpop.f32.mrf.mxu0  ;;  %v2994_v44 = vadd.f32 %v2993_v33, %v7056_v35  ;;  %v4627_v35 = vld [vmem:[%s7586_s11 + $0x70] sm:$0xf]  ;;  %v4879_v33 = vld [vmem:[%s7586_s11 + $0x14] sm:$0xf] }
 0x752   :  { %v3073_v30 = vadd.f32 %v3072_v9, %v2984_v50  ;;  %v4584_v51 = vor.u32 %v4879_v33, %v4581_v42 }
 0x754   :  { %v3119_v31 = vmax.f32 %v3073_v30, 0.0 }
 0x758   :  { %v2995_v57 = vpop.f32.mrf.mxu3 }
 0x759   :  { %v3074_v36 = vpop.f32.mrf.mxu0 }
 0x75a   :  { %v3075_v14 = vadd.f32 %v3074_v36, %v2986_v46 }
 0x75c   :  { %v3120_v24 = vmax.f32 %v3075_v14, 0.0  ;;  %v4892_v14 = vld [vmem:[%s7586_s11 + $0x74] sm:$0xf0] }
 0x75e   :  { %v7238_v59 = vpack.c.bf16 %v3120_v24, %v3119_v31  ;;  %v4635_v31 = vld [vmem:[%s7586_s11 + $0x80] sm:$0xf]  ;;  %v4894_v24 = vld [vmem:[%s7586_s11 + $0x84] sm:$0xf0] }
 0x75f   :  { %3582 = vmatmul.bf16.gmra.mxu1 %v4588_v39 }
 0x760   :  { %v2998_v38 = vpop.f32.mrf.mxu3 }
 0x761   :  { %v3077_v16 = vpop.f32.mrf.mxu0  ;;  %v2999_v20 = vadd.f32 %v2998_v38, %v6996_v4 }
 0x762   :  { %v3078_v27 = vadd.f32 %v3077_v16, %v2989_v52  ;;  %v4877_v52 = vld [vmem:[%s7586_s11 + $0x4] sm:$0xf]  ;;  %v4636_v16 = vor.u32 %v4894_v24, %v4635_v31 }
 0x763   :  { %v4893_v24 = vld [vmem:[%s7586_s11 + $0x84] sm:$0xf] }
 0x764   :  { %v3121_v39 = vmax.f32 %v3078_v27, 0.0  ;;  %v4643_v27 = vld [vmem:[%s7586_s11 + $0x90] sm:$0xf] }
 0x768   :  { %v3000_v0 = vpop.f32.mrf.mxu3 }
 0x769   :  { %v3079_v3 = vpop.f32.mrf.mxu0  ;;  %v3001_v54 = vadd.f32 %v3000_v0, %v7036_v15  ;;  %v2991_v15 = vadd.f32 %v2990_v22, %v7038_v49  ;;  %v4628_v22 = vor.u32 %v4892_v14, %v4627_v35  ;;  %v4883_v0 = vld [vmem:[%s7586_s11 + $0x34] sm:$0xf] }
 0x76b   :  { %v3080_v4 = vadd.f32 %v3079_v3, %v2991_v15  ;;  %v4651_v3 = vld [vmem:[%s7586_s11 + $0xa0] sm:$0xf] }
 0x76f   :  { %3587 = vmatmul.bf16.gmra.mxu1 %v4596_v28  ;;  %v4898_v28 = vld [vmem:[%s7586_s11 + $0xa4] sm:$0xf0] }
 0x770   :  { %v3003_v8 = vpop.f32.mrf.mxu3  ;;  %v4652_v38 = vor.u32 %v4898_v28, %v4651_v3  ;;  %v4895_v3 = vld [vmem:[%s7586_s11 + $0x94] sm:$0xf]  ;;  %v4645_v28 = vld [vmem:[%s7586_s11 + $0x98] sm:$0xf0] }
 0x771   :  { %v3082_v40 = vpop.f32.mrf.mxu0  ;;  %v3004_v2 = vadd.f32 %v3003_v8, %v6971_v23  ;;  %v4667_v8 = vld [vmem:[%s7586_s11 + $0xc0] sm:$0xf] }
 0x772   :  { %v3083_v9 = vadd.f32 %v3082_v40, %v2994_v44  ;;  %v4589_v40 = vld [vmem:[%s7586_s11 + $0x28] sm:$0xf0] }
 0x773   :  { %v4621_v44 = vld [vmem:[%s7586_s11 + $0x68] sm:$0xf0] }
 0x774   :  { %v3123_v34 = vmax.f32 %v3083_v9, 0.0 }
 0x778   :  { %v3005_v48 = vpop.f32.mrf.mxu3 }
 0x779   :  { %v3084_v55 = vpop.f32.mrf.mxu0  ;;  %v3006_v47 = vadd.f32 %v3005_v48, %v6985_v25  ;;  %v2996_v25 = vadd.f32 %v2995_v57, %v7013_v17  ;;  %v3122_v17 = vmax.f32 %v3080_v4, 0.0  ;;  %v4881_v57 = vld [vmem:[%s7586_s11 + $0x24] sm:$0xf]  ;;  %v4605_v48 = vld [vmem:[%s7586_s11 + $0x48] sm:$0xf0] }
 0x77a   :  { %v4592_v56 = vor.u32 %v4881_v57, %v4589_v40  ;;  %v4691_v4 = vld [vmem:[%s7586_s11 + $0xf0] sm:$0xf] }
 0x77b   :  { %v3085_v19 = vadd.f32 %v3084_v55, %v2996_v25  ;;  %v3141_v49 = vpack.c.bf16 %v3122_v17, %v3121_v39  ;;  %v4900_v55 = vld [vmem:[%s7586_s11 + $0xb4] sm:$0xf0]  ;;  %v4906_v25 = vld [vmem:[%s7586_s11 + $0xe4] sm:$0xf0] }
 0x77c   :  { %v4660_v1 = vor.u32 %v4900_v55, %v4659_v60 }
 0x77d   :  { %v3124_v46 = vmax.f32 %v3085_v19, 0.0 }
 0x77f   :  { %3592 = vmatmul.bf16.gmra.mxu1 %v4604_v26  ;;  %v3142_v36 = vpack.c.bf16 %v3124_v46, %v3123_v34  ;;  %v4908_v46 = vld [vmem:[%s7586_s11 + $0xf4] sm:$0x10]  ;;  %v4629_v34 = vld [vmem:[%s7586_s11 + $0x78] sm:$0xf0] }
 0x781   :  { %v3087_v63 = vpop.f32.mrf.mxu0 }
 0x782   :  { %v3088_v13 = vadd.f32 %v3087_v63, %v2999_v20  ;;  %v4597_v63 = vld [vmem:[%s7586_s11 + $0x38] sm:$0xf0] }
 0x783   :  { %v4600_v32 = vor.u32 %v4883_v0, %v4597_v63 }
 0x784   :  { %v3125_v30 = vmax.f32 %v3088_v13, 0.0  ;;  %v7375_v13 = vpop.permute.xlu0 %3271 }
 0x789   :  { %v3089_v5 = vpop.f32.mrf.mxu0 }
 0x78a   :  { %v3090_v53 = vadd.f32 %v3089_v5, %v3001_v54  ;;  %v4904_v54 = vld [vmem:[%s7586_s11 + $0xd4] sm:$0xf0] }
 0x78b   :  { %v4676_v20 = vor.u32 %v4904_v54, %v4675_v43 }
 0x78c   :  { %v3126_v7 = vmax.f32 %v3090_v53, 0.0  ;;  %v7388_v9 = vpop.permute.xlu0 %3266 }
 0x78e   :  { %v3143_v18 = vpack.c.bf16 %v3126_v7, %v3125_v30 }
 0x78f   :  { %3597 = vmatmul.bf16.gmra.mxu1 %v4612_v11  ;;  %v4902_v11 = vld [vmem:[%s7586_s11 + $0xc4] sm:$0xf0] }
 0x791   :  { %v3092_v58 = vpop.f32.mrf.mxu0 }
 0x792   :  { %v3093_v45 = vadd.f32 %v3092_v58, %v3004_v2  ;;  %v4885_v58 = vld [vmem:[%s7586_s11 + $0x44] sm:$0xf]  ;;  %v4668_v2 = vor.u32 %v4902_v11, %v4667_v8 }
 0x794   :  { %v3127_v23 = vmax.f32 %v3093_v45, 0.0  ;;  %v3242_v14 = vpop.permute.xlu0 %3241 }
 0x799   :  { %v3094_v61 = vpop.f32.mrf.mxu0 }
 0x79a   :  { %v3095_v37 = vadd.f32 %v3094_v61, %v3006_v47  ;;  %v4608_v47 = vor.u32 %v4885_v58, %v4605_v48  ;;  %v4887_v61 = vld [vmem:[%s7586_s11 + $0x54] sm:$0xf]  ;;  %v4653_v58 = vld [vmem:[%s7586_s11 + $0xa8] sm:$0xf0] }
 0x79c   :  { %v3128_v12 = vmax.f32 %v3095_v37, 0.0  ;;  %v4613_v37 = vld [vmem:[%s7586_s11 + $0x58] sm:$0xf0]  ;;  %v3237_v31 = vpop.permute.xlu0 %3236 }
 0x79d   :  { %v4616_v53 = vor.u32 %v4887_v61, %v4613_v37 }
 0x79e   :  { %v3144_v21 = vpack.c.bf16 %v3128_v12, %v3127_v23  ;;  %v7367_v23 = vpop.permute.xlu1 %3281  ;;  %v4683_v12 = vld [vmem:[%s7586_s11 + $0xe0] sm:$0xf] }
 0x79f   :  { %3602 = vmatmul.bf16.gmra.mxu1 %v4620_v41  ;;  %v4684_v7 = vor.u32 %v4906_v25, %v4683_v12 }
 0x7a0   :  { %v3562_v50 = vsel %vm421_vm1, %v3144_v21, 0  ;;  %v4889_v21 = vld [vmem:[%s7586_s11 + $0x64] sm:$0xf] }
 0x7a1   :  { %3653 = vmatpush.bf16.msra.mxu2 %v3562_v50  ;;  %v4624_v50 = vor.u32 %v4889_v21, %v4621_v44  ;;  %v4661_v21 = vld [vmem:[%s7586_s11 + $0xb8] sm:$0xf0] }
 0x7a5   :  { %3654 = vmatpush.bf16.msra.mxu2 %v3143_v18  ;;  %v4891_v18 = vld [vmem:[%s7586_s11 + $0x74] sm:$0xf] }
 0x7a6   :  { %v7386_v15 = vpop.permute.xlu1 %3276  ;;  %v4632_v35 = vor.u32 %v4891_v18, %v4629_v34 }
 0x7a9   :  { %3655 = vmatpush.bf16.msra.mxu2 %v3142_v36  ;;  %v4692_v36 = vor.u32 %v4908_v46, %v4691_v4 }
 0x7ad   :  { %3656 = vmatpush.bf16.msra.mxu2 %v3141_v49  ;;  %v7409_v49 = vpop.permute.xlu2 %3286 }
 0x7ae   :  { %v7404_v17 = vpop.permute.xlu1 %3251 }
 0x7af   :  { %3607 = vmatmul.bf16.gmra.mxu1 %v4628_v22 }
 0x7b1   :  { %3657 = vmatpush.bf16.msra.mxu2 %v7238_v59  ;;  %v4573_v59 = vld [vmem:[%s7586_s11 + $0x8] sm:$0xf0] }
 0x7b5   :  { %3658 = vmatpush.bf16.msra.mxu2 %v7228_v10  ;;  %v4576_v10 = vor.u32 %v4877_v52, %v4573_v59  ;;  %v4637_v52 = vld [vmem:[%s7586_s11 + $0x88] sm:$0xf0]  ;;  %v7417_v59 = vpop.permute.xlu2 %3261 }
 0x7b6   :  { %v3247_v22 = vpop.permute.xlu1 %3246 }
 0x7b9   :  { %3659 = vmatpush.bf16.msra.mxu2 %v7218_v29  ;;  %v4896_v29 = vld [vmem:[%s7586_s11 + $0x94] sm:$0xf0] }
 0x7bc   :  { %v3573_v26 = vpop.f32.mrf.mxu1 }
 0x7bd   :  { %3660 = vmatpush.bf16.msra.mxu2 %v7204_v62  ;;  %v4644_v62 = vor.u32 %v4896_v29, %v4643_v27  ;;  %v3212_v27 = vpop.permute.xlu0 %3211 }
 0x7be   :  { %v3574_v29 = vadd.f32 %v3573_v26, %v3212_v27 }
 0x7bf   :  { %3612 = vmatmul.bf16.gmra.mxu1 %v4636_v16  ;;  %v4640_v16 = vor.u32 %v4893_v24, %v4637_v52 }
 0x7c0   :  { %4697 = vmatmul.msk.bf16.vlgmr.msra.gmra.mxu2 %vm932_vm3, %v4576_v10  ;;  %v3222_v10 = vpop.permute.xlu1 %3221 }
 0x7c4   :  { %v3575_v5 = vpop.f32.mrf.mxu1 }
 0x7cc   :  { %v7347_v45 = vpop.f32.mrf.mxu1 }
 0x7cf   :  { %3617 = vmatmul.bf16.gmra.mxu1 %v4644_v62  ;;  %v7420_v62 = vpop.permute.xlu2 %3256 }
 0x7d0   :  { %4698 = vmatmul.msk.bf16.gmra.mxu2 %vm932_vm3, %v4584_v51  ;;  %v3217_v51 = vpop.permute.xlu1 %3216 }
 0x7d1   :  { %v3576_v57 = vadd.f32 %v3575_v5, %v3217_v51  ;;  %v4897_v5 = vld [vmem:[%s7586_s11 + $0xa4] sm:$0xf] }
 0x7d2   :  { %v4656_v54 = vor.u32 %v4897_v5, %v4653_v58 }
 0x7d4   :  { %v7350_v6 = vpop.f32.mrf.mxu1 }
 0x7d7   :  { %v3232_v26 = vpop.permute.xlu2 %3231 }
 0x7dc   :  { %v7365_v41 = vpop.f32.mrf.mxu1 }
 0x7df   :  { %3622 = vmatmul.bf16.gmra.mxu1 %v4652_v38  ;;  %v3227_v11 = vpop.permute.xlu2 %3226 }
 0x7e0   :  { %4699 = vmatmul.msk.bf16.gmra.mxu2 %vm932_vm3, %v4592_v56  ;;  %v4648_v56 = vor.u32 %v4895_v3, %v4645_v28  ;;  %v3581_v48 = vadd.f32 %v7350_v6, %v3227_v11  ;;  %v4899_v6 = vld [vmem:[%s7586_s11 + $0xb4] sm:$0xf] }
 0x7e1   :  { %v4664_v4 = vor.u32 %v4899_v6, %v4661_v21 }
 0x7e4   :  { %v7383_v19 = vpop.f32.mrf.mxu1 }
 0x7e5   :  { %v3586_v44 = vadd.f32 %v7383_v19, %v3237_v31  ;;  %v4669_v19 = vld [vmem:[%s7586_s11 + $0xc8] sm:$0xf0] }
 0x7ec   :  { %v7390_v30 = vpop.f32.mrf.mxu1 }
 0x7ef   :  { %3627 = vmatmul.bf16.gmra.mxu1 %v4660_v1  ;;  %v3579_v1 = vadd.f32 %v7347_v45, %v3222_v10 }
 0x7f0   :  { %4700 = vmatmul.msk.bf16.gmra.mxu2 %vm932_vm3, %v4600_v32 }
 0x7f4   :  { %v7406_v39 = vpop.f32.mrf.mxu1 }
 0x7f5   :  { %v3591_v31 = vadd.f32 %v7406_v39, %v3247_v22  ;;  %v4677_v39 = vld [vmem:[%s7586_s11 + $0xd8] sm:$0xf0] }
 0x7fc   :  { %v3593_v63 = vpop.f32.mrf.mxu1 }
 0x7ff   :  { %3632 = vmatmul.bf16.gmra.mxu1 %v4668_v2 }
 0x800   :  { %4701 = vmatmul.msk.bf16.gmra.mxu2 %vm932_vm3, %v4608_v47 }
 0x804   :  { %v7439_v2 = vpop.f32.mrf.mxu1 }
 0x80c   :  { %v7445_v25 = vpop.f32.mrf.mxu1 }
 0x80f   :  { %3637 = vmatmul.bf16.gmra.mxu1 %v4676_v20  ;;  %v3584_v20 = vadd.f32 %v7365_v41, %v3232_v26  ;;  %v4905_v26 = vld [vmem:[%s7586_s11 + $0xe4] sm:$0xf] }
 0x810   :  { %4702 = vmatmul.msk.bf16.gmra.mxu2 %vm932_vm3, %v4616_v53 }
 0x814   :  { %v3600_v41 = vpop.f32.mrf.mxu1 }
 0x81c   :  { %v3603_v52 = vpop.f32.mrf.mxu1 }
 0x81f   :  { %3642 = vmatmul.bf16.gmra.mxu1 %v4684_v7 }
 0x820   :  { %4703 = vmatmul.msk.bf16.gmra.mxu2 %vm932_vm3, %v4624_v50 }
 0x824   :  { %v3605_v51 = vpop.f32.mrf.mxu1 }
 0x82f   :  { %3647 = vmatmul.bf16.gmra.mxu1 %v4692_v36  ;;  %v3589_v36 = vadd.f32 %v7390_v30, %v3242_v14  ;;  %v3594_v14 = vadd.f32 %v3593_v63, %v7404_v17  ;;  %v4685_v63 = vld [vmem:[%s7586_s11 + $0xe8] sm:$0xf0] }
 0x830   :  { %4704 = vmatmul.msk.bf16.gmra.mxu2 %vm932_vm3, %v4632_v35 }
 0x840   :  { %4705 = vmatmul.msk.bf16.gmra.mxu2 %vm932_vm3, %v4640_v16  ;;  %v4901_v16 = vld [vmem:[%s7586_s11 + $0xc4] sm:$0xf] }
 0x843   :  { %v3662_v33 = vpop.f32.mrf.mxu2 }
 0x844   :  { %v3663_v42 = vadd.f32 %v3662_v33, %v3574_v29  ;;  %v4672_v29 = vor.u32 %v4901_v16, %v4669_v19  ;;  %v3601_v19 = vadd.f32 %v3600_v41, %v7388_v9 }
 0x846   :  { %v3742_v60 = vmax.f32 %v3663_v42, 0.0 }
 0x84b   :  { %v3664_v40 = vpop.f32.mrf.mxu2 }
 0x84c   :  { %v3665_v38 = vadd.f32 %v3664_v40, %v3576_v57  ;;  %v4903_v57 = vld [vmem:[%s7586_s11 + $0xd4] sm:$0xf] }
 0x84d   :  { %v4680_v40 = vor.u32 %v4903_v57, %v4677_v39 }
 0x84e   :  { %v3743_v55 = vmax.f32 %v3665_v38, 0.0  ;;  %v3608_v38 = vpop.f32.mrf.mxu1 }
 0x850   :  { %4706 = vmatmul.msk.bf16.gmra.mxu2 %vm932_vm3, %v4648_v56  ;;  %v7429_v0 = vpack.c.bf16 %v3743_v55, %v3742_v60  ;;  %v7478_v60 = vpop.permute.xlu2 %3361  ;;  %v7480_v55 = vpop.permute.xlu1 %3351 }
 0x853   :  { %v3667_v32 = vpop.f32.mrf.mxu2 }
 0x854   :  { %v3668_v8 = vadd.f32 %v3667_v32, %v3579_v1  ;;  %v4688_v32 = vor.u32 %v4905_v26, %v4685_v63 }
 0x856   :  { %v3744_v61 = vmax.f32 %v3668_v8, 0.0  ;;  %v3610_v17 = vpop.f32.mrf.mxu1 }
 0x858   :  { %v7488_v8 = vpop.permute.xlu2 %3356  ;;  %v7491_v5 = vpop.permute.xlu1 %3346 }
 0x85b   :  { %v3669_v47 = vpop.f32.mrf.mxu2 }
 0x85c   :  { %v3670_v43 = vadd.f32 %v3669_v47, %v3581_v48  ;;  %v4907_v48 = vld [vmem:[%s7586_s11 + $0xf4] sm:$0xf]  ;;  %v4693_v47 = vld [vmem:[%s7586_s11 + $0xf8] sm:$0x10] }
 0x85e   :  { %v3745_v45 = vmax.f32 %v3670_v43, 0.0  ;;  %v3613_v11 = vpop.f32.mrf.mxu1 }
 0x860   :  { %4707 = vmatmul.msk.bf16.gmra.mxu2 %vm932_vm3, %v4656_v54  ;;  %v7442_v37 = vpack.c.bf16 %v3745_v45, %v3744_v61  ;;  %v7499_v43 = vpop.permute.xlu2 %3331  ;;  %v4696_v45 = vor.u32 %v4907_v48, %v4693_v47 }
 0x863   :  { %v3672_v53 = vpop.f32.mrf.mxu2 }
 0x864   :  { %v3673_v12 = vadd.f32 %v3672_v53, %v3584_v20  ;;  %v7501_v20 = vpop.permute.xlu1 %3321  ;;  %v7504_v53 = vpop.permute.xlu0 %3366 }
 0x866   :  { %v3746_v46 = vmax.f32 %v3673_v12, 0.0  ;;  %v3615_v54 = vpop.f32.mrf.mxu1 }
 0x868   :  { %v7506_v6 = vpop.permute.xlu2 %3326 }
 0x86b   :  { %v3674_v7 = vpop.f32.mrf.mxu2 }
 0x86c   :  { %v3675_v50 = vadd.f32 %v3674_v7, %v3586_v44  ;;  %v7508_v44 = vpop.permute.xlu1 %3316  ;;  %v3609_v7 = vadd.f32 %v3608_v38, %v7367_v23  ;;  %v3599_v23 = vadd.f32 %v7445_v25, %v7417_v59 }
 0x86e   :  { %v3747_v18 = vmax.f32 %v3675_v50, 0.0  ;;  %v3618_v21 = vpop.f32.mrf.mxu1  ;;  %v3606_v50 = vadd.f32 %v3605_v51, %v7386_v15  ;;  %v3596_v51 = vadd.f32 %v7439_v2, %v7420_v62 }
 0x870   :  { %4708 = vmatmul.msk.bf16.gmra.mxu2 %vm932_vm3, %v4664_v4  ;;  %v7455_v34 = vpack.c.bf16 %v3747_v18, %v3746_v46  ;;  %v3611_v4 = vadd.f32 %v3610_v17, %v7409_v49  ;;  %v7513_v18 = vpop.permute.xlu0 %3341 }
 0x873   :  { %v3677_v35 = vpop.f32.mrf.mxu2 }
 0x874   :  { %v3678_v24 = vadd.f32 %v3677_v35, %v3589_v36  ;;  %v3604_v35 = vadd.f32 %v3603_v52, %v7375_v13 }
 0x876   :  { %v3748_v33 = vmax.f32 %v3678_v24, 0.0 }
 0x878   :  { %v7521_v38 = vpop.permute.xlu0 %3336 }
 0x87b   :  { %v3679_v10 = vpop.f32.mrf.mxu2 }
 0x87c   :  { %v3680_v27 = vadd.f32 %v3679_v10, %v3591_v31 }
 0x87e   :  { %v3749_v42 = vmax.f32 %v3680_v27, 0.0 }
 0x880   :  { %4709 = vmatmul.msk.bf16.gmra.mxu2 %vm932_vm3, %v4672_v29  ;;  %v7466_v30 = vpack.c.bf16 %v3749_v42, %v3748_v33  ;;  %v3302_v29 = vpop.permute.xlu2 %3301  ;;  %v3620_v33 = vpop.f32.mrf.mxu1 }
 0x881   :  { %v3619_v47 = vadd.f32 %v3618_v21, %v3302_v29 }
 0x883   :  { %v3682_v3 = vpop.f32.mrf.mxu2 }
 0x884   :  { %v7469_v28 = vadd.f32 %v3682_v3, %v3594_v14  ;;  %v3292_v14 = vpop.permute.xlu1 %3291 }
 0x885   :  { %v3614_v13 = vadd.f32 %v3613_v11, %v3292_v14 }
 0x886   :  { %v3750_v62 = vmax.f32 %v7469_v28, 0.0 }
 0x888   :  { %v3297_v26 = vpop.permute.xlu2 %3296  ;;  %v3623_v63 = vpop.f32.mrf.mxu1 }
 0x88b   :  { %v3684_v22 = vpop.f32.mrf.mxu2 }
 0x88c   :  { %v3685_v41 = vadd.f32 %v3684_v22, %v3596_v51 }
 0x88e   :  { %v3751_v59 = vmax.f32 %v3685_v41, 0.0 }
 0x890   :  { %4710 = vmatmul.msk.bf16.gmra.mxu2 %vm932_vm3, %v4680_v40 }
 0x893   :  { %v3687_v56 = vpop.f32.mrf.mxu2 }
 0x894   :  { %v3688_v52 = vadd.f32 %v3687_v56, %v3599_v23  ;;  %v3778_v56 = vpack.c.bf16 %v3751_v59, %v3750_v62 }
 0x896   :  { %v3752_v17 = vmax.f32 %v3688_v52, 0.0 }
 0x89b   :  { %v3689_v1 = vpop.f32.mrf.mxu2 }
 0x89c   :  { %v3690_v15 = vadd.f32 %v3689_v1, %v3601_v19  ;;  %v3616_v1 = vadd.f32 %v3615_v54, %v3297_v26 }
 0x89e   :  { %v3753_v57 = vmax.f32 %v3690_v15, 0.0 }
 0x8a0   :  { %4711 = vmatmul.msk.bf16.gmra.mxu2 %vm932_vm3, %v4688_v32  ;;  %v3779_v25 = vpack.c.bf16 %v3753_v57, %v3752_v17 }
 0x8a3   :  { %v3692_v58 = vpop.f32.mrf.mxu2 }
 0x8a4   :  { %v3693_v31 = vadd.f32 %v3692_v58, %v3604_v35  ;;  %v3312_v58 = vpop.permute.xlu0 %3311 }
 0x8a6   :  { %v3754_v3 = vmax.f32 %v3693_v31, 0.0 }
 0x8ab   :  { %v3694_v61 = vpop.f32.mrf.mxu2 }
 0x8ac   :  { %v3695_v24 = vadd.f32 %v3694_v61, %v3606_v50  ;;  %v3625_v61 = vpop.f32.mrf.mxu1  ;;  %v3307_v54 = vpop.permute.xlu0 %3306  ;;  %v4910_v50 = vld [vmem:[%s7588_s13 + $0x4] sm:$0xf0] }
 0x8ad   :  { %v3621_v28 = vadd.f32 %v3620_v33, %v3307_v54  ;;  %v3626_v31 = vadd.f32 %v3625_v61, %v7508_v44 }
 0x8ae   :  { %v3755_v49 = vmax.f32 %v3695_v24, 0.0 }
 0x8b0   :  { %4712 = vmatmul.msk.bf16.gmra.mxu2 %vm932_vm3, %v4696_v45  ;;  %v3780_v39 = vpack.c.bf16 %v3755_v49, %v3754_v3 }
 0x8b3   :  { %v3697_v12 = vpop.f32.mrf.mxu2 }
 0x8b4   :  { %v3698_v46 = vadd.f32 %v3697_v12, %v3609_v7  ;;  %v4715_v7 = vld [vmem:[%s7588_s13] sm:$0xf] }
 0x8b6   :  { %v3756_v10 = vmax.f32 %v3698_v46, 0.0  ;;  %v4716_v46 = vor.u32 %v4910_v50, %v4715_v7 }
 0x8bb   :  { %v3699_v36 = vpop.f32.mrf.mxu2 }
 0x8bc   :  { %v3700_v16 = vadd.f32 %v3699_v36, %v3611_v4 }
 0x8be   :  { %v3757_v27 = vmax.f32 %v3700_v16, 0.0 }
 0x8c0   :  { %v3781_v42 = vpack.c.bf16 %v3757_v27, %v3756_v10  ;;  %v4723_v10 = vld [vmem:[%s7588_s13 + $0x10] sm:$0xf]  ;;  %v4912_v27 = vld [vmem:[%s7588_s13 + $0x14] sm:$0x10] }
 0x8c2   :  { %3845 = vmatpush.bf16.msrb.mxu3 %v3781_v42 }
 0x8c3   :  { %v3702_v9 = vpop.f32.mrf.mxu2 }
 0x8c4   :  { %v3703_v40 = vadd.f32 %v3702_v9, %v3614_v13 }
 0x8c6   :  { %3846 = vmatpush.bf16.msrb.mxu3 %v3780_v39  ;;  %v3758_v11 = vmax.f32 %v3703_v40, 0.0 }
 0x8ca   :  { %3847 = vmatpush.bf16.msrb.mxu3 %v3779_v25 }
 0x8cb   :  { %v3704_v2 = vpop.f32.mrf.mxu2 }
 0x8cc   :  { %v3705_v32 = vadd.f32 %v3704_v2, %v3616_v1 }
 0x8ce   :  { %v3759_v22 = vmax.f32 %v3705_v32, 0.0  ;;  %3848 = vmatpush.bf16.msrb.mxu3 %v3778_v56 }
 0x8d0   :  { %v7524_v48 = vpack.c.bf16 %v3759_v22, %v3758_v11 }
 0x8d2   :  { %3849 = vmatpush.bf16.msrb.mxu3 %v7466_v30  ;;  %v3628_v30 = vpop.f32.mrf.mxu1 }
 0x8d3   :  { %v3707_v45 = vpop.f32.mrf.mxu2  ;;  %v3629_v14 = vadd.f32 %v3628_v30, %v7501_v20 }
 0x8d4   :  { %v3708_v12 = vadd.f32 %v3707_v45, %v3619_v47 }
 0x8d6   :  { %3850 = vmatpush.bf16.msrb.mxu3 %v7455_v34  ;;  %v3760_v36 = vmax.f32 %v3708_v12, 0.0 }
 0x8da   :  { %3851 = vmatpush.bf16.msrb.mxu3 %v7442_v37  ;;  %v3624_v37 = vadd.f32 %v3623_v63, %v3312_v58  ;;  %v3630_v19 = vpop.f32.mrf.mxu1 }
 0x8db   :  { %v3709_v21 = vpop.f32.mrf.mxu2  ;;  %v3631_v13 = vadd.f32 %v3630_v19, %v7506_v6 }
 0x8dc   :  { %v3710_v4 = vadd.f32 %v3709_v21, %v3621_v28 }
 0x8de   :  { %v3761_v35 = vmax.f32 %v3710_v4, 0.0  ;;  %3852 = vmatpush.bf16.msrb.mxu3 %v7429_v0  ;;  %v4724_v0 = vor.u32 %v4912_v27, %v4723_v10 }
 0x8e0   :  { %v7536_v34 = vpack.c.bf16 %v3761_v35, %v3760_v36 }
 0x8e1   :  { %3853 = vmatmul.bf16.vlgmr.msrb.gmra.mxu3 %v4716_v46 }
 0x8e2   :  { %v3633_v42 = vpop.f32.mrf.mxu1 }
 0x8e3   :  { %v3712_v24 = vpop.f32.mrf.mxu2  ;;  %v3634_v40 = vadd.f32 %v3633_v42, %v7499_v43 }
 0x8e4   :  { %v3713_v16 = vadd.f32 %v3712_v24, %v3624_v37 }
 0x8e6   :  { %v3762_v23 = vmax.f32 %v3713_v16, 0.0 }
 0x8ea   :  { %v3635_v52 = vpop.f32.mrf.mxu1 }
 0x8eb   :  { %v3714_v29 = vpop.f32.mrf.mxu2  ;;  %v3636_v35 = vadd.f32 %v3635_v52, %v7521_v38  ;;  %v4717_v38 = vld [vmem:[%s7588_s13 + $0x8] sm:$0xf0] }
 0x8ec   :  { %v3715_v33 = vadd.f32 %v3714_v29, %v3626_v31 }
 0x8ee   :  { %v3763_v15 = vmax.f32 %v3715_v33, 0.0  ;;  %v4911_v33 = vld [vmem:[%s7588_s13 + $0x14] sm:$0xf] }
 0x8f0   :  { %v3784_v49 = vpack.c.bf16 %v3763_v15, %v3762_v23 }
 0x8f1   :  { %3858 = vmatmul.bf16.gmra.mxu3 %v4724_v0 }
 0x8f2   :  { %v3638_v25 = vpop.f32.mrf.mxu1 }
 0x8f3   :  { %v3717_v51 = vpop.f32.mrf.mxu2  ;;  %v3639_v46 = vadd.f32 %v3638_v25, %v7513_v18  ;;  %v4909_v18 = vld [vmem:[%s7588_s13 + $0x4] sm:$0xf] }
 0x8f4   :  { %v3718_v44 = vadd.f32 %v3717_v51, %v3629_v14  ;;  %v4720_v29 = vor.u32 %v4909_v18, %v4717_v38  ;;  %v3801_v14 = vpop.permute.xlu0 %3800 }
 0x8f6   :  { %v3764_v41 = vmax.f32 %v3718_v44, 0.0 }
 0x8fa   :  { %v3640_v63 = vpop.f32.mrf.mxu1 }
 0x8fb   :  { %v3719_v3 = vpop.f32.mrf.mxu2  ;;  %v3641_v21 = vadd.f32 %v3640_v63, %v7491_v5 }
 0x8fc   :  { %v3720_v9 = vadd.f32 %v3719_v3, %v3631_v13  ;;  %v3806_v13 = vpop.permute.xlu1 %3805 }
 0x8fe   :  { %v3765_v57 = vmax.f32 %v3720_v9, 0.0 }
 0x900   :  { %v3785_v39 = vpack.c.bf16 %v3765_v57, %v3764_v41  ;;  %v3811_v41 = vpop.permute.xlu2 %3810 }
 0x902   :  { %v3643_v62 = vpop.f32.mrf.mxu1 }
 0x903   :  { %v3722_v17 = vpop.f32.mrf.mxu2  ;;  %v3644_v54 = vadd.f32 %v3643_v62, %v7480_v55 }
 0x904   :  { %v3723_v59 = vadd.f32 %v3722_v17, %v3634_v40  ;;  %v3816_v17 = vpop.permute.xlu0 %3815 }
 0x906   :  { %v3766_v10 = vmax.f32 %v3723_v59, 0.0 }
 0x90a   :  { %v3645_v2 = vpop.f32.mrf.mxu1 }
 0x90b   :  { %v3724_v26 = vpop.f32.mrf.mxu2  ;;  %v3646_v43 = vadd.f32 %v3645_v2, %v7488_v8 }
 0x90c   :  { %v3725_v24 = vadd.f32 %v3724_v26, %v3636_v35 }
 0x90e   :  { %v3767_v31 = vmax.f32 %v3725_v24, 0.0 }
 0x910   :  { %v3786_v27 = vpack.c.bf16 %v3767_v31, %v3766_v10 }
 0x912   :  { %v3648_v6 = vpop.f32.mrf.mxu1 }
 0x913   :  { %v3727_v1 = vpop.f32.mrf.mxu2  ;;  %v3649_v58 = vadd.f32 %v3648_v6, %v7478_v60 }
 0x914   :  { %v3728_v8 = vadd.f32 %v3727_v1, %v3639_v46 }
 0x916   :  { %v3768_v19 = vmax.f32 %v3728_v8, 0.0 }
 0x91a   :  { %v3650_v22 = vpop.f32.mrf.mxu1 }
 0x91b   :  { %v3729_v20 = vpop.f32.mrf.mxu2  ;;  %v3651_v47 = vadd.f32 %v3650_v22, %v7504_v53 }
 0x91c   :  { %v3730_v36 = vadd.f32 %v3729_v20, %v3641_v21 }
 0x91e   :  { %v3769_v55 = vmax.f32 %v3730_v36, 0.0 }
 0x920   :  { %v3787_v5 = vpack.c.bf16 %v3769_v55, %v3768_v19 }
 0x923   :  { %v3732_v56 = vpop.f32.mrf.mxu2 }
 0x924   :  { %v3733_v4 = vadd.f32 %v3732_v56, %v3644_v54 }
 0x926   :  { %v3770_v37 = vmax.f32 %v3733_v4, 0.0 }
 0x92b   :  { %v3734_v32 = vpop.f32.mrf.mxu2 }
 0x92c   :  { %v3735_v28 = vadd.f32 %v3734_v32, %v3646_v43 }
 0x92e   :  { %v3771_v60 = vmax.f32 %v3735_v28, 0.0 }
 0x930   :  { %v3788_v16 = vpack.c.bf16 %v3771_v60, %v3770_v37 }
 0x933   :  { %v3737_v11 = vpop.f32.mrf.mxu2 }
 0x934   :  { %v3738_v61 = vadd.f32 %v3737_v11, %v3649_v58 }
 0x936   :  { %v3772_v7 = vmax.f32 %v3738_v61, 0.0 }
 0x93b   :  { %v3739_v45 = vpop.f32.mrf.mxu2 }
 0x93c   :  { %v3740_v12 = vadd.f32 %v3739_v45, %v3651_v47 }
 0x93e   :  { %v3773_v50 = vmax.f32 %v3740_v12, 0.0 }
 0x940   :  { %v3789_v30 = vpack.c.bf16 %v3773_v50, %v3772_v7 }
 0x942   :  { %v3843_v53 = vsel %vm421_vm1, %v3789_v30, 0 }
 0x943   :  { %3864 = vmatpush.bf16.msra.mxu3 %v3843_v53 }
 0x947   :  { %3865 = vmatpush.bf16.msra.mxu3 %v3788_v16 }
 0x94b   :  { %3866 = vmatpush.bf16.msra.mxu3 %v3787_v5 }
 0x94f   :  { %3867 = vmatpush.bf16.msra.mxu3 %v3786_v27 }
 0x953   :  { %3868 = vmatpush.bf16.msra.mxu3 %v3785_v39 }
 0x957   :  { %3869 = vmatpush.bf16.msra.mxu3 %v3784_v49 }
 0x95b   :  { %3870 = vmatpush.bf16.msra.mxu3 %v7536_v34  ;;  %v4725_v34 = vld [vmem:[%s7588_s13 + $0x18] sm:$0x10]  ;;  %s4967_s13 = smov [#allocation2]  }
 0x95c   :  { %v4728_v0 = vor.u32 %v4911_v33, %v4725_v34  ;;  %s3891_s17 = sshll.u32 %s4967_s13, 4  ;;  %s3892_s17 = int_to_ptr.vmem [resolvable:$true] %s3891_s17 }
 0x95f   :  { %3871 = vmatpush.bf16.msra.mxu3 %v7524_v48 }
 0x962   :  { %4729 = vmatmul.msk.bf16.vlgmr.msra.gmra.mxu3 %vm932_vm3, %v4720_v29 }
 0x964   :  { %v3854_v23 = vpop.f32.mrf.mxu3 }
 0x965   :  { %v3855_v51 = vadd.f32 %v3854_v23, %v3801_v14 }
 0x96c   :  { %v3856_v15 = vpop.f32.mrf.mxu3 }
 0x96d   :  { %v3857_v52 = vadd.f32 %v3856_v15, %v3806_v13 }
 0x972   :  { %4730 = vmatmul.msk.bf16.gmra.mxu3 %vm932_vm3, %v4728_v0 }
 0x974   :  { %v3859_v49 = vpop.f32.mrf.mxu3 }
 0x975   :  { %v3860_v57 = vadd.f32 %v3859_v49, %v3811_v41 }
 0x97c   :  { %v3861_v42 = vpop.f32.mrf.mxu3 }
 0x97d   :  { %v3862_v59 = vadd.f32 %v3861_v42, %v3816_v17 }
 0x9e5   :  { %v3873_v48 = vpop.f32.mrf.mxu3 }
 0x9e6   :  { %v3874_v44 = vadd.f32 %v3873_v48, %v3855_v51 }
 0x9e8   :  { %3883 = vst [vmem:[#allocation2] sm:$0xff] %v3874_v44 }
 0x9ed   :  { %v3875_v3 = vpop.f32.mrf.mxu3 }
 0x9ee   :  { %v3876_v9 = vadd.f32 %v3875_v3, %v3857_v52 }
 0x9f0   :  { %3884 = vst [vmem:[#allocation2 + $0x8] sm:$0xff] %v3876_v9 }
 0x9f5   :  { %v3878_v39 = vpop.f32.mrf.mxu3 }
 0x9f6   :  { %v3879_v40 = vadd.f32 %v3878_v39, %v3860_v57 }
 0x9f8   :  { %3885 = vst [vmem:[#allocation2 + $0x10] sm:$0xff] %v3879_v40 }
 0x9fd   :  { %v3880_v25 = vpop.f32.mrf.mxu3 }
 0x9fe   :  { %v3881_v26 = vadd.f32 %v3880_v25, %v3862_v59 }
 0xa00   :  { %3886 = vst [vmem:[#allocation2 + $0x18] sm:$0x1] %v3881_v26 }
 0xa01   :  { %3899 = dma.vmem_to_hbm [thread:$0]  %s3892_s17, 512, %s3894_s19, [#allocation3], %s4968_s3, %s4968_s3, %s4969_s7  }
 0xa02   :  { %4963 = dma.done.wait [#allocation3], 512  }
 0xa03   :  { %4964 = vsyncadd [#allocation3], 4294966784 }
 0xa04   :  { %3904 = vsyncpa [#allocation3], 1 }

</bundles_post_ra>
